<compile_context>
chip_gen: v7x
topology: tpu7x:2x2x1
jax: 0.10.0
libtpu: 0.0.40
codegen_flags: <defaults>
</compile_context>

<pallas_src>
import math

import jax
import jax.numpy as jnp
from jax.experimental import pallas as pl
from jax.experimental.pallas import tpu as pltpu

# ----------------------------- config (scaled-down byt5-small) -----------------------------
B        = 2      # batch
S_ENC    = 16     # neuro sequence length
S_DEC    = 8      # label sequence length
D_IN     = 256    # neuro feature dim (nn.Linear(256, d_model))
D_MODEL  = 128    # byt5-small: 1472 (pad to 1536 at real scale for lane alignment)
N_HEADS  = 2      # byt5-small: 6
D_KV     = 64     # byt5-small: 64
D_INNER  = N_HEADS * D_KV
D_FF     = 256    # byt5-small: 3584
VOCAB    = 384    # byt5 vocab size
ENC_LAYERS = 2    # byt5-small: 12
DEC_LAYERS = 2    # byt5-small: 4
REL_BUCKETS = 32
REL_MAXDIST = 128
LN_EPS   = 1e-6
NEG      = -1e9
PAD_ID   = 0
DEC_START_ID = 0
IGNORE   = -100

# Explicit scoped-VMEM budget (fits v5e/v6e 128 MiB and v7x 64 MiB physical VMEM).
VMEM_LIMIT = 32 * 1024 * 1024

# Tile preferences — sweep per chip (v6e/v7x: >=256 rows / 256 lanes; v5e: 128-lane N tiles).
TM_PREF = 256     # row (sublane) tile
TN_PREF = 256     # output lane tile
TK_PREF = 128     # K tile (small here so the accumulator/K-pipeline path is exercised)


# ----------------------------------- tile pickers -------------------------------------------

def _sub_tile(dim, pref):
    """Row tile: divides dim and is a multiple of 8 (or the full dim)."""
    if dim <= pref:
        return dim
    t = (pref // 8) * 8
    while t >= 8:
        if dim % t == 0:
            return t
        t -= 8
    return dim


def _lane_tile(dim, pref):
    """Lane tile: divides dim and is a multiple of 128 (or the full dim)."""
    if dim <= pref:
        return dim
    t = (pref // 128) * 128
    while t >= 128:
        if dim % t == 0:
            return t
        t -= 128
    return dim


def _params(dims):
    return pltpu.CompilerParams(dimension_semantics=dims, vmem_limit_bytes=VMEM_LIMIT)


# -------------------------- Pallas kernel 1: tiled matmul (+bias/+residual) -----------------

def _make_mm_kernel(has_bias, has_res):
    def kernel(*refs):
        a_ref, b_ref = refs[0], refs[1]
        idx = 2
        bias_ref = None
        res_ref = None
        if has_bias:
            bias_ref = refs[idx]; idx += 1
        if has_res:
            res_ref = refs[idx]; idx += 1
        o_ref, acc_ref = refs[idx], refs[idx + 1]

        @pl.when(pl.program_id(2) == 0)
        def _():
            acc_ref[...] = jnp.zeros_like(acc_ref)

        acc_ref[...] += jnp.dot(a_ref[...], b_ref[...],
                                preferred_element_type=jnp.float32)

        @pl.when(pl.program_id(2) == pl.num_programs(2) - 1)
        def _():
            out = acc_ref[...]
            if has_bias:
                out = out + bias_ref[...]
            if has_res:
                out = out + res_ref[...]
            o_ref[...] = out
    return kernel


def pallas_matmul(a, b, bias=None, residual=None,
                  tm_pref=TM_PREF, tn_pref=TN_PREF, tk_pref=TK_PREF):
    """a: (M, K), b: (K, N) -> (M, N) f32, with optional bias row / residual folded in."""
    M, K = a.shape
    K2, N = b.shape
    assert K == K2
    tm = _sub_tile(M, tm_pref)
    tn = _lane_tile(N, tn_pref)
    tk = _lane_tile(K, tk_pref)
    grid = (M // tm, N // tn, K // tk)

    in_specs = [pl.BlockSpec((tm, tk), lambda i, j, k: (i, k)),
                pl.BlockSpec((tk, tn), lambda i, j, k: (k, j))]
    args = [a, b]
    if bias is not None:
        in_specs.append(pl.BlockSpec((1, tn), lambda i, j, k: (0, j)))
        args.append(bias.reshape(1, N))
    if residual is not None:
        in_specs.append(pl.BlockSpec((tm, tn), lambda i, j, k: (i, j)))
        args.append(residual)

    return pl.pallas_call(
        _make_mm_kernel(bias is not None, residual is not None),
        out_shape=jax.ShapeDtypeStruct((M, N), jnp.float32),
        grid=grid,
        in_specs=in_specs,
        out_specs=pl.BlockSpec((tm, tn), lambda i, j, k: (i, j)),
        scratch_shapes=[pltpu.VMEM((tm, tn), jnp.float32)],
        compiler_params=_params(("parallel", "parallel", "arbitrary")),
    )(*args)


# ----------------------- Pallas kernel 2: fused RMSNorm + matmul -----------------------------

def _norm_mm_kernel(x_ref, g_ref, w_ref, o_ref):
    x = x_ref[...]
    var = jnp.mean(x * x, axis=-1, keepdims=True)
    xn = (x * jax.lax.rsqrt(var + LN_EPS)) * g_ref[...]
    o_ref[...] = jnp.dot(xn, w_ref[...], preferred_element_type=jnp.float32)


def pallas_norm_matmul(x, g_row, w, tm_pref=TM_PREF, tn_pref=TN_PREF):
    """T5 RMSNorm(x) @ w, fused. x: (M, K), g_row: (1, K), w: (K, N)."""
    M, K = x.shape
    N = w.shape[1]
    tm = _sub_tile(M, tm_pref)
    tn = _lane_tile(N, tn_pref)
    return pl.pallas_call(
        _norm_mm_kernel,
        out_shape=jax.ShapeDtypeStruct((M, N), jnp.float32),
        grid=(M // tm, N // tn),
        in_specs=[pl.BlockSpec((tm, K), lambda i, j: (i, 0)),
                  pl.BlockSpec((1, K), lambda i, j: (0, 0)),
                  pl.BlockSpec((K, tn), lambda i, j: (0, j))],
        out_specs=pl.BlockSpec((tm, tn), lambda i, j: (i, j)),
        compiler_params=_params(("parallel", "parallel")),
    )(x, g_row, w)


# --------------- Pallas kernel 3: fused RMSNorm + wi0/wi1 + gated new-GELU -------------------

def _ff_gate_kernel(x_ref, g_ref, wi0_ref, wi1_ref, o_ref):
    x = x_ref[...]
    var = jnp.mean(x * x, axis=-1, keepdims=True)
    xn = (x * jax.lax.rsqrt(var + LN_EPS)) * g_ref[...]
    h0 = jnp.dot(xn, wi0_ref[...], preferred_element_type=jnp.float32)
    h1 = jnp.dot(xn, wi1_ref[...], preferred_element_type=jnp.float32)
    # HF NewGELUActivation (tanh approximation) used by T5 "gated-gelu"
    g = 0.5 * h0 * (1.0 + jnp.tanh(0.7978845608028654 * (h0 + 0.044715 * h0 * h0 * h0)))
    o_ref[...] = g * h1


def pallas_ff_gate(x, g_row, wi0, wi1, tm_pref=TM_PREF, tf_pref=TN_PREF):
    M, D = x.shape
    F = wi0.shape[1]
    tm = _sub_tile(M, tm_pref)
    tf = _lane_tile(F, tf_pref)
    return pl.pallas_call(
        _ff_gate_kernel,
        out_shape=jax.ShapeDtypeStruct((M, F), jnp.float32),
        grid=(M // tm, F // tf),
        in_specs=[pl.BlockSpec((tm, D), lambda i, j: (i, 0)),
                  pl.BlockSpec((1, D), lambda i, j: (0, 0)),
                  pl.BlockSpec((D, tf), lambda i, j: (0, j)),
                  pl.BlockSpec((D, tf), lambda i, j: (0, j))],
        out_specs=pl.BlockSpec((tm, tf), lambda i, j: (i, j)),
        compiler_params=_params(("parallel", "parallel")),
    )(x, g_row, wi0, wi1)


# ------------------ Pallas kernel 4: attention (all heads per batch element) -----------------

def _attn_kernel(q_ref, k_ref, v_ref, pb_ref, mask_ref, o_ref):
    q = q_ref[0]                       # (H, Sq, dk)
    k = k_ref[0]                       # (H, Skv, dk)
    v = v_ref[0]                       # (H, Skv, dk)
    bias = pb_ref[0] + mask_ref[0]     # (H, Sq, Skv) + (1, 1, Skv) broadcast
    # T5 attention: scores are NOT scaled by 1/sqrt(dk)
    s = jnp.einsum('hqd,hkd->hqk', q, k, preferred_element_type=jnp.float32) + bias
    m = jnp.max(s, axis=-1, keepdims=True)
    p = jnp.exp(s - m)
    p = p * pl.reciprocal(jnp.sum(p, axis=-1, keepdims=True), approx=True)
    o_ref[...] = jnp.einsum('hqk,hkd->hqd', p, v,
                            preferred_element_type=jnp.float32)[None]


def pallas_attention(q, k, v, pos_bias, mask_bias):
    """q/k/v: (B, H, S, dk); pos_bias: (1, H, Sq, Skv); mask_bias: (B, 1, 1, Skv).
    Broadcasts of pos_bias over batch and mask over heads/query happen via index_maps."""
    Bq, H, Sq, dk = q.shape
    Skv = k.shape[2]
    return pl.pallas_call(
        _attn_kernel,
        out_shape=jax.ShapeDtypeStruct((Bq, H, Sq, dk), jnp.float32),
        grid=(Bq,),
        in_specs=[pl.BlockSpec((1, H, Sq, dk), lambda bi: (bi, 0, 0, 0)),
                  pl.BlockSpec((1, H, Skv, dk), lambda bi: (bi, 0, 0, 0)),
                  pl.BlockSpec((1, H, Skv, dk), lambda bi: (bi, 0, 0, 0)),
                  pl.BlockSpec((1, H, Sq, Skv), lambda bi: (0, 0, 0, 0)),
                  pl.BlockSpec((1, 1, 1, Skv), lambda bi: (bi, 0, 0, 0))],
        out_specs=pl.BlockSpec((1, H, Sq, dk), lambda bi: (bi, 0, 0, 0)),
        compiler_params=_params(("parallel",)),
    )(q, k, v, pos_bias, mask_bias)


# -------------------------- Pallas kernel 5: standalone RMSNorm ------------------------------

def _rmsnorm_kernel(x_ref, g_ref, o_ref):
    x = x_ref[...]
    var = jnp.mean(x * x, axis=-1, keepdims=True)
    o_ref[...] = (x * jax.lax.rsqrt(var + LN_EPS)) * g_ref[...]


def pallas_rmsnorm(x2d, g_row, tm_pref=512):
    M, D = x2d.shape
    tm = _sub_tile(M, tm_pref)
    return pl.pallas_call(
        _rmsnorm_kernel,
        out_shape=jax.ShapeDtypeStruct((M, D), jnp.float32),
        grid=(M // tm,),
        in_specs=[pl.BlockSpec((tm, D), lambda i: (i, 0)),
                  pl.BlockSpec((1, D), lambda i: (0, 0))],
        out_specs=pl.BlockSpec((tm, D), lambda i: (i, 0)),
        compiler_params=_params(("parallel",)),
    )(x2d, g_row)


# ------------ Pallas kernel 6: fused final RMSNorm + lm_head + online-LSE NLL ----------------

def _make_lm_nll_kernel(tv):
    def kernel(x_ref, g_ref, w_ref, lbl_ref, logits_ref, nll_ref, m_sc, l_sc, p_sc):
        j = pl.program_id(1)

        @pl.when(j == 0)
        def _():
            m_sc[...] = jnp.full_like(m_sc, -1e30)
            l_sc[...] = jnp.zeros_like(l_sc)
            p_sc[...] = jnp.zeros_like(p_sc)

        x = x_ref[...]
        var = jnp.mean(x * x, axis=-1, keepdims=True)
        xn = (x * jax.lax.rsqrt(var + LN_EPS)) * g_ref[...]
        logits = jnp.dot(xn, w_ref[...], preferred_element_type=jnp.float32)   # (tm, tv)
        logits_ref[...] = logits

        lbl = lbl_ref[...]                                                     # (tm, 1) int32
        ids = j * tv + jax.lax.broadcasted_iota(jnp.int32, logits.shape, 1)
        p_sc[...] += jnp.sum(jnp.where(ids == lbl, logits, 0.0), axis=-1, keepdims=True)

        m_old = m_sc[...]
        m_new = jnp.maximum(m_old, jnp.max(logits, axis=-1, keepdims=True))
        l_sc[...] = l_sc[...] * jnp.exp(m_old - m_new) + \
            jnp.sum(jnp.exp(logits - m_new), axis=-1, keepdims=True)
        m_sc[...] = m_new

        @pl.when(j == pl.num_programs(1) - 1)
        def _():
            # per-token NLL = logsumexp(logits) - logit[label]
            nll_ref[...] = (m_sc[...] + jnp.log(l_sc[...])) - p_sc[...]
    return kernel


def pallas_lmhead_nll(x, g_row, lm_w, labels_col, tm_pref=TM_PREF, tv_pref=TN_PREF):
    """x: (M, D) decoder hidden (pre final LN); lm_w: (D, V); labels_col: (M, 1) int32.
    Returns (logits (M, V), nll (M, 1)). NLL for IGNORE labels is meaningless (masked later)."""
    M, D = x.shape
    V = lm_w.shape[1]
    tm = _sub_tile(M, tm_pref)
    tv = _lane_tile(V, tv_pref)
    return pl.pallas_call(
        _make_lm_nll_kernel(tv),
        out_shape=(jax.ShapeDtypeStruct((M, V), jnp.float32),
                   jax.ShapeDtypeStruct((M, 1), jnp.float32)),
        grid=(M // tm, V // tv),
        in_specs=[pl.BlockSpec((tm, D), lambda i, j: (i, 0)),
                  pl.BlockSpec((1, D), lambda i, j: (0, 0)),
                  pl.BlockSpec((D, tv), lambda i, j: (0, j)),
                  pl.BlockSpec((tm, 1), lambda i, j: (i, 0))],
        out_specs=(pl.BlockSpec((tm, tv), lambda i, j: (i, j)),
                   pl.BlockSpec((tm, 1), lambda i, j: (i, 0))),
        scratch_shapes=[pltpu.VMEM((tm, 1), jnp.float32)] * 3,
        compiler_params=_params(("parallel", "arbitrary")),
    )(x, g_row, lm_w, labels_col)


# ----------------------------------- T5 glue (plain JAX) -------------------------------------

def relative_position_bucket(rel, bidirectional, num_buckets, max_distance):
    ret = jnp.zeros_like(rel)
    n = num_buckets
    if bidirectional:
        n = n // 2
        ret = ret + (rel > 0).astype(jnp.int32) * n
        rel_abs = jnp.abs(rel)
    else:
        rel_abs = -jnp.minimum(rel, 0)
    max_exact = n // 2
    is_small = rel_abs < max_exact
    rel_large = max_exact + (
        jnp.log(jnp.maximum(rel_abs, 1).astype(jnp.float32) / max_exact)
        / math.log(max_distance / max_exact) * (n - max_exact)
    ).astype(jnp.int32)
    rel_large = jnp.minimum(rel_large, n - 1)
    return ret + jnp.where(is_small, rel_abs, rel_large)


def compute_position_bias(rel_emb, q_len, k_len, bidirectional):
    ctx = jnp.arange(q_len, dtype=jnp.int32)[:, None]
    mem = jnp.arange(k_len, dtype=jnp.int32)[None, :]
    buckets = relative_position_bucket(mem - ctx, bidirectional, REL_BUCKETS, REL_MAXDIST)
    vals = rel_emb[buckets]                              # (q, k, H)
    return jnp.transpose(vals, (2, 0, 1))[None]          # (1, H, q, k)


def split_heads(x2d, b, s):
    # (b*s, H*dkv) -> (b, H, s, dkv).  Transpose left to XLA (small at these shapes).
    return x2d.reshape(b, s, N_HEADS, D_KV).transpose(0, 2, 1, 3)


def merge_heads(x4d, b, s):
    return x4d.transpose(0, 2, 1, 3).reshape(b * s, D_INNER)


def self_attention_block(hidden, p, pos_bias, mask_bias, b, s):
    """Pre-LN T5 self-attention; LN fused into the fused q|k|v projection."""
    x2d = hidden.reshape(-1, D_MODEL)
    wqkv = jnp.concatenate([p["wq"], p["wk"], p["wv"]], axis=1)        # (D, 3*D_INNER)
    qkv = pallas_norm_matmul(x2d, p["ln"], wqkv)
    q, k, v = jnp.split(qkv, 3, axis=1)
    a = pallas_attention(split_heads(q, b, s), split_heads(k, b, s),
                         split_heads(v, b, s), pos_bias, mask_bias)
    out = pallas_matmul(merge_heads(a, b, s), p["wo"], residual=x2d)   # residual fused
    return out.reshape(b, s, D_MODEL)


def cross_attention_block(hidden, p, enc_kv2d, pos_bias, mask_bias, b, sq, skv):
    x2d = hidden.reshape(-1, D_MODEL)
    q = pallas_norm_matmul(x2d, p["ln"], p["wq"])                      # LN only on the query side
    wkv = jnp.concatenate([p["wk"], p["wv"]], axis=1)                  # (D, 2*D_INNER)
    kv = pallas_matmul(enc_kv2d, wkv)
    k, v = jnp.split(kv, 2, axis=1)
    a = pallas_attention(split_heads(q, b, sq), split_heads(k, b, skv),
                         split_heads(v, b, skv), pos_bias, mask_bias)
    out = pallas_matmul(merge_heads(a, b, sq), p["wo"], residual=x2d)
    return out.reshape(b, sq, D_MODEL)


def ff_block(hidden, p, b, s):
    x2d = hidden.reshape(-1, D_MODEL)
    g = pallas_ff_gate(x2d, p["ln"], p["wi0"], p["wi1"])               # LN + wi0/wi1 + gelu*gate
    out = pallas_matmul(g, p["wo"], residual=x2d)
    return out.reshape(b, s, D_MODEL)


def shift_right(labels):
    start = jnp.full((labels.shape[0], 1), DEC_START_ID, labels.dtype)
    shifted = jnp.concatenate([start, labels[:, :-1]], axis=1)
    return jnp.where(shifted == IGNORE, PAD_ID, shifted)


def neuro_t5_forward(params, neuro, neuro_mask, labels):
    b, s_enc, _ = neuro.shape
    s_dec = labels.shape[1]

    # --- self.linear(neuro): nn.Linear(D_IN, d_model); bias folded into matmul epilogue ---
    x = pallas_matmul(neuro.reshape(-1, D_IN), params["lin_w"], bias=params["lin_b"])
    hidden = x.reshape(b, s_enc, D_MODEL)

    # --- encoder ---
    enc_mask_bias = (1.0 - neuro_mask.astype(jnp.float32))[:, None, None, :] * NEG   # (B,1,1,Se)
    enc_pos = compute_position_bias(params["enc_rel"], s_enc, s_enc, True)            # (1,H,Se,Se)
    for lp in params["enc_layers"]:
        hidden = self_attention_block(hidden, lp["sa"], enc_pos, enc_mask_bias, b, s_enc)
        hidden = ff_block(hidden, lp["ff"], b, s_enc)
    enc_out2d = pallas_rmsnorm(hidden.reshape(-1, D_MODEL), params["enc_final_ln"])    # (B*Se, D)

    # --- decoder ---
    dec_ids = shift_right(labels)
    hidden = params["shared_emb"][dec_ids]                                             # (B,Sd,D)
    causal = jnp.tril(jnp.ones((s_dec, s_dec), jnp.float32))
    dec_self_pos = compute_position_bias(params["dec_rel"], s_dec, s_dec, False) \
        + (1.0 - causal)[None, None] * NEG                                             # (1,H,Sd,Sd)
    dec_self_mask = jnp.zeros((b, 1, 1, s_dec), jnp.float32)
    cross_pos = jnp.zeros((1, N_HEADS, s_dec, s_enc), jnp.float32)                     # no rel bias
    for lp in params["dec_layers"]:
        hidden = self_attention_block(hidden, lp["sa"], dec_self_pos, dec_self_mask, b, s_dec)
        hidden = cross_attention_block(hidden, lp["ca"], enc_out2d, cross_pos,
                                       enc_mask_bias, b, s_dec, s_enc)
        hidden = ff_block(hidden, lp["ff"], b, s_dec)

    # --- fused: decoder final RMSNorm + lm_head (byt5: untied, no rescale) + NLL ---
    labels_col = labels.reshape(-1, 1).astype(jnp.int32)
    logits, nll = pallas_lmhead_nll(hidden.reshape(-1, D_MODEL), params["dec_final_ln"],
                                    params["lm_head"], labels_col)
    valid = (labels.reshape(-1) != IGNORE).astype(jnp.float32)
    loss = jnp.sum(nll[:, 0] * valid) / jnp.maximum(jnp.sum(valid), 1.0)
    return loss, logits.reshape(b, s_dec, VOCAB)


# ----------------------------------- param init ----------------------------------------------

def init_params(key):
    keys = iter(jax.random.split(key, 256))

    def w(shape, scale=0.02):
        return jax.random.normal(next(keys), shape, jnp.float32) * scale

    def attn_params():
        return {"ln": jnp.ones((1, D_MODEL), jnp.float32),
                "wq": w((D_MODEL, D_INNER)), "wk": w((D_MODEL, D_INNER)),
                "wv": w((D_MODEL, D_INNER)), "wo": w((D_INNER, D_MODEL))}

    def ff_params():
        return {"ln": jnp.ones((1, D_MODEL), jnp.float32),
                "wi0": w((D_MODEL, D_FF)), "wi1": w((D_MODEL, D_FF)),
                "wo": w((D_FF, D_MODEL))}

    return {
        "lin_w": w((D_IN, D_MODEL)), "lin_b": w((D_MODEL,)),
        "shared_emb": w((VOCAB, D_MODEL)),
        "lm_head": w((D_MODEL, VOCAB)),
        "enc_rel": w((REL_BUCKETS, N_HEADS)),
        "dec_rel": w((REL_BUCKETS, N_HEADS)),
        "enc_final_ln": jnp.ones((1, D_MODEL), jnp.float32),
        "dec_final_ln": jnp.ones((1, D_MODEL), jnp.float32),
        "enc_layers": [{"sa": attn_params(), "ff": ff_params()} for _ in range(ENC_LAYERS)],
        "dec_layers": [{"sa": attn_params(), "ca": attn_params(), "ff": ff_params()}
                       for _ in range(DEC_LAYERS)],
    }


# ----------------------------------- main -----------------------------------------------------

if __name__ == "__main__":
    key = jax.random.PRNGKey(0)
    kp, kn, kl = jax.random.split(key, 3)

    params = init_params(kp)
    neuro = jax.random.normal(kn, (B, S_ENC, D_IN), jnp.float32)
    lengths = jnp.array([S_ENC, S_ENC - 4])
    neuro_mask = (jnp.arange(S_ENC)[None, :] < lengths[:, None]).astype(jnp.float32)
    labels = jax.random.randint(kl, (B, S_DEC), 0, VOCAB, dtype=jnp.int32)
    labels = labels.at[1, -2:].set(IGNORE)   # exercise ignore_index=-100 path

    loss, logits = jax.jit(neuro_t5_forward)(params, neuro, neuro_mask, labels)
    jax.block_until_ready((loss, logits))
    assert logits.shape == (B, S_DEC, VOCAB) and loss.shape == ()
    assert bool(jnp.isfinite(loss))
    print("KERNEL_OK")
</pallas_src>

<mosaic_0001>
module attributes {stable_mosaic.version = 11 : i64} {
  func.func @_norm_mm_kernel(%arg0: i32, %arg1: i32, %arg2: memref<32x128xf32, #tpu.memory_space<vmem>>, %arg3: memref<1x128xf32, #tpu.memory_space<vmem>>, %arg4: memref<128x128xf32, #tpu.memory_space<vmem>>, %arg5: memref<32x128xf32, #tpu.memory_space<vmem>>) attributes {dimension_semantics = [#tpu.dimension_semantics<parallel>, #tpu.dimension_semantics<parallel>], iteration_bounds = array<i64: 1, 3>, scalar_prefetch = 0 : i64, scratch_operands = 0 : i64, tpu.core_type = #tpu.core_type<tc>, window_params = [{transform_indices = @transform_0, window_bounds = array<i64: 32, 128>}, {pipeline_mode = #tpu.pipeline_mode<synchronous>, transform_indices = @transform_1, window_bounds = array<i64: 1, 128>}, {transform_indices = @transform_2, window_bounds = array<i64: 128, 128>}, {transform_indices = @transform_3, window_bounds = array<i64: 32, 128>}]} {
    %c0 = arith.constant 0 : index
    %c0_0 = arith.constant 0 : index
    %0 = vector.load %arg2[%c0, %c0_0] : memref<32x128xf32, #tpu.memory_space<vmem>>, vector<32x128xf32>
    %1 = arith.mulf %0, %0 : vector<32x128xf32>
    %cst = arith.constant dense<0.000000e+00> : vector<32xf32>
    %2 = vector.multi_reduction <add>, %1, %cst [1] : vector<32x128xf32> to vector<32xf32>
    %3 = vector.shape_cast %2 : vector<32xf32> to vector<32x1xf32>
    %cst_1 = arith.constant 1.280000e+02 : f32
    %4 = vector.broadcast %cst_1 : f32 to vector<32x1xf32>
    %5 = arith.divf %3, %4 : vector<32x1xf32>
    %cst_2 = arith.constant 9.99999997E-7 : f32
    %6 = vector.broadcast %cst_2 : f32 to vector<32x1xf32>
    %7 = arith.addf %5, %6 : vector<32x1xf32>
    %8 = math.rsqrt %7 : vector<32x1xf32>
    %9 = vector.broadcast %8 : vector<32x1xf32> to vector<32x128xf32>
    %10 = arith.mulf %0, %9 : vector<32x128xf32>
    %c0_3 = arith.constant 0 : index
    %c0_4 = arith.constant 0 : index
    %11 = vector.load %arg3[%c0_3, %c0_4] : memref<1x128xf32, #tpu.memory_space<vmem>>, vector<1x128xf32>
    %12 = vector.broadcast %11 : vector<1x128xf32> to vector<32x128xf32>
    %13 = arith.mulf %10, %12 : vector<32x128xf32>
    %c0_5 = arith.constant 0 : index
    %c0_6 = arith.constant 0 : index
    %14 = vector.load %arg4[%c0_5, %c0_6] : memref<128x128xf32, #tpu.memory_space<vmem>>, vector<128x128xf32>
    %cst_7 = arith.constant dense<0.000000e+00> : vector<32x128xf32>
    %15 = tpu.matmul %13, %14, %cst_7 {dimension_numbers = #tpu.dot_dimension_numbers<[1], [0], [0], [1], [0, 0, 1, 1], [], []>} : vector<32x128xf32>, vector<128x128xf32>, vector<32x128xf32> -> vector<32x128xf32>
    %c0_8 = arith.constant 0 : index
    %c0_9 = arith.constant 0 : index
    %16 = vector.load %arg5[%c0_8, %c0_9] : memref<32x128xf32, #tpu.memory_space<vmem>>, vector<32x128xf32>
    tpu.vector_store %arg5[%c0_8, %c0_9], %15 {strides = array<i32>} : memref<32x128xf32, #tpu.memory_space<vmem>>, vector<32x128xf32>,
    return
  }
  func.func @transform_0(%arg0: i32, %arg1: i32) -> (i32, i32) {
    %c0_i32 = arith.constant 0 : i32
    %c0_i32_0 = arith.constant 0 : i32
    return %arg0, %c0_i32 : i32, i32
  }
  func.func @transform_1(%arg0: i32, %arg1: i32) -> (i32, i32) {
    %c0_i32 = arith.constant 0 : i32
    %c0_i32_0 = arith.constant 0 : i32
    %c0_i32_1 = arith.constant 0 : i32
    return %c0_i32, %c0_i32_0 : i32, i32
  }
  func.func @transform_2(%arg0: i32, %arg1: i32) -> (i32, i32) {
    %c0_i32 = arith.constant 0 : i32
    %c0_i32_0 = arith.constant 0 : i32
    return %c0_i32, %arg1 : i32, i32
  }
  func.func @transform_3(%arg0: i32, %arg1: i32) -> (i32, i32) {
    %c0_i32 = arith.constant 0 : i32
    return %arg0, %arg1 : i32, i32
  }
}

module attributes {stable_mosaic.version = 11 : i64} {
  func.func @kernel(%arg0: i32, %arg1: i32, %arg2: i32, %arg3: memref<32x128xf32, #tpu.memory_space<vmem>>, %arg4: memref<128x128xf32, #tpu.memory_space<vmem>>, %arg5: memref<1x128xf32, #tpu.memory_space<vmem>>, %arg6: memref<32x128xf32, #tpu.memory_space<vmem>>, %arg7: memref<32x128xf32, #tpu.memory_space<vmem>>) attributes {dimension_semantics = [#tpu.dimension_semantics<parallel>, #tpu.dimension_semantics<parallel>, #tpu.dimension_semantics<arbitrary>], iteration_bounds = array<i64: 1, 1, 2>, scalar_prefetch = 0 : i64, scratch_operands = 1 : i64, tpu.core_type = #tpu.core_type<tc>, window_params = [{transform_indices = @transform_0, window_bounds = array<i64: 32, 128>}, {transform_indices = @transform_1, window_bounds = array<i64: 128, 128>}, {transform_indices = @transform_2, window_bounds = array<i64: 1, 128>}, {transform_indices = @transform_3, window_bounds = array<i64: 32, 128>}]} {
    %c0_i32 = arith.constant 0 : i32
    %0 = arith.cmpi eq, %arg2, %c0_i32 : i32
    %1 = arith.extui %0 : i1 to i32
    %c0_i32_0 = arith.constant 0 : i32
    %2 = arith.cmpi ne, %1, %c0_i32_0 : i32
    scf.if %2 {
      %cst_9 = arith.constant 0.000000e+00 : f32
      %12 = vector.broadcast %cst_9 : f32 to vector<32x128xf32>
      %c0_10 = arith.constant 0 : index
      %c0_11 = arith.constant 0 : index
      %13 = vector.load %arg7[%c0_10, %c0_11] : memref<32x128xf32, #tpu.memory_space<vmem>>, vector<32x128xf32>
      tpu.vector_store %arg7[%c0_10, %c0_11], %12 {strides = array<i32>} : memref<32x128xf32, #tpu.memory_space<vmem>>, vector<32x128xf32>,
    } else {
    }
    %c0 = arith.constant 0 : index
    %c0_1 = arith.constant 0 : index
    %3 = vector.load %arg7[%c0, %c0_1] : memref<32x128xf32, #tpu.memory_space<vmem>>, vector<32x128xf32>
    %c0_2 = arith.constant 0 : index
    %c0_3 = arith.constant 0 : index
    %4 = vector.load %arg3[%c0_2, %c0_3] : memref<32x128xf32, #tpu.memory_space<vmem>>, vector<32x128xf32>
    %c0_4 = arith.constant 0 : index
    %c0_5 = arith.constant 0 : index
    %5 = vector.load %arg4[%c0_4, %c0_5] : memref<128x128xf32, #tpu.memory_space<vmem>>, vector<128x128xf32>
    %cst = arith.constant dense<0.000000e+00> : vector<32x128xf32>
    %6 = tpu.matmul %4, %5, %cst {dimension_numbers = #tpu.dot_dimension_numbers<[1], [0], [0], [1], [0, 0, 1, 1], [], []>} : vector<32x128xf32>, vector<128x128xf32>, vector<32x128xf32> -> vector<32x128xf32>
    %7 = arith.addf %3, %6 : vector<32x128xf32>
    %c0_6 = arith.constant 0 : index
    %c0_7 = arith.constant 0 : index
    %8 = vector.load %arg7[%c0_6, %c0_7] : memref<32x128xf32, #tpu.memory_space<vmem>>, vector<32x128xf32>
    tpu.vector_store %arg7[%c0_6, %c0_7], %7 {strides = array<i32>} : memref<32x128xf32, #tpu.memory_space<vmem>>, vector<32x128xf32>,
    %c1_i32 = arith.constant 1 : i32
    %9 = arith.cmpi eq, %arg2, %c1_i32 : i32
    %10 = arith.extui %9 : i1 to i32
    %c0_i32_8 = arith.constant 0 : i32
    %11 = arith.cmpi ne, %10, %c0_i32_8 : i32
    scf.if %11 {
      %c0_9 = arith.constant 0 : index
      %c0_10 = arith.constant 0 : index
      %12 = vector.load %arg7[%c0_9, %c0_10] : memref<32x128xf32, #tpu.memory_space<vmem>>, vector<32x128xf32>
      %c0_11 = arith.constant 0 : index
      %c0_12 = arith.constant 0 : index
      %13 = vector.load %arg5[%c0_11, %c0_12] : memref<1x128xf32, #tpu.memory_space<vmem>>, vector<1x128xf32>
      %14 = vector.broadcast %13 : vector<1x128xf32> to vector<32x128xf32>
      %15 = arith.addf %12, %14 : vector<32x128xf32>
      %c0_13 = arith.constant 0 : index
      %c0_14 = arith.constant 0 : index
      %16 = vector.load %arg6[%c0_13, %c0_14] : memref<32x128xf32, #tpu.memory_space<vmem>>, vector<32x128xf32>
      tpu.vector_store %arg6[%c0_13, %c0_14], %15 {strides = array<i32>} : memref<32x128xf32, #tpu.memory_space<vmem>>, vector<32x128xf32>,
    } else {
    }
    return
  }
  func.func @transform_0(%arg0: i32, %arg1: i32, %arg2: i32) -> (i32, i32) {
    %c0_i32 = arith.constant 0 : i32
    return %arg0, %arg2 : i32, i32
  }
  func.func @transform_1(%arg0: i32, %arg1: i32, %arg2: i32) -> (i32, i32) {
    %c0_i32 = arith.constant 0 : i32
    return %arg2, %arg1 : i32, i32
  }
  func.func @transform_2(%arg0: i32, %arg1: i32, %arg2: i32) -> (i32, i32) {
    %c0_i32 = arith.constant 0 : i32
    %c0_i32_0 = arith.constant 0 : i32
    return %c0_i32, %arg1 : i32, i32
  }
  func.func @transform_3(%arg0: i32, %arg1: i32, %arg2: i32) -> (i32, i32) {
    %c0_i32 = arith.constant 0 : i32
    return %arg0, %arg1 : i32, i32
  }
}

module attributes {stable_mosaic.version = 11 : i64} {
  func.func @_ff_gate_kernel(%arg0: i32, %arg1: i32, %arg2: memref<32x128xf32, #tpu.memory_space<vmem>>, %arg3: memref<1x128xf32, #tpu.memory_space<vmem>>, %arg4: memref<128x256xf32, #tpu.memory_space<vmem>>, %arg5: memref<128x256xf32, #tpu.memory_space<vmem>>, %arg6: memref<32x256xf32, #tpu.memory_space<vmem>>) attributes {dimension_semantics = [#tpu.dimension_semantics<parallel>, #tpu.dimension_semantics<parallel>], iteration_bounds = array<i64: 1, 1>, scalar_prefetch = 0 : i64, scratch_operands = 0 : i64, tpu.core_type = #tpu.core_type<tc>, window_params = [{transform_indices = @transform_0, window_bounds = array<i64: 32, 128>}, {pipeline_mode = #tpu.pipeline_mode<synchronous>, transform_indices = @transform_1, window_bounds = array<i64: 1, 128>}, {transform_indices = @transform_2, window_bounds = array<i64: 128, 256>}, {transform_indices = @transform_3, window_bounds = array<i64: 128, 256>}, {transform_indices = @transform_4, window_bounds = array<i64: 32, 256>}]} {
    %c0 = arith.constant 0 : index
    %c0_0 = arith.constant 0 : index
    %0 = vector.load %arg2[%c0, %c0_0] : memref<32x128xf32, #tpu.memory_space<vmem>>, vector<32x128xf32>
    %1 = arith.mulf %0, %0 : vector<32x128xf32>
    %cst = arith.constant dense<0.000000e+00> : vector<32xf32>
    %2 = vector.multi_reduction <add>, %1, %cst [1] : vector<32x128xf32> to vector<32xf32>
    %3 = vector.shape_cast %2 : vector<32xf32> to vector<32x1xf32>
    %cst_1 = arith.constant 1.280000e+02 : f32
    %4 = vector.broadcast %cst_1 : f32 to vector<32x1xf32>
    %5 = arith.divf %3, %4 : vector<32x1xf32>
    %cst_2 = arith.constant 9.99999997E-7 : f32
    %6 = vector.broadcast %cst_2 : f32 to vector<32x1xf32>
    %7 = arith.addf %5, %6 : vector<32x1xf32>
    %8 = math.rsqrt %7 : vector<32x1xf32>
    %9 = vector.broadcast %8 : vector<32x1xf32> to vector<32x128xf32>
    %10 = arith.mulf %0, %9 : vector<32x128xf32>
    %c0_3 = arith.constant 0 : index
    %c0_4 = arith.constant 0 : index
    %11 = vector.load %arg3[%c0_3, %c0_4] : memref<1x128xf32, #tpu.memory_space<vmem>>, vector<1x128xf32>
    %12 = vector.broadcast %11 : vector<1x128xf32> to vector<32x128xf32>
    %13 = arith.mulf %10, %12 : vector<32x128xf32>
    %c0_5 = arith.constant 0 : index
    %c0_6 = arith.constant 0 : index
    %14 = vector.load %arg4[%c0_5, %c0_6] : memref<128x256xf32, #tpu.memory_space<vmem>>, vector<128x256xf32>
    %cst_7 = arith.constant dense<0.000000e+00> : vector<32x256xf32>
    %15 = tpu.matmul %13, %14, %cst_7 {dimension_numbers = #tpu.dot_dimension_numbers<[1], [0], [0], [1], [0, 0, 1, 1], [], []>} : vector<32x128xf32>, vector<128x256xf32>, vector<32x256xf32> -> vector<32x256xf32>
    %c0_8 = arith.constant 0 : index
    %c0_9 = arith.constant 0 : index
    %16 = vector.load %arg5[%c0_8, %c0_9] : memref<128x256xf32, #tpu.memory_space<vmem>>, vector<128x256xf32>
    %cst_10 = arith.constant dense<0.000000e+00> : vector<32x256xf32>
    %17 = tpu.matmul %13, %16, %cst_10 {dimension_numbers = #tpu.dot_dimension_numbers<[1], [0], [0], [1], [0, 0, 1, 1], [], []>} : vector<32x128xf32>, vector<128x256xf32>, vector<32x256xf32> -> vector<32x256xf32>
    %cst_11 = arith.constant 5.000000e-01 : f32
    %18 = vector.broadcast %cst_11 : f32 to vector<32x256xf32>
    %19 = arith.mulf %18, %15 : vector<32x256xf32>
    %cst_12 = arith.constant 4.471500e-02 : f32
    %20 = vector.broadcast %cst_12 : f32 to vector<32x256xf32>
    %21 = arith.mulf %20, %15 : vector<32x256xf32>
    %22 = arith.mulf %21, %15 : vector<32x256xf32>
    %23 = arith.mulf %22, %15 : vector<32x256xf32>
    %24 = arith.addf %15, %23 : vector<32x256xf32>
    %cst_13 = arith.constant 0.797884583 : f32
    %25 = vector.broadcast %cst_13 : f32 to vector<32x256xf32>
    %26 = arith.mulf %25, %24 : vector<32x256xf32>
    %27 = math.tanh %26 : vector<32x256xf32>
    %cst_14 = arith.constant 1.000000e+00 : f32
    %28 = vector.broadcast %cst_14 : f32 to vector<32x256xf32>
    %29 = arith.addf %28, %27 : vector<32x256xf32>
    %30 = arith.mulf %19, %29 : vector<32x256xf32>
    %31 = arith.mulf %30, %17 : vector<32x256xf32>
    %c0_15 = arith.constant 0 : index
    %c0_16 = arith.constant 0 : index
    %32 = vector.load %arg6[%c0_15, %c0_16] : memref<32x256xf32, #tpu.memory_space<vmem>>, vector<32x256xf32>
    tpu.vector_store %arg6[%c0_15, %c0_16], %31 {strides = array<i32>} : memref<32x256xf32, #tpu.memory_space<vmem>>, vector<32x256xf32>,
    return
  }
  func.func @transform_0(%arg0: i32, %arg1: i32) -> (i32, i32) {
    %c0_i32 = arith.constant 0 : i32
    %c0_i32_0 = arith.constant 0 : i32
    return %arg0, %c0_i32 : i32, i32
  }
  func.func @transform_1(%arg0: i32, %arg1: i32) -> (i32, i32) {
    %c0_i32 = arith.constant 0 : i32
    %c0_i32_0 = arith.constant 0 : i32
    %c0_i32_1 = arith.constant 0 : i32
    return %c0_i32, %c0_i32_0 : i32, i32
  }
  func.func @transform_2(%arg0: i32, %arg1: i32) -> (i32, i32) {
    %c0_i32 = arith.constant 0 : i32
    %c0_i32_0 = arith.constant 0 : i32
    return %c0_i32, %arg1 : i32, i32
  }
  func.func @transform_3(%arg0: i32, %arg1: i32) -> (i32, i32) {
    %c0_i32 = arith.constant 0 : i32
    %c0_i32_0 = arith.constant 0 : i32
    return %c0_i32, %arg1 : i32, i32
  }
  func.func @transform_4(%arg0: i32, %arg1: i32) -> (i32, i32) {
    %c0_i32 = arith.constant 0 : i32
    return %arg0, %arg1 : i32, i32
  }
}

module attributes {stable_mosaic.version = 11 : i64} {
  func.func @_attn_kernel(%arg0: i32, %arg1: memref<1x2x16x64xf32, #tpu.memory_space<vmem>>, %arg2: memref<1x2x16x64xf32, #tpu.memory_space<vmem>>, %arg3: memref<1x2x16x64xf32, #tpu.memory_space<vmem>>, %arg4: memref<1x2x16x16xf32, #tpu.memory_space<vmem>>, %arg5: memref<1x1x1x16xf32, #tpu.memory_space<vmem>>, %arg6: memref<1x2x16x64xf32, #tpu.memory_space<vmem>>) attributes {dimension_semantics = [#tpu.dimension_semantics<parallel>], iteration_bounds = array<i64: 2>, scalar_prefetch = 0 : i64, scratch_operands = 0 : i64, tpu.core_type = #tpu.core_type<tc>, window_params = [{transform_indices = @transform_0, window_bounds = array<i64: 1, 2, 16, 64>}, {transform_indices = @transform_1, window_bounds = array<i64: 1, 2, 16, 64>}, {transform_indices = @transform_2, window_bounds = array<i64: 1, 2, 16, 64>}, {pipeline_mode = #tpu.pipeline_mode<synchronous>, transform_indices = @transform_3, window_bounds = array<i64: 1, 2, 16, 16>}, {transform_indices = @transform_4, window_bounds = array<i64: 1, 1, 1, 16>}, {transform_indices = @transform_5, window_bounds = array<i64: 1, 2, 16, 64>}]} {
    %c0 = arith.constant 0 : index
    %c0_0 = arith.constant 0 : index
    %c0_1 = arith.constant 0 : index
    %c0_2 = arith.constant 0 : index
    %0 = vector.load %arg1[%c0, %c0_0, %c0_1, %c0_2] : memref<1x2x16x64xf32, #tpu.memory_space<vmem>>, vector<1x2x16x64xf32>
    %1 = vector.shape_cast %0 : vector<1x2x16x64xf32> to vector<2x16x64xf32>
    %c0_3 = arith.constant 0 : index
    %c0_4 = arith.constant 0 : index
    %c0_5 = arith.constant 0 : index
    %c0_6 = arith.constant 0 : index
    %2 = vector.load %arg2[%c0_3, %c0_4, %c0_5, %c0_6] : memref<1x2x16x64xf32, #tpu.memory_space<vmem>>, vector<1x2x16x64xf32>
    %3 = vector.shape_cast %2 : vector<1x2x16x64xf32> to vector<2x16x64xf32>
    %c0_7 = arith.constant 0 : index
    %c0_8 = arith.constant 0 : index
    %c0_9 = arith.constant 0 : index
    %c0_10 = arith.constant 0 : index
    %4 = vector.load %arg3[%c0_7, %c0_8, %c0_9, %c0_10] : memref<1x2x16x64xf32, #tpu.memory_space<vmem>>, vector<1x2x16x64xf32>
    %5 = vector.shape_cast %4 : vector<1x2x16x64xf32> to vector<2x16x64xf32>
    %c0_11 = arith.constant 0 : index
    %c0_12 = arith.constant 0 : index
    %c0_13 = arith.constant 0 : index
    %c0_14 = arith.constant 0 : index
    %6 = vector.load %arg4[%c0_11, %c0_12, %c0_13, %c0_14] : memref<1x2x16x16xf32, #tpu.memory_space<vmem>>, vector<1x2x16x16xf32>
    %7 = vector.shape_cast %6 : vector<1x2x16x16xf32> to vector<2x16x16xf32>
    %c0_15 = arith.constant 0 : index
    %c0_16 = arith.constant 0 : index
    %c0_17 = arith.constant 0 : index
    %c0_18 = arith.constant 0 : index
    %8 = vector.load %arg5[%c0_15, %c0_16, %c0_17, %c0_18] : memref<1x1x1x16xf32, #tpu.memory_space<vmem>>, vector<1x1x1x16xf32>
    %9 = vector.shape_cast %8 : vector<1x1x1x16xf32> to vector<1x1x16xf32>
    %10 = vector.broadcast %9 : vector<1x1x16xf32> to vector<2x16x16xf32>
    %11 = arith.addf %7, %10 : vector<2x16x16xf32>
    "tpu.trace_start"() <{level = 10 : i32, message = "hqd,hkd->hqk"}> : () -> ()
    %cst = arith.constant dense<0.000000e+00> : vector<2x16x16xf32>
    %12 = tpu.matmul %1, %3, %cst {dimension_numbers = #tpu.dot_dimension_numbers<[2], [2], [1], [1], [0, 0, 0, 1, 1, 1], [0], [0]>} : vector<2x16x64xf32>, vector<2x16x64xf32>, vector<2x16x16xf32> -> vector<2x16x16xf32>
    "tpu.trace_stop"() : () -> ()
    %13 = arith.addf %12, %11 : vector<2x16x16xf32>
    %cst_19 = arith.constant dense<0xFF800000> : vector<2x16xf32>
    %14 = vector.multi_reduction <maximumf>, %13, %cst_19 [2] : vector<2x16x16xf32> to vector<2x16xf32>
    %15 = vector.shape_cast %14 : vector<2x16xf32> to vector<2x16x1xf32>
    %16 = vector.broadcast %15 : vector<2x16x1xf32> to vector<2x16x16xf32>
    %17 = arith.subf %13, %16 : vector<2x16x16xf32>
    %18 = math.exp %17 : vector<2x16x16xf32>
    %cst_20 = arith.constant dense<0.000000e+00> : vector<2x16xf32>
    %19 = vector.multi_reduction <add>, %18, %cst_20 [2] : vector<2x16x16xf32> to vector<2x16xf32>
    %20 = vector.shape_cast %19 : vector<2x16xf32> to vector<2x16x1xf32>
    %21 = tpu.reciprocal %20 {approx = true} : vector<2x16x1xf32> -> vector<2x16x1xf32>
    %22 = vector.broadcast %21 : vector<2x16x1xf32> to vector<2x16x16xf32>
    %23 = arith.mulf %18, %22 : vector<2x16x16xf32>
    "tpu.trace_start"() <{level = 10 : i32, message = "hqk,hkd->hqd"}> : () -> ()
    %cst_21 = arith.constant dense<0.000000e+00> : vector<2x16x64xf32>
    %24 = tpu.matmul %23, %5, %cst_21 {dimension_numbers = #tpu.dot_dimension_numbers<[2], [1], [1], [2], [0, 0, 0, 1, 1, 2], [0], [0]>} : vector<2x16x16xf32>, vector<2x16x64xf32>, vector<2x16x64xf32> -> vector<2x16x64xf32>
    "tpu.trace_stop"() : () -> ()
    %25 = vector.shape_cast %24 : vector<2x16x64xf32> to vector<1x2x16x64xf32>
    %c0_22 = arith.constant 0 : index
    %c0_23 = arith.constant 0 : index
    %c0_24 = arith.constant 0 : index
    %c0_25 = arith.constant 0 : index
    %26 = vector.load %arg6[%c0_22, %c0_23, %c0_24, %c0_25] : memref<1x2x16x64xf32, #tpu.memory_space<vmem>>, vector<1x2x16x64xf32>
    tpu.vector_store %arg6[%c0_22, %c0_23, %c0_24, %c0_25], %25 {strides = array<i32>} : memref<1x2x16x64xf32, #tpu.memory_space<vmem>>, vector<1x2x16x64xf32>,
    return
  }
  func.func @transform_0(%arg0: i32) -> (i32, i32, i32, i32) {
    %c0_i32 = arith.constant 0 : i32
    %c0_i32_0 = arith.constant 0 : i32
    %c0_i32_1 = arith.constant 0 : i32
    %c0_i32_2 = arith.constant 0 : i32
    return %arg0, %c0_i32, %c0_i32_0, %c0_i32_1 : i32, i32, i32, i32
  }
  func.func @transform_1(%arg0: i32) -> (i32, i32, i32, i32) {
    %c0_i32 = arith.constant 0 : i32
    %c0_i32_0 = arith.constant 0 : i32
    %c0_i32_1 = arith.constant 0 : i32
    %c0_i32_2 = arith.constant 0 : i32
    return %arg0, %c0_i32, %c0_i32_0, %c0_i32_1 : i32, i32, i32, i32
  }
  func.func @transform_2(%arg0: i32) -> (i32, i32, i32, i32) {
    %c0_i32 = arith.constant 0 : i32
    %c0_i32_0 = arith.constant 0 : i32
    %c0_i32_1 = arith.constant 0 : i32
    %c0_i32_2 = arith.constant 0 : i32
    return %arg0, %c0_i32, %c0_i32_0, %c0_i32_1 : i32, i32, i32, i32
  }
  func.func @transform_3(%arg0: i32) -> (i32, i32, i32, i32) {
    %c0_i32 = arith.constant 0 : i32
    %c0_i32_0 = arith.constant 0 : i32
    %c0_i32_1 = arith.constant 0 : i32
    %c0_i32_2 = arith.constant 0 : i32
    %c0_i32_3 = arith.constant 0 : i32
    return %c0_i32, %c0_i32_0, %c0_i32_1, %c0_i32_2 : i32, i32, i32, i32
  }
  func.func @transform_4(%arg0: i32) -> (i32, i32, i32, i32) {
    %c0_i32 = arith.constant 0 : i32
    %c0_i32_0 = arith.constant 0 : i32
    %c0_i32_1 = arith.constant 0 : i32
    %c0_i32_2 = arith.constant 0 : i32
    return %arg0, %c0_i32, %c0_i32_0, %c0_i32_1 : i32, i32, i32, i32
  }
  func.func @transform_5(%arg0: i32) -> (i32, i32, i32, i32) {
    %c0_i32 = arith.constant 0 : i32
    %c0_i32_0 = arith.constant 0 : i32
    %c0_i32_1 = arith.constant 0 : i32
    %c0_i32_2 = arith.constant 0 : i32
    return %arg0, %c0_i32, %c0_i32_0, %c0_i32_1 : i32, i32, i32, i32
  }
}

module attributes {stable_mosaic.version = 11 : i64} {
  func.func @kernel(%arg0: i32, %arg1: i32, %arg2: i32, %arg3: memref<32x128xf32, #tpu.memory_space<vmem>>, %arg4: memref<128x128xf32, #tpu.memory_space<vmem>>, %arg5: memref<32x128xf32, #tpu.memory_space<vmem>>, %arg6: memref<32x128xf32, #tpu.memory_space<vmem>>, %arg7: memref<32x128xf32, #tpu.memory_space<vmem>>) attributes {dimension_semantics = [#tpu.dimension_semantics<parallel>, #tpu.dimension_semantics<parallel>, #tpu.dimension_semantics<arbitrary>], iteration_bounds = array<i64: 1, 1, 1>, scalar_prefetch = 0 : i64, scratch_operands = 1 : i64, tpu.core_type = #tpu.core_type<tc>, window_params = [{transform_indices = @transform_0, window_bounds = array<i64: 32, 128>}, {transform_indices = @transform_1, window_bounds = array<i64: 128, 128>}, {transform_indices = @transform_2, window_bounds = array<i64: 32, 128>}, {transform_indices = @transform_3, window_bounds = array<i64: 32, 128>}]} {
    %c0_i32 = arith.constant 0 : i32
    %0 = arith.cmpi eq, %arg2, %c0_i32 : i32
    %1 = arith.extui %0 : i1 to i32
    %c0_i32_0 = arith.constant 0 : i32
    %2 = arith.cmpi ne, %1, %c0_i32_0 : i32
    scf.if %2 {
      %cst_10 = arith.constant 0.000000e+00 : f32
      %12 = vector.broadcast %cst_10 : f32 to vector<32x128xf32>
      %c0_11 = arith.constant 0 : index
      %c0_12 = arith.constant 0 : index
      %13 = vector.load %arg7[%c0_11, %c0_12] : memref<32x128xf32, #tpu.memory_space<vmem>>, vector<32x128xf32>
      tpu.vector_store %arg7[%c0_11, %c0_12], %12 {strides = array<i32>} : memref<32x128xf32, #tpu.memory_space<vmem>>, vector<32x128xf32>,
    } else {
    }
    %c0 = arith.constant 0 : index
    %c0_1 = arith.constant 0 : index
    %3 = vector.load %arg7[%c0, %c0_1] : memref<32x128xf32, #tpu.memory_space<vmem>>, vector<32x128xf32>
    %c0_2 = arith.constant 0 : index
    %c0_3 = arith.constant 0 : index
    %4 = vector.load %arg3[%c0_2, %c0_3] : memref<32x128xf32, #tpu.memory_space<vmem>>, vector<32x128xf32>
    %c0_4 = arith.constant 0 : index
    %c0_5 = arith.constant 0 : index
    %5 = vector.load %arg4[%c0_4, %c0_5] : memref<128x128xf32, #tpu.memory_space<vmem>>, vector<128x128xf32>
    %cst = arith.constant dense<0.000000e+00> : vector<32x128xf32>
    %6 = tpu.matmul %4, %5, %cst {dimension_numbers = #tpu.dot_dimension_numbers<[1], [0], [0], [1], [0, 0, 1, 1], [], []>} : vector<32x128xf32>, vector<128x128xf32>, vector<32x128xf32> -> vector<32x128xf32>
    %7 = arith.addf %3, %6 : vector<32x128xf32>
    %c0_6 = arith.constant 0 : index
    %c0_7 = arith.constant 0 : index
    %8 = vector.load %arg7[%c0_6, %c0_7] : memref<32x128xf32, #tpu.memory_space<vmem>>, vector<32x128xf32>
    tpu.vector_store %arg7[%c0_6, %c0_7], %7 {strides = array<i32>} : memref<32x128xf32, #tpu.memory_space<vmem>>, vector<32x128xf32>,
    %c0_i32_8 = arith.constant 0 : i32
    %9 = arith.cmpi eq, %arg2, %c0_i32_8 : i32
    %10 = arith.extui %9 : i1 to i32
    %c0_i32_9 = arith.constant 0 : i32
    %11 = arith.cmpi ne, %10, %c0_i32_9 : i32
    scf.if %11 {
      %c0_10 = arith.constant 0 : index
      %c0_11 = arith.constant 0 : index
      %12 = vector.load %arg7[%c0_10, %c0_11] : memref<32x128xf32, #tpu.memory_space<vmem>>, vector<32x128xf32>
      %c0_12 = arith.constant 0 : index
      %c0_13 = arith.constant 0 : index
      %13 = vector.load %arg5[%c0_12, %c0_13] : memref<32x128xf32, #tpu.memory_space<vmem>>, vector<32x128xf32>
      %14 = arith.addf %12, %13 : vector<32x128xf32>
      %c0_14 = arith.constant 0 : index
      %c0_15 = arith.constant 0 : index
      %15 = vector.load %arg6[%c0_14, %c0_15] : memref<32x128xf32, #tpu.memory_space<vmem>>, vector<32x128xf32>
      tpu.vector_store %arg6[%c0_14, %c0_15], %14 {strides = array<i32>} : memref<32x128xf32, #tpu.memory_space<vmem>>, vector<32x128xf32>,
    } else {
    }
    return
  }
  func.func @transform_0(%arg0: i32, %arg1: i32, %arg2: i32) -> (i32, i32) {
    %c0_i32 = arith.constant 0 : i32
    return %arg0, %arg2 : i32, i32
  }
  func.func @transform_1(%arg0: i32, %arg1: i32, %arg2: i32) -> (i32, i32) {
    %c0_i32 = arith.constant 0 : i32
    return %arg2, %arg1 : i32, i32
  }
  func.func @transform_2(%arg0: i32, %arg1: i32, %arg2: i32) -> (i32, i32) {
    %c0_i32 = arith.constant 0 : i32
    return %arg0, %arg1 : i32, i32
  }
  func.func @transform_3(%arg0: i32, %arg1: i32, %arg2: i32) -> (i32, i32) {
    %c0_i32 = arith.constant 0 : i32
    return %arg0, %arg1 : i32, i32
  }
}

module attributes {stable_mosaic.version = 11 : i64} {
  func.func @kernel(%arg0: i32, %arg1: i32, %arg2: i32, %arg3: memref<32x128xf32, #tpu.memory_space<vmem>>, %arg4: memref<128x128xf32, #tpu.memory_space<vmem>>, %arg5: memref<32x128xf32, #tpu.memory_space<vmem>>, %arg6: memref<32x128xf32, #tpu.memory_space<vmem>>, %arg7: memref<32x128xf32, #tpu.memory_space<vmem>>) attributes {dimension_semantics = [#tpu.dimension_semantics<parallel>, #tpu.dimension_semantics<parallel>, #tpu.dimension_semantics<arbitrary>], iteration_bounds = array<i64: 1, 1, 2>, scalar_prefetch = 0 : i64, scratch_operands = 1 : i64, tpu.core_type = #tpu.core_type<tc>, window_params = [{transform_indices = @transform_0, window_bounds = array<i64: 32, 128>}, {transform_indices = @transform_1, window_bounds = array<i64: 128, 128>}, {transform_indices = @transform_2, window_bounds = array<i64: 32, 128>}, {transform_indices = @transform_3, window_bounds = array<i64: 32, 128>}]} {
    %c0_i32 = arith.constant 0 : i32
    %0 = arith.cmpi eq, %arg2, %c0_i32 : i32
    %1 = arith.extui %0 : i1 to i32
    %c0_i32_0 = arith.constant 0 : i32
    %2 = arith.cmpi ne, %1, %c0_i32_0 : i32
    scf.if %2 {
      %cst_9 = arith.constant 0.000000e+00 : f32
      %12 = vector.broadcast %cst_9 : f32 to vector<32x128xf32>
      %c0_10 = arith.constant 0 : index
      %c0_11 = arith.constant 0 : index
      %13 = vector.load %arg7[%c0_10, %c0_11] : memref<32x128xf32, #tpu.memory_space<vmem>>, vector<32x128xf32>
      tpu.vector_store %arg7[%c0_10, %c0_11], %12 {strides = array<i32>} : memref<32x128xf32, #tpu.memory_space<vmem>>, vector<32x128xf32>,
    } else {
    }
    %c0 = arith.constant 0 : index
    %c0_1 = arith.constant 0 : index
    %3 = vector.load %arg7[%c0, %c0_1] : memref<32x128xf32, #tpu.memory_space<vmem>>, vector<32x128xf32>
    %c0_2 = arith.constant 0 : index
    %c0_3 = arith.constant 0 : index
    %4 = vector.load %arg3[%c0_2, %c0_3] : memref<32x128xf32, #tpu.memory_space<vmem>>, vector<32x128xf32>
    %c0_4 = arith.constant 0 : index
    %c0_5 = arith.constant 0 : index
    %5 = vector.load %arg4[%c0_4, %c0_5] : memref<128x128xf32, #tpu.memory_space<vmem>>, vector<128x128xf32>
    %cst = arith.constant dense<0.000000e+00> : vector<32x128xf32>
    %6 = tpu.matmul %4, %5, %cst {dimension_numbers = #tpu.dot_dimension_numbers<[1], [0], [0], [1], [0, 0, 1, 1], [], []>} : vector<32x128xf32>, vector<128x128xf32>, vector<32x128xf32> -> vector<32x128xf32>
    %7 = arith.addf %3, %6 : vector<32x128xf32>
    %c0_6 = arith.constant 0 : index
    %c0_7 = arith.constant 0 : index
    %8 = vector.load %arg7[%c0_6, %c0_7] : memref<32x128xf32, #tpu.memory_space<vmem>>, vector<32x128xf32>
    tpu.vector_store %arg7[%c0_6, %c0_7], %7 {strides = array<i32>} : memref<32x128xf32, #tpu.memory_space<vmem>>, vector<32x128xf32>,
    %c1_i32 = arith.constant 1 : i32
    %9 = arith.cmpi eq, %arg2, %c1_i32 : i32
    %10 = arith.extui %9 : i1 to i32
    %c0_i32_8 = arith.constant 0 : i32
    %11 = arith.cmpi ne, %10, %c0_i32_8 : i32
    scf.if %11 {
      %c0_9 = arith.constant 0 : index
      %c0_10 = arith.constant 0 : index
      %12 = vector.load %arg7[%c0_9, %c0_10] : memref<32x128xf32, #tpu.memory_space<vmem>>, vector<32x128xf32>
      %c0_11 = arith.constant 0 : index
      %c0_12 = arith.constant 0 : index
      %13 = vector.load %arg5[%c0_11, %c0_12] : memref<32x128xf32, #tpu.memory_space<vmem>>, vector<32x128xf32>
      %14 = arith.addf %12, %13 : vector<32x128xf32>
      %c0_13 = arith.constant 0 : index
      %c0_14 = arith.constant 0 : index
      %15 = vector.load %arg6[%c0_13, %c0_14] : memref<32x128xf32, #tpu.memory_space<vmem>>, vector<32x128xf32>
      tpu.vector_store %arg6[%c0_13, %c0_14], %14 {strides = array<i32>} : memref<32x128xf32, #tpu.memory_space<vmem>>, vector<32x128xf32>,
    } else {
    }
    return
  }
  func.func @transform_0(%arg0: i32, %arg1: i32, %arg2: i32) -> (i32, i32) {
    %c0_i32 = arith.constant 0 : i32
    return %arg0, %arg2 : i32, i32
  }
  func.func @transform_1(%arg0: i32, %arg1: i32, %arg2: i32) -> (i32, i32) {
    %c0_i32 = arith.constant 0 : i32
    return %arg2, %arg1 : i32, i32
  }
  func.func @transform_2(%arg0: i32, %arg1: i32, %arg2: i32) -> (i32, i32) {
    %c0_i32 = arith.constant 0 : i32
    return %arg0, %arg1 : i32, i32
  }
  func.func @transform_3(%arg0: i32, %arg1: i32, %arg2: i32) -> (i32, i32) {
    %c0_i32 = arith.constant 0 : i32
    return %arg0, %arg1 : i32, i32
  }
}

module attributes {stable_mosaic.version = 11 : i64} {
  func.func @_rmsnorm_kernel(%arg0: i32, %arg1: memref<32x128xf32, #tpu.memory_space<vmem>>, %arg2: memref<1x128xf32, #tpu.memory_space<vmem>>, %arg3: memref<32x128xf32, #tpu.memory_space<vmem>>) attributes {dimension_semantics = [#tpu.dimension_semantics<parallel>], iteration_bounds = array<i64: 1>, scalar_prefetch = 0 : i64, scratch_operands = 0 : i64, tpu.core_type = #tpu.core_type<tc>, window_params = [{transform_indices = @transform_0, window_bounds = array<i64: 32, 128>}, {pipeline_mode = #tpu.pipeline_mode<synchronous>, transform_indices = @transform_1, window_bounds = array<i64: 1, 128>}, {transform_indices = @transform_2, window_bounds = array<i64: 32, 128>}]} {
    %c0 = arith.constant 0 : index
    %c0_0 = arith.constant 0 : index
    %0 = vector.load %arg1[%c0, %c0_0] : memref<32x128xf32, #tpu.memory_space<vmem>>, vector<32x128xf32>
    %1 = arith.mulf %0, %0 : vector<32x128xf32>
    %cst = arith.constant dense<0.000000e+00> : vector<32xf32>
    %2 = vector.multi_reduction <add>, %1, %cst [1] : vector<32x128xf32> to vector<32xf32>
    %3 = vector.shape_cast %2 : vector<32xf32> to vector<32x1xf32>
    %cst_1 = arith.constant 1.280000e+02 : f32
    %4 = vector.broadcast %cst_1 : f32 to vector<32x1xf32>
    %5 = arith.divf %3, %4 : vector<32x1xf32>
    %cst_2 = arith.constant 9.99999997E-7 : f32
    %6 = vector.broadcast %cst_2 : f32 to vector<32x1xf32>
    %7 = arith.addf %5, %6 : vector<32x1xf32>
    %8 = math.rsqrt %7 : vector<32x1xf32>
    %9 = vector.broadcast %8 : vector<32x1xf32> to vector<32x128xf32>
    %10 = arith.mulf %0, %9 : vector<32x128xf32>
    %c0_3 = arith.constant 0 : index
    %c0_4 = arith.constant 0 : index
    %11 = vector.load %arg2[%c0_3, %c0_4] : memref<1x128xf32, #tpu.memory_space<vmem>>, vector<1x128xf32>
    %12 = vector.broadcast %11 : vector<1x128xf32> to vector<32x128xf32>
    %13 = arith.mulf %10, %12 : vector<32x128xf32>
    %c0_5 = arith.constant 0 : index
    %c0_6 = arith.constant 0 : index
    %14 = vector.load %arg3[%c0_5, %c0_6] : memref<32x128xf32, #tpu.memory_space<vmem>>, vector<32x128xf32>
    tpu.vector_store %arg3[%c0_5, %c0_6], %13 {strides = array<i32>} : memref<32x128xf32, #tpu.memory_space<vmem>>, vector<32x128xf32>,
    return
  }
  func.func @transform_0(%arg0: i32) -> (i32, i32) {
    %c0_i32 = arith.constant 0 : i32
    %c0_i32_0 = arith.constant 0 : i32
    return %arg0, %c0_i32 : i32, i32
  }
  func.func @transform_1(%arg0: i32) -> (i32, i32) {
    %c0_i32 = arith.constant 0 : i32
    %c0_i32_0 = arith.constant 0 : i32
    %c0_i32_1 = arith.constant 0 : i32
    return %c0_i32, %c0_i32_0 : i32, i32
  }
  func.func @transform_2(%arg0: i32) -> (i32, i32) {
    %c0_i32 = arith.constant 0 : i32
    %c0_i32_0 = arith.constant 0 : i32
    return %arg0, %c0_i32 : i32, i32
  }
}

module attributes {stable_mosaic.version = 11 : i64} {
  func.func @kernel(%arg0: i32, %arg1: i32, %arg2: i32, %arg3: memref<32x128xf32, #tpu.memory_space<vmem>>, %arg4: memref<128x256xf32, #tpu.memory_space<vmem>>, %arg5: memref<32x256xf32, #tpu.memory_space<vmem>>, %arg6: memref<32x256xf32, #tpu.memory_space<vmem>>) attributes {dimension_semantics = [#tpu.dimension_semantics<parallel>, #tpu.dimension_semantics<parallel>, #tpu.dimension_semantics<arbitrary>], iteration_bounds = array<i64: 1, 1, 1>, scalar_prefetch = 0 : i64, scratch_operands = 1 : i64, tpu.core_type = #tpu.core_type<tc>, window_params = [{transform_indices = @transform_0, window_bounds = array<i64: 32, 128>}, {transform_indices = @transform_1, window_bounds = array<i64: 128, 256>}, {transform_indices = @transform_2, window_bounds = array<i64: 32, 256>}]} {
    %c0_i32 = arith.constant 0 : i32
    %0 = arith.cmpi eq, %arg2, %c0_i32 : i32
    %1 = arith.extui %0 : i1 to i32
    %c0_i32_0 = arith.constant 0 : i32
    %2 = arith.cmpi ne, %1, %c0_i32_0 : i32
    scf.if %2 {
      %cst_10 = arith.constant 0.000000e+00 : f32
      %12 = vector.broadcast %cst_10 : f32 to vector<32x256xf32>
      %c0_11 = arith.constant 0 : index
      %c0_12 = arith.constant 0 : index
      %13 = vector.load %arg6[%c0_11, %c0_12] : memref<32x256xf32, #tpu.memory_space<vmem>>, vector<32x256xf32>
      tpu.vector_store %arg6[%c0_11, %c0_12], %12 {strides = array<i32>} : memref<32x256xf32, #tpu.memory_space<vmem>>, vector<32x256xf32>,
    } else {
    }
    %c0 = arith.constant 0 : index
    %c0_1 = arith.constant 0 : index
    %3 = vector.load %arg6[%c0, %c0_1] : memref<32x256xf32, #tpu.memory_space<vmem>>, vector<32x256xf32>
    %c0_2 = arith.constant 0 : index
    %c0_3 = arith.constant 0 : index
    %4 = vector.load %arg3[%c0_2, %c0_3] : memref<32x128xf32, #tpu.memory_space<vmem>>, vector<32x128xf32>
    %c0_4 = arith.constant 0 : index
    %c0_5 = arith.constant 0 : index
    %5 = vector.load %arg4[%c0_4, %c0_5] : memref<128x256xf32, #tpu.memory_space<vmem>>, vector<128x256xf32>
    %cst = arith.constant dense<0.000000e+00> : vector<32x256xf32>
    %6 = tpu.matmul %4, %5, %cst {dimension_numbers = #tpu.dot_dimension_numbers<[1], [0], [0], [1], [0, 0, 1, 1], [], []>} : vector<32x128xf32>, vector<128x256xf32>, vector<32x256xf32> -> vector<32x256xf32>
    %7 = arith.addf %3, %6 : vector<32x256xf32>
    %c0_6 = arith.constant 0 : index
    %c0_7 = arith.constant 0 : index
    %8 = vector.load %arg6[%c0_6, %c0_7] : memref<32x256xf32, #tpu.memory_space<vmem>>, vector<32x256xf32>
    tpu.vector_store %arg6[%c0_6, %c0_7], %7 {strides = array<i32>} : memref<32x256xf32, #tpu.memory_space<vmem>>, vector<32x256xf32>,
    %c0_i32_8 = arith.constant 0 : i32
    %9 = arith.cmpi eq, %arg2, %c0_i32_8 : i32
    %10 = arith.extui %9 : i1 to i32
    %c0_i32_9 = arith.constant 0 : i32
    %11 = arith.cmpi ne, %10, %c0_i32_9 : i32
    scf.if %11 {
      %c0_10 = arith.constant 0 : index
      %c0_11 = arith.constant 0 : index
      %12 = vector.load %arg6[%c0_10, %c0_11] : memref<32x256xf32, #tpu.memory_space<vmem>>, vector<32x256xf32>
      %c0_12 = arith.constant 0 : index
      %c0_13 = arith.constant 0 : index
      %13 = vector.load %arg5[%c0_12, %c0_13] : memref<32x256xf32, #tpu.memory_space<vmem>>, vector<32x256xf32>
      tpu.vector_store %arg5[%c0_12, %c0_13], %12 {strides = array<i32>} : memref<32x256xf32, #tpu.memory_space<vmem>>, vector<32x256xf32>,
    } else {
    }
    return
  }
  func.func @transform_0(%arg0: i32, %arg1: i32, %arg2: i32) -> (i32, i32) {
    %c0_i32 = arith.constant 0 : i32
    return %arg0, %arg2 : i32, i32
  }
  func.func @transform_1(%arg0: i32, %arg1: i32, %arg2: i32) -> (i32, i32) {
    %c0_i32 = arith.constant 0 : i32
    return %arg2, %arg1 : i32, i32
  }
  func.func @transform_2(%arg0: i32, %arg1: i32, %arg2: i32) -> (i32, i32) {
    %c0_i32 = arith.constant 0 : i32
    return %arg0, %arg1 : i32, i32
  }
}

module attributes {stable_mosaic.version = 11 : i64} {
  func.func @_norm_mm_kernel(%arg0: i32, %arg1: i32, %arg2: memref<16x128xf32, #tpu.memory_space<vmem>>, %arg3: memref<1x128xf32, #tpu.memory_space<vmem>>, %arg4: memref<128x128xf32, #tpu.memory_space<vmem>>, %arg5: memref<16x128xf32, #tpu.memory_space<vmem>>) attributes {dimension_semantics = [#tpu.dimension_semantics<parallel>, #tpu.dimension_semantics<parallel>], iteration_bounds = array<i64: 1, 3>, scalar_prefetch = 0 : i64, scratch_operands = 0 : i64, tpu.core_type = #tpu.core_type<tc>, window_params = [{transform_indices = @transform_0, window_bounds = array<i64: 16, 128>}, {pipeline_mode = #tpu.pipeline_mode<synchronous>, transform_indices = @transform_1, window_bounds = array<i64: 1, 128>}, {transform_indices = @transform_2, window_bounds = array<i64: 128, 128>}, {transform_indices = @transform_3, window_bounds = array<i64: 16, 128>}]} {
    %c0 = arith.constant 0 : index
    %c0_0 = arith.constant 0 : index
    %0 = vector.load %arg2[%c0, %c0_0] : memref<16x128xf32, #tpu.memory_space<vmem>>, vector<16x128xf32>
    %1 = arith.mulf %0, %0 : vector<16x128xf32>
    %cst = arith.constant dense<0.000000e+00> : vector<16xf32>
    %2 = vector.multi_reduction <add>, %1, %cst [1] : vector<16x128xf32> to vector<16xf32>
    %3 = vector.shape_cast %2 : vector<16xf32> to vector<16x1xf32>
    %cst_1 = arith.constant 1.280000e+02 : f32
    %4 = vector.broadcast %cst_1 : f32 to vector<16x1xf32>
    %5 = arith.divf %3, %4 : vector<16x1xf32>
    %cst_2 = arith.constant 9.99999997E-7 : f32
    %6 = vector.broadcast %cst_2 : f32 to vector<16x1xf32>
    %7 = arith.addf %5, %6 : vector<16x1xf32>
    %8 = math.rsqrt %7 : vector<16x1xf32>
    %9 = vector.broadcast %8 : vector<16x1xf32> to vector<16x128xf32>
    %10 = arith.mulf %0, %9 : vector<16x128xf32>
    %c0_3 = arith.constant 0 : index
    %c0_4 = arith.constant 0 : index
    %11 = vector.load %arg3[%c0_3, %c0_4] : memref<1x128xf32, #tpu.memory_space<vmem>>, vector<1x128xf32>
    %12 = vector.broadcast %11 : vector<1x128xf32> to vector<16x128xf32>
    %13 = arith.mulf %10, %12 : vector<16x128xf32>
    %c0_5 = arith.constant 0 : index
    %c0_6 = arith.constant 0 : index
    %14 = vector.load %arg4[%c0_5, %c0_6] : memref<128x128xf32, #tpu.memory_space<vmem>>, vector<128x128xf32>
    %cst_7 = arith.constant dense<0.000000e+00> : vector<16x128xf32>
    %15 = tpu.matmul %13, %14, %cst_7 {dimension_numbers = #tpu.dot_dimension_numbers<[1], [0], [0], [1], [0, 0, 1, 1], [], []>} : vector<16x128xf32>, vector<128x128xf32>, vector<16x128xf32> -> vector<16x128xf32>
    %c0_8 = arith.constant 0 : index
    %c0_9 = arith.constant 0 : index
    %16 = vector.load %arg5[%c0_8, %c0_9] : memref<16x128xf32, #tpu.memory_space<vmem>>, vector<16x128xf32>
    tpu.vector_store %arg5[%c0_8, %c0_9], %15 {strides = array<i32>} : memref<16x128xf32, #tpu.memory_space<vmem>>, vector<16x128xf32>,
    return
  }
  func.func @transform_0(%arg0: i32, %arg1: i32) -> (i32, i32) {
    %c0_i32 = arith.constant 0 : i32
    %c0_i32_0 = arith.constant 0 : i32
    return %arg0, %c0_i32 : i32, i32
  }
  func.func @transform_1(%arg0: i32, %arg1: i32) -> (i32, i32) {
    %c0_i32 = arith.constant 0 : i32
    %c0_i32_0 = arith.constant 0 : i32
    %c0_i32_1 = arith.constant 0 : i32
    return %c0_i32, %c0_i32_0 : i32, i32
  }
  func.func @transform_2(%arg0: i32, %arg1: i32) -> (i32, i32) {
    %c0_i32 = arith.constant 0 : i32
    %c0_i32_0 = arith.constant 0 : i32
    return %c0_i32, %arg1 : i32, i32
  }
  func.func @transform_3(%arg0: i32, %arg1: i32) -> (i32, i32) {
    %c0_i32 = arith.constant 0 : i32
    return %arg0, %arg1 : i32, i32
  }
}

module attributes {stable_mosaic.version = 11 : i64} {
  func.func @_attn_kernel(%arg0: i32, %arg1: memref<1x2x8x64xf32, #tpu.memory_space<vmem>>, %arg2: memref<1x2x8x64xf32, #tpu.memory_space<vmem>>, %arg3: memref<1x2x8x64xf32, #tpu.memory_space<vmem>>, %arg4: memref<1x2x8x8xf32, #tpu.memory_space<vmem>>, %arg5: memref<1x1x1x8xf32, #tpu.memory_space<vmem>>, %arg6: memref<1x2x8x64xf32, #tpu.memory_space<vmem>>) attributes {dimension_semantics = [#tpu.dimension_semantics<parallel>], iteration_bounds = array<i64: 2>, scalar_prefetch = 0 : i64, scratch_operands = 0 : i64, tpu.core_type = #tpu.core_type<tc>, window_params = [{transform_indices = @transform_0, window_bounds = array<i64: 1, 2, 8, 64>}, {transform_indices = @transform_1, window_bounds = array<i64: 1, 2, 8, 64>}, {transform_indices = @transform_2, window_bounds = array<i64: 1, 2, 8, 64>}, {pipeline_mode = #tpu.pipeline_mode<synchronous>, transform_indices = @transform_3, window_bounds = array<i64: 1, 2, 8, 8>}, {transform_indices = @transform_4, window_bounds = array<i64: 1, 1, 1, 8>}, {transform_indices = @transform_5, window_bounds = array<i64: 1, 2, 8, 64>}]} {
    %c0 = arith.constant 0 : index
    %c0_0 = arith.constant 0 : index
    %c0_1 = arith.constant 0 : index
    %c0_2 = arith.constant 0 : index
    %0 = vector.load %arg1[%c0, %c0_0, %c0_1, %c0_2] : memref<1x2x8x64xf32, #tpu.memory_space<vmem>>, vector<1x2x8x64xf32>
    %1 = vector.shape_cast %0 : vector<1x2x8x64xf32> to vector<2x8x64xf32>
    %c0_3 = arith.constant 0 : index
    %c0_4 = arith.constant 0 : index
    %c0_5 = arith.constant 0 : index
    %c0_6 = arith.constant 0 : index
    %2 = vector.load %arg2[%c0_3, %c0_4, %c0_5, %c0_6] : memref<1x2x8x64xf32, #tpu.memory_space<vmem>>, vector<1x2x8x64xf32>
    %3 = vector.shape_cast %2 : vector<1x2x8x64xf32> to vector<2x8x64xf32>
    %c0_7 = arith.constant 0 : index
    %c0_8 = arith.constant 0 : index
    %c0_9 = arith.constant 0 : index
    %c0_10 = arith.constant 0 : index
    %4 = vector.load %arg3[%c0_7, %c0_8, %c0_9, %c0_10] : memref<1x2x8x64xf32, #tpu.memory_space<vmem>>, vector<1x2x8x64xf32>
    %5 = vector.shape_cast %4 : vector<1x2x8x64xf32> to vector<2x8x64xf32>
    %c0_11 = arith.constant 0 : index
    %c0_12 = arith.constant 0 : index
    %c0_13 = arith.constant 0 : index
    %c0_14 = arith.constant 0 : index
    %6 = vector.load %arg4[%c0_11, %c0_12, %c0_13, %c0_14] : memref<1x2x8x8xf32, #tpu.memory_space<vmem>>, vector<1x2x8x8xf32>
    %7 = vector.shape_cast %6 : vector<1x2x8x8xf32> to vector<2x8x8xf32>
    %c0_15 = arith.constant 0 : index
    %c0_16 = arith.constant 0 : index
    %c0_17 = arith.constant 0 : index
    %c0_18 = arith.constant 0 : index
    %8 = vector.load %arg5[%c0_15, %c0_16, %c0_17, %c0_18] : memref<1x1x1x8xf32, #tpu.memory_space<vmem>>, vector<1x1x1x8xf32>
    %9 = vector.shape_cast %8 : vector<1x1x1x8xf32> to vector<1x1x8xf32>
    %10 = vector.broadcast %9 : vector<1x1x8xf32> to vector<2x8x8xf32>
    %11 = arith.addf %7, %10 : vector<2x8x8xf32>
    "tpu.trace_start"() <{level = 10 : i32, message = "hqd,hkd->hqk"}> : () -> ()
    %cst = arith.constant dense<0.000000e+00> : vector<2x8x8xf32>
    %12 = tpu.matmul %1, %3, %cst {dimension_numbers = #tpu.dot_dimension_numbers<[2], [2], [1], [1], [0, 0, 0, 1, 1, 1], [0], [0]>} : vector<2x8x64xf32>, vector<2x8x64xf32>, vector<2x8x8xf32> -> vector<2x8x8xf32>
    "tpu.trace_stop"() : () -> ()
    %13 = arith.addf %12, %11 : vector<2x8x8xf32>
    %cst_19 = arith.constant dense<0xFF800000> : vector<2x8xf32>
    %14 = vector.multi_reduction <maximumf>, %13, %cst_19 [2] : vector<2x8x8xf32> to vector<2x8xf32>
    %15 = vector.shape_cast %14 : vector<2x8xf32> to vector<2x8x1xf32>
    %16 = vector.broadcast %15 : vector<2x8x1xf32> to vector<2x8x8xf32>
    %17 = arith.subf %13, %16 : vector<2x8x8xf32>
    %18 = math.exp %17 : vector<2x8x8xf32>
    %cst_20 = arith.constant dense<0.000000e+00> : vector<2x8xf32>
    %19 = vector.multi_reduction <add>, %18, %cst_20 [2] : vector<2x8x8xf32> to vector<2x8xf32>
    %20 = vector.shape_cast %19 : vector<2x8xf32> to vector<2x8x1xf32>
    %21 = tpu.reciprocal %20 {approx = true} : vector<2x8x1xf32> -> vector<2x8x1xf32>
    %22 = vector.broadcast %21 : vector<2x8x1xf32> to vector<2x8x8xf32>
    %23 = arith.mulf %18, %22 : vector<2x8x8xf32>
    "tpu.trace_start"() <{level = 10 : i32, message = "hqk,hkd->hqd"}> : () -> ()
    %cst_21 = arith.constant dense<0.000000e+00> : vector<2x8x64xf32>
    %24 = tpu.matmul %23, %5, %cst_21 {dimension_numbers = #tpu.dot_dimension_numbers<[2], [1], [1], [2], [0, 0, 0, 1, 1, 2], [0], [0]>} : vector<2x8x8xf32>, vector<2x8x64xf32>, vector<2x8x64xf32> -> vector<2x8x64xf32>
    "tpu.trace_stop"() : () -> ()
    %25 = vector.shape_cast %24 : vector<2x8x64xf32> to vector<1x2x8x64xf32>
    %c0_22 = arith.constant 0 : index
    %c0_23 = arith.constant 0 : index
    %c0_24 = arith.constant 0 : index
    %c0_25 = arith.constant 0 : index
    %26 = vector.load %arg6[%c0_22, %c0_23, %c0_24, %c0_25] : memref<1x2x8x64xf32, #tpu.memory_space<vmem>>, vector<1x2x8x64xf32>
    tpu.vector_store %arg6[%c0_22, %c0_23, %c0_24, %c0_25], %25 {strides = array<i32>} : memref<1x2x8x64xf32, #tpu.memory_space<vmem>>, vector<1x2x8x64xf32>,
    return
  }
  func.func @transform_0(%arg0: i32) -> (i32, i32, i32, i32) {
    %c0_i32 = arith.constant 0 : i32
    %c0_i32_0 = arith.constant 0 : i32
    %c0_i32_1 = arith.constant 0 : i32
    %c0_i32_2 = arith.constant 0 : i32
    return %arg0, %c0_i32, %c0_i32_0, %c0_i32_1 : i32, i32, i32, i32
  }
  func.func @transform_1(%arg0: i32) -> (i32, i32, i32, i32) {
    %c0_i32 = arith.constant 0 : i32
    %c0_i32_0 = arith.constant 0 : i32
    %c0_i32_1 = arith.constant 0 : i32
    %c0_i32_2 = arith.constant 0 : i32
    return %arg0, %c0_i32, %c0_i32_0, %c0_i32_1 : i32, i32, i32, i32
  }
  func.func @transform_2(%arg0: i32) -> (i32, i32, i32, i32) {
    %c0_i32 = arith.constant 0 : i32
    %c0_i32_0 = arith.constant 0 : i32
    %c0_i32_1 = arith.constant 0 : i32
    %c0_i32_2 = arith.constant 0 : i32
    return %arg0, %c0_i32, %c0_i32_0, %c0_i32_1 : i32, i32, i32, i32
  }
  func.func @transform_3(%arg0: i32) -> (i32, i32, i32, i32) {
    %c0_i32 = arith.constant 0 : i32
    %c0_i32_0 = arith.constant 0 : i32
    %c0_i32_1 = arith.constant 0 : i32
    %c0_i32_2 = arith.constant 0 : i32
    %c0_i32_3 = arith.constant 0 : i32
    return %c0_i32, %c0_i32_0, %c0_i32_1, %c0_i32_2 : i32, i32, i32, i32
  }
  func.func @transform_4(%arg0: i32) -> (i32, i32, i32, i32) {
    %c0_i32 = arith.constant 0 : i32
    %c0_i32_0 = arith.constant 0 : i32
    %c0_i32_1 = arith.constant 0 : i32
    %c0_i32_2 = arith.constant 0 : i32
    return %arg0, %c0_i32, %c0_i32_0, %c0_i32_1 : i32, i32, i32, i32
  }
  func.func @transform_5(%arg0: i32) -> (i32, i32, i32, i32) {
    %c0_i32 = arith.constant 0 : i32
    %c0_i32_0 = arith.constant 0 : i32
    %c0_i32_1 = arith.constant 0 : i32
    %c0_i32_2 = arith.constant 0 : i32
    return %arg0, %c0_i32, %c0_i32_0, %c0_i32_1 : i32, i32, i32, i32
  }
}

module attributes {stable_mosaic.version = 11 : i64} {
  func.func @kernel(%arg0: i32, %arg1: i32, %arg2: i32, %arg3: memref<16x128xf32, #tpu.memory_space<vmem>>, %arg4: memref<128x128xf32, #tpu.memory_space<vmem>>, %arg5: memref<16x128xf32, #tpu.memory_space<vmem>>, %arg6: memref<16x128xf32, #tpu.memory_space<vmem>>, %arg7: memref<16x128xf32, #tpu.memory_space<vmem>>) attributes {dimension_semantics = [#tpu.dimension_semantics<parallel>, #tpu.dimension_semantics<parallel>, #tpu.dimension_semantics<arbitrary>], iteration_bounds = array<i64: 1, 1, 1>, scalar_prefetch = 0 : i64, scratch_operands = 1 : i64, tpu.core_type = #tpu.core_type<tc>, window_params = [{transform_indices = @transform_0, window_bounds = array<i64: 16, 128>}, {transform_indices = @transform_1, window_bounds = array<i64: 128, 128>}, {transform_indices = @transform_2, window_bounds = array<i64: 16, 128>}, {transform_indices = @transform_3, window_bounds = array<i64: 16, 128>}]} {
    %c0_i32 = arith.constant 0 : i32
    %0 = arith.cmpi eq, %arg2, %c0_i32 : i32
    %1 = arith.extui %0 : i1 to i32
    %c0_i32_0 = arith.constant 0 : i32
    %2 = arith.cmpi ne, %1, %c0_i32_0 : i32
    scf.if %2 {
      %cst_10 = arith.constant 0.000000e+00 : f32
      %12 = vector.broadcast %cst_10 : f32 to vector<16x128xf32>
      %c0_11 = arith.constant 0 : index
      %c0_12 = arith.constant 0 : index
      %13 = vector.load %arg7[%c0_11, %c0_12] : memref<16x128xf32, #tpu.memory_space<vmem>>, vector<16x128xf32>
      tpu.vector_store %arg7[%c0_11, %c0_12], %12 {strides = array<i32>} : memref<16x128xf32, #tpu.memory_space<vmem>>, vector<16x128xf32>,
    } else {
    }
    %c0 = arith.constant 0 : index
    %c0_1 = arith.constant 0 : index
    %3 = vector.load %arg7[%c0, %c0_1] : memref<16x128xf32, #tpu.memory_space<vmem>>, vector<16x128xf32>
    %c0_2 = arith.constant 0 : index
    %c0_3 = arith.constant 0 : index
    %4 = vector.load %arg3[%c0_2, %c0_3] : memref<16x128xf32, #tpu.memory_space<vmem>>, vector<16x128xf32>
    %c0_4 = arith.constant 0 : index
    %c0_5 = arith.constant 0 : index
    %5 = vector.load %arg4[%c0_4, %c0_5] : memref<128x128xf32, #tpu.memory_space<vmem>>, vector<128x128xf32>
    %cst = arith.constant dense<0.000000e+00> : vector<16x128xf32>
    %6 = tpu.matmul %4, %5, %cst {dimension_numbers = #tpu.dot_dimension_numbers<[1], [0], [0], [1], [0, 0, 1, 1], [], []>} : vector<16x128xf32>, vector<128x128xf32>, vector<16x128xf32> -> vector<16x128xf32>
    %7 = arith.addf %3, %6 : vector<16x128xf32>
    %c0_6 = arith.constant 0 : index
    %c0_7 = arith.constant 0 : index
    %8 = vector.load %arg7[%c0_6, %c0_7] : memref<16x128xf32, #tpu.memory_space<vmem>>, vector<16x128xf32>
    tpu.vector_store %arg7[%c0_6, %c0_7], %7 {strides = array<i32>} : memref<16x128xf32, #tpu.memory_space<vmem>>, vector<16x128xf32>,
    %c0_i32_8 = arith.constant 0 : i32
    %9 = arith.cmpi eq, %arg2, %c0_i32_8 : i32
    %10 = arith.extui %9 : i1 to i32
    %c0_i32_9 = arith.constant 0 : i32
    %11 = arith.cmpi ne, %10, %c0_i32_9 : i32
    scf.if %11 {
      %c0_10 = arith.constant 0 : index
      %c0_11 = arith.constant 0 : index
      %12 = vector.load %arg7[%c0_10, %c0_11] : memref<16x128xf32, #tpu.memory_space<vmem>>, vector<16x128xf32>
      %c0_12 = arith.constant 0 : index
      %c0_13 = arith.constant 0 : index
      %13 = vector.load %arg5[%c0_12, %c0_13] : memref<16x128xf32, #tpu.memory_space<vmem>>, vector<16x128xf32>
      %14 = arith.addf %12, %13 : vector<16x128xf32>
      %c0_14 = arith.constant 0 : index
      %c0_15 = arith.constant 0 : index
      %15 = vector.load %arg6[%c0_14, %c0_15] : memref<16x128xf32, #tpu.memory_space<vmem>>, vector<16x128xf32>
      tpu.vector_store %arg6[%c0_14, %c0_15], %14 {strides = array<i32>} : memref<16x128xf32, #tpu.memory_space<vmem>>, vector<16x128xf32>,
    } else {
    }
    return
  }
  func.func @transform_0(%arg0: i32, %arg1: i32, %arg2: i32) -> (i32, i32) {
    %c0_i32 = arith.constant 0 : i32
    return %arg0, %arg2 : i32, i32
  }
  func.func @transform_1(%arg0: i32, %arg1: i32, %arg2: i32) -> (i32, i32) {
    %c0_i32 = arith.constant 0 : i32
    return %arg2, %arg1 : i32, i32
  }
  func.func @transform_2(%arg0: i32, %arg1: i32, %arg2: i32) -> (i32, i32) {
    %c0_i32 = arith.constant 0 : i32
    return %arg0, %arg1 : i32, i32
  }
  func.func @transform_3(%arg0: i32, %arg1: i32, %arg2: i32) -> (i32, i32) {
    %c0_i32 = arith.constant 0 : i32
    return %arg0, %arg1 : i32, i32
  }
}

module attributes {stable_mosaic.version = 11 : i64} {
  func.func @_norm_mm_kernel(%arg0: i32, %arg1: i32, %arg2: memref<16x128xf32, #tpu.memory_space<vmem>>, %arg3: memref<1x128xf32, #tpu.memory_space<vmem>>, %arg4: memref<128x128xf32, #tpu.memory_space<vmem>>, %arg5: memref<16x128xf32, #tpu.memory_space<vmem>>) attributes {dimension_semantics = [#tpu.dimension_semantics<parallel>, #tpu.dimension_semantics<parallel>], iteration_bounds = array<i64: 1, 1>, scalar_prefetch = 0 : i64, scratch_operands = 0 : i64, tpu.core_type = #tpu.core_type<tc>, window_params = [{transform_indices = @transform_0, window_bounds = array<i64: 16, 128>}, {pipeline_mode = #tpu.pipeline_mode<synchronous>, transform_indices = @transform_1, window_bounds = array<i64: 1, 128>}, {transform_indices = @transform_2, window_bounds = array<i64: 128, 128>}, {transform_indices = @transform_3, window_bounds = array<i64: 16, 128>}]} {
    %c0 = arith.constant 0 : index
    %c0_0 = arith.constant 0 : index
    %0 = vector.load %arg2[%c0, %c0_0] : memref<16x128xf32, #tpu.memory_space<vmem>>, vector<16x128xf32>
    %1 = arith.mulf %0, %0 : vector<16x128xf32>
    %cst = arith.constant dense<0.000000e+00> : vector<16xf32>
    %2 = vector.multi_reduction <add>, %1, %cst [1] : vector<16x128xf32> to vector<16xf32>
    %3 = vector.shape_cast %2 : vector<16xf32> to vector<16x1xf32>
    %cst_1 = arith.constant 1.280000e+02 : f32
    %4 = vector.broadcast %cst_1 : f32 to vector<16x1xf32>
    %5 = arith.divf %3, %4 : vector<16x1xf32>
    %cst_2 = arith.constant 9.99999997E-7 : f32
    %6 = vector.broadcast %cst_2 : f32 to vector<16x1xf32>
    %7 = arith.addf %5, %6 : vector<16x1xf32>
    %8 = math.rsqrt %7 : vector<16x1xf32>
    %9 = vector.broadcast %8 : vector<16x1xf32> to vector<16x128xf32>
    %10 = arith.mulf %0, %9 : vector<16x128xf32>
    %c0_3 = arith.constant 0 : index
    %c0_4 = arith.constant 0 : index
    %11 = vector.load %arg3[%c0_3, %c0_4] : memref<1x128xf32, #tpu.memory_space<vmem>>, vector<1x128xf32>
    %12 = vector.broadcast %11 : vector<1x128xf32> to vector<16x128xf32>
    %13 = arith.mulf %10, %12 : vector<16x128xf32>
    %c0_5 = arith.constant 0 : index
    %c0_6 = arith.constant 0 : index
    %14 = vector.load %arg4[%c0_5, %c0_6] : memref<128x128xf32, #tpu.memory_space<vmem>>, vector<128x128xf32>
    %cst_7 = arith.constant dense<0.000000e+00> : vector<16x128xf32>
    %15 = tpu.matmul %13, %14, %cst_7 {dimension_numbers = #tpu.dot_dimension_numbers<[1], [0], [0], [1], [0, 0, 1, 1], [], []>} : vector<16x128xf32>, vector<128x128xf32>, vector<16x128xf32> -> vector<16x128xf32>
    %c0_8 = arith.constant 0 : index
    %c0_9 = arith.constant 0 : index
    %16 = vector.load %arg5[%c0_8, %c0_9] : memref<16x128xf32, #tpu.memory_space<vmem>>, vector<16x128xf32>
    tpu.vector_store %arg5[%c0_8, %c0_9], %15 {strides = array<i32>} : memref<16x128xf32, #tpu.memory_space<vmem>>, vector<16x128xf32>,
    return
  }
  func.func @transform_0(%arg0: i32, %arg1: i32) -> (i32, i32) {
    %c0_i32 = arith.constant 0 : i32
    %c0_i32_0 = arith.constant 0 : i32
    return %arg0, %c0_i32 : i32, i32
  }
  func.func @transform_1(%arg0: i32, %arg1: i32) -> (i32, i32) {
    %c0_i32 = arith.constant 0 : i32
    %c0_i32_0 = arith.constant 0 : i32
    %c0_i32_1 = arith.constant 0 : i32
    return %c0_i32, %c0_i32_0 : i32, i32
  }
  func.func @transform_2(%arg0: i32, %arg1: i32) -> (i32, i32) {
    %c0_i32 = arith.constant 0 : i32
    %c0_i32_0 = arith.constant 0 : i32
    return %c0_i32, %arg1 : i32, i32
  }
  func.func @transform_3(%arg0: i32, %arg1: i32) -> (i32, i32) {
    %c0_i32 = arith.constant 0 : i32
    return %arg0, %arg1 : i32, i32
  }
}

module attributes {stable_mosaic.version = 11 : i64} {
  func.func @_attn_kernel(%arg0: i32, %arg1: memref<1x2x8x64xf32, #tpu.memory_space<vmem>>, %arg2: memref<1x2x16x64xf32, #tpu.memory_space<vmem>>, %arg3: memref<1x2x16x64xf32, #tpu.memory_space<vmem>>, %arg4: memref<1x2x8x16xf32, #tpu.memory_space<vmem>>, %arg5: memref<1x1x1x16xf32, #tpu.memory_space<vmem>>, %arg6: memref<1x2x8x64xf32, #tpu.memory_space<vmem>>) attributes {dimension_semantics = [#tpu.dimension_semantics<parallel>], iteration_bounds = array<i64: 2>, scalar_prefetch = 0 : i64, scratch_operands = 0 : i64, tpu.core_type = #tpu.core_type<tc>, window_params = [{transform_indices = @transform_0, window_bounds = array<i64: 1, 2, 8, 64>}, {transform_indices = @transform_1, window_bounds = array<i64: 1, 2, 16, 64>}, {transform_indices = @transform_2, window_bounds = array<i64: 1, 2, 16, 64>}, {pipeline_mode = #tpu.pipeline_mode<synchronous>, transform_indices = @transform_3, window_bounds = array<i64: 1, 2, 8, 16>}, {transform_indices = @transform_4, window_bounds = array<i64: 1, 1, 1, 16>}, {transform_indices = @transform_5, window_bounds = array<i64: 1, 2, 8, 64>}]} {
    %c0 = arith.constant 0 : index
    %c0_0 = arith.constant 0 : index
    %c0_1 = arith.constant 0 : index
    %c0_2 = arith.constant 0 : index
    %0 = vector.load %arg1[%c0, %c0_0, %c0_1, %c0_2] : memref<1x2x8x64xf32, #tpu.memory_space<vmem>>, vector<1x2x8x64xf32>
    %1 = vector.shape_cast %0 : vector<1x2x8x64xf32> to vector<2x8x64xf32>
    %c0_3 = arith.constant 0 : index
    %c0_4 = arith.constant 0 : index
    %c0_5 = arith.constant 0 : index
    %c0_6 = arith.constant 0 : index
    %2 = vector.load %arg2[%c0_3, %c0_4, %c0_5, %c0_6] : memref<1x2x16x64xf32, #tpu.memory_space<vmem>>, vector<1x2x16x64xf32>
    %3 = vector.shape_cast %2 : vector<1x2x16x64xf32> to vector<2x16x64xf32>
    %c0_7 = arith.constant 0 : index
    %c0_8 = arith.constant 0 : index
    %c0_9 = arith.constant 0 : index
    %c0_10 = arith.constant 0 : index
    %4 = vector.load %arg3[%c0_7, %c0_8, %c0_9, %c0_10] : memref<1x2x16x64xf32, #tpu.memory_space<vmem>>, vector<1x2x16x64xf32>
    %5 = vector.shape_cast %4 : vector<1x2x16x64xf32> to vector<2x16x64xf32>
    %c0_11 = arith.constant 0 : index
    %c0_12 = arith.constant 0 : index
    %c0_13 = arith.constant 0 : index
    %c0_14 = arith.constant 0 : index
    %6 = vector.load %arg4[%c0_11, %c0_12, %c0_13, %c0_14] : memref<1x2x8x16xf32, #tpu.memory_space<vmem>>, vector<1x2x8x16xf32>
    %7 = vector.shape_cast %6 : vector<1x2x8x16xf32> to vector<2x8x16xf32>
    %c0_15 = arith.constant 0 : index
    %c0_16 = arith.constant 0 : index
    %c0_17 = arith.constant 0 : index
    %c0_18 = arith.constant 0 : index
    %8 = vector.load %arg5[%c0_15, %c0_16, %c0_17, %c0_18] : memref<1x1x1x16xf32, #tpu.memory_space<vmem>>, vector<1x1x1x16xf32>
    %9 = vector.shape_cast %8 : vector<1x1x1x16xf32> to vector<1x1x16xf32>
    %10 = vector.broadcast %9 : vector<1x1x16xf32> to vector<2x8x16xf32>
    %11 = arith.addf %7, %10 : vector<2x8x16xf32>
    "tpu.trace_start"() <{level = 10 : i32, message = "hqd,hkd->hqk"}> : () -> ()
    %cst = arith.constant dense<0.000000e+00> : vector<2x8x16xf32>
    %12 = tpu.matmul %1, %3, %cst {dimension_numbers = #tpu.dot_dimension_numbers<[2], [2], [1], [1], [0, 0, 0, 1, 1, 1], [0], [0]>} : vector<2x8x64xf32>, vector<2x16x64xf32>, vector<2x8x16xf32> -> vector<2x8x16xf32>
    "tpu.trace_stop"() : () -> ()
    %13 = arith.addf %12, %11 : vector<2x8x16xf32>
    %cst_19 = arith.constant dense<0xFF800000> : vector<2x8xf32>
    %14 = vector.multi_reduction <maximumf>, %13, %cst_19 [2] : vector<2x8x16xf32> to vector<2x8xf32>
    %15 = vector.shape_cast %14 : vector<2x8xf32> to vector<2x8x1xf32>
    %16 = vector.broadcast %15 : vector<2x8x1xf32> to vector<2x8x16xf32>
    %17 = arith.subf %13, %16 : vector<2x8x16xf32>
    %18 = math.exp %17 : vector<2x8x16xf32>
    %cst_20 = arith.constant dense<0.000000e+00> : vector<2x8xf32>
    %19 = vector.multi_reduction <add>, %18, %cst_20 [2] : vector<2x8x16xf32> to vector<2x8xf32>
    %20 = vector.shape_cast %19 : vector<2x8xf32> to vector<2x8x1xf32>
    %21 = tpu.reciprocal %20 {approx = true} : vector<2x8x1xf32> -> vector<2x8x1xf32>
    %22 = vector.broadcast %21 : vector<2x8x1xf32> to vector<2x8x16xf32>
    %23 = arith.mulf %18, %22 : vector<2x8x16xf32>
    "tpu.trace_start"() <{level = 10 : i32, message = "hqk,hkd->hqd"}> : () -> ()
    %cst_21 = arith.constant dense<0.000000e+00> : vector<2x8x64xf32>
    %24 = tpu.matmul %23, %5, %cst_21 {dimension_numbers = #tpu.dot_dimension_numbers<[2], [1], [1], [2], [0, 0, 0, 1, 1, 2], [0], [0]>} : vector<2x8x16xf32>, vector<2x16x64xf32>, vector<2x8x64xf32> -> vector<2x8x64xf32>
    "tpu.trace_stop"() : () -> ()
    %25 = vector.shape_cast %24 : vector<2x8x64xf32> to vector<1x2x8x64xf32>
    %c0_22 = arith.constant 0 : index
    %c0_23 = arith.constant 0 : index
    %c0_24 = arith.constant 0 : index
    %c0_25 = arith.constant 0 : index
    %26 = vector.load %arg6[%c0_22, %c0_23, %c0_24, %c0_25] : memref<1x2x8x64xf32, #tpu.memory_space<vmem>>, vector<1x2x8x64xf32>
    tpu.vector_store %arg6[%c0_22, %c0_23, %c0_24, %c0_25], %25 {strides = array<i32>} : memref<1x2x8x64xf32, #tpu.memory_space<vmem>>, vector<1x2x8x64xf32>,
    return
  }
  func.func @transform_0(%arg0: i32) -> (i32, i32, i32, i32) {
    %c0_i32 = arith.constant 0 : i32
    %c0_i32_0 = arith.constant 0 : i32
    %c0_i32_1 = arith.constant 0 : i32
    %c0_i32_2 = arith.constant 0 : i32
    return %arg0, %c0_i32, %c0_i32_0, %c0_i32_1 : i32, i32, i32, i32
  }
  func.func @transform_1(%arg0: i32) -> (i32, i32, i32, i32) {
    %c0_i32 = arith.constant 0 : i32
    %c0_i32_0 = arith.constant 0 : i32
    %c0_i32_1 = arith.constant 0 : i32
    %c0_i32_2 = arith.constant 0 : i32
    return %arg0, %c0_i32, %c0_i32_0, %c0_i32_1 : i32, i32, i32, i32
  }
  func.func @transform_2(%arg0: i32) -> (i32, i32, i32, i32) {
    %c0_i32 = arith.constant 0 : i32
    %c0_i32_0 = arith.constant 0 : i32
    %c0_i32_1 = arith.constant 0 : i32
    %c0_i32_2 = arith.constant 0 : i32
    return %arg0, %c0_i32, %c0_i32_0, %c0_i32_1 : i32, i32, i32, i32
  }
  func.func @transform_3(%arg0: i32) -> (i32, i32, i32, i32) {
    %c0_i32 = arith.constant 0 : i32
    %c0_i32_0 = arith.constant 0 : i32
    %c0_i32_1 = arith.constant 0 : i32
    %c0_i32_2 = arith.constant 0 : i32
    %c0_i32_3 = arith.constant 0 : i32
    return %c0_i32, %c0_i32_0, %c0_i32_1, %c0_i32_2 : i32, i32, i32, i32
  }
  func.func @transform_4(%arg0: i32) -> (i32, i32, i32, i32) {
    %c0_i32 = arith.constant 0 : i32
    %c0_i32_0 = arith.constant 0 : i32
    %c0_i32_1 = arith.constant 0 : i32
    %c0_i32_2 = arith.constant 0 : i32
    return %arg0, %c0_i32, %c0_i32_0, %c0_i32_1 : i32, i32, i32, i32
  }
  func.func @transform_5(%arg0: i32) -> (i32, i32, i32, i32) {
    %c0_i32 = arith.constant 0 : i32
    %c0_i32_0 = arith.constant 0 : i32
    %c0_i32_1 = arith.constant 0 : i32
    %c0_i32_2 = arith.constant 0 : i32
    return %arg0, %c0_i32, %c0_i32_0, %c0_i32_1 : i32, i32, i32, i32
  }
}

module attributes {stable_mosaic.version = 11 : i64} {
  func.func @_ff_gate_kernel(%arg0: i32, %arg1: i32, %arg2: memref<16x128xf32, #tpu.memory_space<vmem>>, %arg3: memref<1x128xf32, #tpu.memory_space<vmem>>, %arg4: memref<128x256xf32, #tpu.memory_space<vmem>>, %arg5: memref<128x256xf32, #tpu.memory_space<vmem>>, %arg6: memref<16x256xf32, #tpu.memory_space<vmem>>) attributes {dimension_semantics = [#tpu.dimension_semantics<parallel>, #tpu.dimension_semantics<parallel>], iteration_bounds = array<i64: 1, 1>, scalar_prefetch = 0 : i64, scratch_operands = 0 : i64, tpu.core_type = #tpu.core_type<tc>, window_params = [{transform_indices = @transform_0, window_bounds = array<i64: 16, 128>}, {pipeline_mode = #tpu.pipeline_mode<synchronous>, transform_indices = @transform_1, window_bounds = array<i64: 1, 128>}, {transform_indices = @transform_2, window_bounds = array<i64: 128, 256>}, {transform_indices = @transform_3, window_bounds = array<i64: 128, 256>}, {transform_indices = @transform_4, window_bounds = array<i64: 16, 256>}]} {
    %c0 = arith.constant 0 : index
    %c0_0 = arith.constant 0 : index
    %0 = vector.load %arg2[%c0, %c0_0] : memref<16x128xf32, #tpu.memory_space<vmem>>, vector<16x128xf32>
    %1 = arith.mulf %0, %0 : vector<16x128xf32>
    %cst = arith.constant dense<0.000000e+00> : vector<16xf32>
    %2 = vector.multi_reduction <add>, %1, %cst [1] : vector<16x128xf32> to vector<16xf32>
    %3 = vector.shape_cast %2 : vector<16xf32> to vector<16x1xf32>
    %cst_1 = arith.constant 1.280000e+02 : f32
    %4 = vector.broadcast %cst_1 : f32 to vector<16x1xf32>
    %5 = arith.divf %3, %4 : vector<16x1xf32>
    %cst_2 = arith.constant 9.99999997E-7 : f32
    %6 = vector.broadcast %cst_2 : f32 to vector<16x1xf32>
    %7 = arith.addf %5, %6 : vector<16x1xf32>
    %8 = math.rsqrt %7 : vector<16x1xf32>
    %9 = vector.broadcast %8 : vector<16x1xf32> to vector<16x128xf32>
    %10 = arith.mulf %0, %9 : vector<16x128xf32>
    %c0_3 = arith.constant 0 : index
    %c0_4 = arith.constant 0 : index
    %11 = vector.load %arg3[%c0_3, %c0_4] : memref<1x128xf32, #tpu.memory_space<vmem>>, vector<1x128xf32>
    %12 = vector.broadcast %11 : vector<1x128xf32> to vector<16x128xf32>
    %13 = arith.mulf %10, %12 : vector<16x128xf32>
    %c0_5 = arith.constant 0 : index
    %c0_6 = arith.constant 0 : index
    %14 = vector.load %arg4[%c0_5, %c0_6] : memref<128x256xf32, #tpu.memory_space<vmem>>, vector<128x256xf32>
    %cst_7 = arith.constant dense<0.000000e+00> : vector<16x256xf32>
    %15 = tpu.matmul %13, %14, %cst_7 {dimension_numbers = #tpu.dot_dimension_numbers<[1], [0], [0], [1], [0, 0, 1, 1], [], []>} : vector<16x128xf32>, vector<128x256xf32>, vector<16x256xf32> -> vector<16x256xf32>
    %c0_8 = arith.constant 0 : index
    %c0_9 = arith.constant 0 : index
    %16 = vector.load %arg5[%c0_8, %c0_9] : memref<128x256xf32, #tpu.memory_space<vmem>>, vector<128x256xf32>
    %cst_10 = arith.constant dense<0.000000e+00> : vector<16x256xf32>
    %17 = tpu.matmul %13, %16, %cst_10 {dimension_numbers = #tpu.dot_dimension_numbers<[1], [0], [0], [1], [0, 0, 1, 1], [], []>} : vector<16x128xf32>, vector<128x256xf32>, vector<16x256xf32> -> vector<16x256xf32>
    %cst_11 = arith.constant 5.000000e-01 : f32
    %18 = vector.broadcast %cst_11 : f32 to vector<16x256xf32>
    %19 = arith.mulf %18, %15 : vector<16x256xf32>
    %cst_12 = arith.constant 4.471500e-02 : f32
    %20 = vector.broadcast %cst_12 : f32 to vector<16x256xf32>
    %21 = arith.mulf %20, %15 : vector<16x256xf32>
    %22 = arith.mulf %21, %15 : vector<16x256xf32>
    %23 = arith.mulf %22, %15 : vector<16x256xf32>
    %24 = arith.addf %15, %23 : vector<16x256xf32>
    %cst_13 = arith.constant 0.797884583 : f32
    %25 = vector.broadcast %cst_13 : f32 to vector<16x256xf32>
    %26 = arith.mulf %25, %24 : vector<16x256xf32>
    %27 = math.tanh %26 : vector<16x256xf32>
    %cst_14 = arith.constant 1.000000e+00 : f32
    %28 = vector.broadcast %cst_14 : f32 to vector<16x256xf32>
    %29 = arith.addf %28, %27 : vector<16x256xf32>
    %30 = arith.mulf %19, %29 : vector<16x256xf32>
    %31 = arith.mulf %30, %17 : vector<16x256xf32>
    %c0_15 = arith.constant 0 : index
    %c0_16 = arith.constant 0 : index
    %32 = vector.load %arg6[%c0_15, %c0_16] : memref<16x256xf32, #tpu.memory_space<vmem>>, vector<16x256xf32>
    tpu.vector_store %arg6[%c0_15, %c0_16], %31 {strides = array<i32>} : memref<16x256xf32, #tpu.memory_space<vmem>>, vector<16x256xf32>,
    return
  }
  func.func @transform_0(%arg0: i32, %arg1: i32) -> (i32, i32) {
    %c0_i32 = arith.constant 0 : i32
    %c0_i32_0 = arith.constant 0 : i32
    return %arg0, %c0_i32 : i32, i32
  }
  func.func @transform_1(%arg0: i32, %arg1: i32) -> (i32, i32) {
    %c0_i32 = arith.constant 0 : i32
    %c0_i32_0 = arith.constant 0 : i32
    %c0_i32_1 = arith.constant 0 : i32
    return %c0_i32, %c0_i32_0 : i32, i32
  }
  func.func @transform_2(%arg0: i32, %arg1: i32) -> (i32, i32) {
    %c0_i32 = arith.constant 0 : i32
    %c0_i32_0 = arith.constant 0 : i32
    return %c0_i32, %arg1 : i32, i32
  }
  func.func @transform_3(%arg0: i32, %arg1: i32) -> (i32, i32) {
    %c0_i32 = arith.constant 0 : i32
    %c0_i32_0 = arith.constant 0 : i32
    return %c0_i32, %arg1 : i32, i32
  }
  func.func @transform_4(%arg0: i32, %arg1: i32) -> (i32, i32) {
    %c0_i32 = arith.constant 0 : i32
    return %arg0, %arg1 : i32, i32
  }
}

module attributes {stable_mosaic.version = 11 : i64} {
  func.func @kernel(%arg0: i32, %arg1: i32, %arg2: memref<16x128xf32, #tpu.memory_space<vmem>>, %arg3: memref<1x128xf32, #tpu.memory_space<vmem>>, %arg4: memref<128x128xf32, #tpu.memory_space<vmem>>, %arg5: memref<16x1xi32, #tpu.memory_space<vmem>>, %arg6: memref<16x128xf32, #tpu.memory_space<vmem>>, %arg7: memref<16x1xf32, #tpu.memory_space<vmem>>, %arg8: memref<16x1xf32, #tpu.memory_space<vmem>>, %arg9: memref<16x1xf32, #tpu.memory_space<vmem>>, %arg10: memref<16x1xf32, #tpu.memory_space<vmem>>) attributes {dimension_semantics = [#tpu.dimension_semantics<parallel>, #tpu.dimension_semantics<arbitrary>], iteration_bounds = array<i64: 1, 3>, scalar_prefetch = 0 : i64, scratch_operands = 3 : i64, tpu.core_type = #tpu.core_type<tc>, window_params = [{transform_indices = @transform_0, window_bounds = array<i64: 16, 128>}, {pipeline_mode = #tpu.pipeline_mode<synchronous>, transform_indices = @transform_1, window_bounds = array<i64: 1, 128>}, {transform_indices = @transform_2, window_bounds = array<i64: 128, 128>}, {transform_indices = @transform_3, window_bounds = array<i64: 16, 1>}, {transform_indices = @transform_4, window_bounds = array<i64: 16, 128>}, {transform_indices = @transform_5, window_bounds = array<i64: 16, 1>}]} {
    %c0_i32 = arith.constant 0 : i32
    %0 = arith.cmpi eq, %arg1, %c0_i32 : i32
    %1 = arith.extui %0 : i1 to i32
    %c0_i32_0 = arith.constant 0 : i32
    %2 = arith.cmpi ne, %1, %c0_i32_0 : i32
    scf.if %2 {
      %cst_30 = arith.constant -1.000000e+30 : f32
      %53 = vector.broadcast %cst_30 : f32 to vector<16x1xf32>
      %c0_31 = arith.constant 0 : index
      %c0_32 = arith.constant 0 : index
      %54 = vector.load %arg8[%c0_31, %c0_32] : memref<16x1xf32, #tpu.memory_space<vmem>>, vector<16x1xf32>
      tpu.vector_store %arg8[%c0_31, %c0_32], %53 {strides = array<i32>} : memref<16x1xf32, #tpu.memory_space<vmem>>, vector<16x1xf32>,
      %cst_33 = arith.constant 0.000000e+00 : f32
      %55 = vector.broadcast %cst_33 : f32 to vector<16x1xf32>
      %c0_34 = arith.constant 0 : index
      %c0_35 = arith.constant 0 : index
      %56 = vector.load %arg9[%c0_34, %c0_35] : memref<16x1xf32, #tpu.memory_space<vmem>>, vector<16x1xf32>
      tpu.vector_store %arg9[%c0_34, %c0_35], %55 {strides = array<i32>} : memref<16x1xf32, #tpu.memory_space<vmem>>, vector<16x1xf32>,
      %cst_36 = arith.constant 0.000000e+00 : f32
      %57 = vector.broadcast %cst_36 : f32 to vector<16x1xf32>
      %c0_37 = arith.constant 0 : index
      %c0_38 = arith.constant 0 : index
      %58 = vector.load %arg10[%c0_37, %c0_38] : memref<16x1xf32, #tpu.memory_space<vmem>>, vector<16x1xf32>
      tpu.vector_store %arg10[%c0_37, %c0_38], %57 {strides = array<i32>} : memref<16x1xf32, #tpu.memory_space<vmem>>, vector<16x1xf32>,
    } else {
    }
    %c0 = arith.constant 0 : index
    %c0_1 = arith.constant 0 : index
    %3 = vector.load %arg2[%c0, %c0_1] : memref<16x128xf32, #tpu.memory_space<vmem>>, vector<16x128xf32>
    %4 = arith.mulf %3, %3 : vector<16x128xf32>
    %cst = arith.constant dense<0.000000e+00> : vector<16xf32>
    %5 = vector.multi_reduction <add>, %4, %cst [1] : vector<16x128xf32> to vector<16xf32>
    %6 = vector.shape_cast %5 : vector<16xf32> to vector<16x1xf32>
    %cst_2 = arith.constant 1.280000e+02 : f32
    %7 = vector.broadcast %cst_2 : f32 to vector<16x1xf32>
    %8 = arith.divf %6, %7 : vector<16x1xf32>
    %cst_3 = arith.constant 9.99999997E-7 : f32
    %9 = vector.broadcast %cst_3 : f32 to vector<16x1xf32>
    %10 = arith.addf %8, %9 : vector<16x1xf32>
    %11 = math.rsqrt %10 : vector<16x1xf32>
    %12 = vector.broadcast %11 : vector<16x1xf32> to vector<16x128xf32>
    %13 = arith.mulf %3, %12 : vector<16x128xf32>
    %c0_4 = arith.constant 0 : index
    %c0_5 = arith.constant 0 : index
    %14 = vector.load %arg3[%c0_4, %c0_5] : memref<1x128xf32, #tpu.memory_space<vmem>>, vector<1x128xf32>
    %15 = vector.broadcast %14 : vector<1x128xf32> to vector<16x128xf32>
    %16 = arith.mulf %13, %15 : vector<16x128xf32>
    %c0_6 = arith.constant 0 : index
    %c0_7 = arith.constant 0 : index
    %17 = vector.load %arg4[%c0_6, %c0_7] : memref<128x128xf32, #tpu.memory_space<vmem>>, vector<128x128xf32>
    %cst_8 = arith.constant dense<0.000000e+00> : vector<16x128xf32>
    %18 = tpu.matmul %16, %17, %cst_8 {dimension_numbers = #tpu.dot_dimension_numbers<[1], [0], [0], [1], [0, 0, 1, 1], [], []>} : vector<16x128xf32>, vector<128x128xf32>, vector<16x128xf32> -> vector<16x128xf32>
    %c0_9 = arith.constant 0 : index
    %c0_10 = arith.constant 0 : index
    %19 = vector.load %arg6[%c0_9, %c0_10] : memref<16x128xf32, #tpu.memory_space<vmem>>, vector<16x128xf32>
    tpu.vector_store %arg6[%c0_9, %c0_10], %18 {strides = array<i32>} : memref<16x128xf32, #tpu.memory_space<vmem>>, vector<16x128xf32>,
    %c0_11 = arith.constant 0 : index
    %c0_12 = arith.constant 0 : index
    %20 = vector.load %arg5[%c0_11, %c0_12] : memref<16x1xi32, #tpu.memory_space<vmem>>, vector<16x1xi32>
    %c128_i32 = arith.constant 128 : i32
    %21 = arith.muli %arg1, %c128_i32 : i32
    %22 = tpu.iota {dimensions = array<i32: 1>} : vector<16x128xi32>
    %23 = vector.broadcast %21 : i32 to vector<16x128xi32>
    %24 = arith.addi %23, %22 : vector<16x128xi32>
    %c0_13 = arith.constant 0 : index
    %c0_14 = arith.constant 0 : index
    %25 = vector.load %arg10[%c0_13, %c0_14] : memref<16x1xf32, #tpu.memory_space<vmem>>, vector<16x1xf32>
    %26 = vector.broadcast %20 : vector<16x1xi32> to vector<16x128xi32>
    %27 = arith.cmpi eq, %24, %26 : vector<16x128xi32>
    %cst_15 = arith.constant 0.000000e+00 : f32
    %28 = vector.broadcast %cst_15 : f32 to vector<16x128xf32>
    %29 = arith.select %27, %18, %28 : vector<16x128xi1>, vector<16x128xf32>
    %cst_16 = arith.constant dense<0.000000e+00> : vector<16xf32>
    %30 = vector.multi_reduction <add>, %29, %cst_16 [1] : vector<16x128xf32> to vector<16xf32>
    %31 = vector.shape_cast %30 : vector<16xf32> to vector<16x1xf32>
    %32 = arith.addf %25, %31 : vector<16x1xf32>
    %c0_17 = arith.constant 0 : index
    %c0_18 = arith.constant 0 : index
    %33 = vector.load %arg10[%c0_17, %c0_18] : memref<16x1xf32, #tpu.memory_space<vmem>>, vector<16x1xf32>
    tpu.vector_store %arg10[%c0_17, %c0_18], %32 {strides = array<i32>} : memref<16x1xf32, #tpu.memory_space<vmem>>, vector<16x1xf32>,
    %c0_19 = arith.constant 0 : index
    %c0_20 = arith.constant 0 : index
    %34 = vector.load %arg8[%c0_19, %c0_20] : memref<16x1xf32, #tpu.memory_space<vmem>>, vector<16x1xf32>
    %cst_21 = arith.constant dense<0xFF800000> : vector<16xf32>
    %35 = vector.multi_reduction <maximumf>, %18, %cst_21 [1] : vector<16x128xf32> to vector<16xf32>
    %36 = vector.shape_cast %35 : vector<16xf32> to vector<16x1xf32>
    %37 = arith.maximumf %34, %36 : vector<16x1xf32>
    %c0_22 = arith.constant 0 : index
    %c0_23 = arith.constant 0 : index
    %38 = vector.load %arg9[%c0_22, %c0_23] : memref<16x1xf32, #tpu.memory_space<vmem>>, vector<16x1xf32>
    %39 = arith.subf %34, %37 : vector<16x1xf32>
    %40 = math.exp %39 : vector<16x1xf32>
    %41 = arith.mulf %38, %40 : vector<16x1xf32>
    %42 = vector.broadcast %37 : vector<16x1xf32> to vector<16x128xf32>
    %43 = arith.subf %18, %42 : vector<16x128xf32>
    %44 = math.exp %43 : vector<16x128xf32>
    %cst_24 = arith.constant dense<0.000000e+00> : vector<16xf32>
    %45 = vector.multi_reduction <add>, %44, %cst_24 [1] : vector<16x128xf32> to vector<16xf32>
    %46 = vector.shape_cast %45 : vector<16xf32> to vector<16x1xf32>
    %47 = arith.addf %41, %46 : vector<16x1xf32>
    %c0_25 = arith.constant 0 : index
    %c0_26 = arith.constant 0 : index
    %48 = vector.load %arg9[%c0_25, %c0_26] : memref<16x1xf32, #tpu.memory_space<vmem>>, vector<16x1xf32>
    tpu.vector_store %arg9[%c0_25, %c0_26], %47 {strides = array<i32>} : memref<16x1xf32, #tpu.memory_space<vmem>>, vector<16x1xf32>,
    %c0_27 = arith.constant 0 : index
    %c0_28 = arith.constant 0 : index
    %49 = vector.load %arg8[%c0_27, %c0_28] : memref<16x1xf32, #tpu.memory_space<vmem>>, vector<16x1xf32>
    tpu.vector_store %arg8[%c0_27, %c0_28], %37 {strides = array<i32>} : memref<16x1xf32, #tpu.memory_space<vmem>>, vector<16x1xf32>,
    %c2_i32 = arith.constant 2 : i32
    %50 = arith.cmpi eq, %arg1, %c2_i32 : i32
    %51 = arith.extui %50 : i1 to i32
    %c0_i32_29 = arith.constant 0 : i32
    %52 = arith.cmpi ne, %51, %c0_i32_29 : i32
    scf.if %52 {
      %c0_30 = arith.constant 0 : index
      %c0_31 = arith.constant 0 : index
      %53 = vector.load %arg8[%c0_30, %c0_31] : memref<16x1xf32, #tpu.memory_space<vmem>>, vector<16x1xf32>
      %c0_32 = arith.constant 0 : index
      %c0_33 = arith.constant 0 : index
      %54 = vector.load %arg9[%c0_32, %c0_33] : memref<16x1xf32, #tpu.memory_space<vmem>>, vector<16x1xf32>
      %55 = math.log %54 : vector<16x1xf32>
      %56 = arith.addf %53, %55 : vector<16x1xf32>
      %c0_34 = arith.constant 0 : index
      %c0_35 = arith.constant 0 : index
      %57 = vector.load %arg10[%c0_34, %c0_35] : memref<16x1xf32, #tpu.memory_space<vmem>>, vector<16x1xf32>
      %58 = arith.subf %56, %57 : vector<16x1xf32>
      %c0_36 = arith.constant 0 : index
      %c0_37 = arith.constant 0 : index
      %59 = vector.load %arg7[%c0_36, %c0_37] : memref<16x1xf32, #tpu.memory_space<vmem>>, vector<16x1xf32>
      tpu.vector_store %arg7[%c0_36, %c0_37], %58 {strides = array<i32>} : memref<16x1xf32, #tpu.memory_space<vmem>>, vector<16x1xf32>,
    } else {
    }
    return
  }
  func.func @transform_0(%arg0: i32, %arg1: i32) -> (i32, i32) {
    %c0_i32 = arith.constant 0 : i32
    %c0_i32_0 = arith.constant 0 : i32
    return %arg0, %c0_i32 : i32, i32
  }
  func.func @transform_1(%arg0: i32, %arg1: i32) -> (i32, i32) {
    %c0_i32 = arith.constant 0 : i32
    %c0_i32_0 = arith.constant 0 : i32
    %c0_i32_1 = arith.constant 0 : i32
    return %c0_i32, %c0_i32_0 : i32, i32
  }
  func.func @transform_2(%arg0: i32, %arg1: i32) -> (i32, i32) {
    %c0_i32 = arith.constant 0 : i32
    %c0_i32_0 = arith.constant 0 : i32
    return %c0_i32, %arg1 : i32, i32
  }
  func.func @transform_3(%arg0: i32, %arg1: i32) -> (i32, i32) {
    %c0_i32 = arith.constant 0 : i32
    %c0_i32_0 = arith.constant 0 : i32
    return %arg0, %c0_i32 : i32, i32
  }
  func.func @transform_4(%arg0: i32, %arg1: i32) -> (i32, i32) {
    %c0_i32 = arith.constant 0 : i32
    return %arg0, %arg1 : i32, i32
  }
  func.func @transform_5(%arg0: i32, %arg1: i32) -> (i32, i32) {
    %c0_i32 = arith.constant 0 : i32
    %c0_i32_0 = arith.constant 0 : i32
    return %arg0, %c0_i32 : i32, i32
  }
}

module attributes {stable_mosaic.version = 11 : i64} {
  func.func @kernel(%arg0: i32, %arg1: i32, %arg2: i32, %arg3: memref<16x128xf32, #tpu.memory_space<vmem>>, %arg4: memref<128x128xf32, #tpu.memory_space<vmem>>, %arg5: memref<16x128xf32, #tpu.memory_space<vmem>>, %arg6: memref<16x128xf32, #tpu.memory_space<vmem>>, %arg7: memref<16x128xf32, #tpu.memory_space<vmem>>) attributes {dimension_semantics = [#tpu.dimension_semantics<parallel>, #tpu.dimension_semantics<parallel>, #tpu.dimension_semantics<arbitrary>], iteration_bounds = array<i64: 1, 1, 2>, scalar_prefetch = 0 : i64, scratch_operands = 1 : i64, tpu.core_type = #tpu.core_type<tc>, window_params = [{transform_indices = @transform_0, window_bounds = array<i64: 16, 128>}, {transform_indices = @transform_1, window_bounds = array<i64: 128, 128>}, {transform_indices = @transform_2, window_bounds = array<i64: 16, 128>}, {transform_indices = @transform_3, window_bounds = array<i64: 16, 128>}]} {
    %c0_i32 = arith.constant 0 : i32
    %0 = arith.cmpi eq, %arg2, %c0_i32 : i32
    %1 = arith.extui %0 : i1 to i32
    %c0_i32_0 = arith.constant 0 : i32
    %2 = arith.cmpi ne, %1, %c0_i32_0 : i32
    scf.if %2 {
      %cst_9 = arith.constant 0.000000e+00 : f32
      %12 = vector.broadcast %cst_9 : f32 to vector<16x128xf32>
      %c0_10 = arith.constant 0 : index
      %c0_11 = arith.constant 0 : index
      %13 = vector.load %arg7[%c0_10, %c0_11] : memref<16x128xf32, #tpu.memory_space<vmem>>, vector<16x128xf32>
      tpu.vector_store %arg7[%c0_10, %c0_11], %12 {strides = array<i32>} : memref<16x128xf32, #tpu.memory_space<vmem>>, vector<16x128xf32>,
    } else {
    }
    %c0 = arith.constant 0 : index
    %c0_1 = arith.constant 0 : index
    %3 = vector.load %arg7[%c0, %c0_1] : memref<16x128xf32, #tpu.memory_space<vmem>>, vector<16x128xf32>
    %c0_2 = arith.constant 0 : index
    %c0_3 = arith.constant 0 : index
    %4 = vector.load %arg3[%c0_2, %c0_3] : memref<16x128xf32, #tpu.memory_space<vmem>>, vector<16x128xf32>
    %c0_4 = arith.constant 0 : index
    %c0_5 = arith.constant 0 : index
    %5 = vector.load %arg4[%c0_4, %c0_5] : memref<128x128xf32, #tpu.memory_space<vmem>>, vector<128x128xf32>
    %cst = arith.constant dense<0.000000e+00> : vector<16x128xf32>
    %6 = tpu.matmul %4, %5, %cst {dimension_numbers = #tpu.dot_dimension_numbers<[1], [0], [0], [1], [0, 0, 1, 1], [], []>} : vector<16x128xf32>, vector<128x128xf32>, vector<16x128xf32> -> vector<16x128xf32>
    %7 = arith.addf %3, %6 : vector<16x128xf32>
    %c0_6 = arith.constant 0 : index
    %c0_7 = arith.constant 0 : index
    %8 = vector.load %arg7[%c0_6, %c0_7] : memref<16x128xf32, #tpu.memory_space<vmem>>, vector<16x128xf32>
    tpu.vector_store %arg7[%c0_6, %c0_7], %7 {strides = array<i32>} : memref<16x128xf32, #tpu.memory_space<vmem>>, vector<16x128xf32>,
    %c1_i32 = arith.constant 1 : i32
    %9 = arith.cmpi eq, %arg2, %c1_i32 : i32
    %10 = arith.extui %9 : i1 to i32
    %c0_i32_8 = arith.constant 0 : i32
    %11 = arith.cmpi ne, %10, %c0_i32_8 : i32
    scf.if %11 {
      %c0_9 = arith.constant 0 : index
      %c0_10 = arith.constant 0 : index
      %12 = vector.load %arg7[%c0_9, %c0_10] : memref<16x128xf32, #tpu.memory_space<vmem>>, vector<16x128xf32>
      %c0_11 = arith.constant 0 : index
      %c0_12 = arith.constant 0 : index
      %13 = vector.load %arg5[%c0_11, %c0_12] : memref<16x128xf32, #tpu.memory_space<vmem>>, vector<16x128xf32>
      %14 = arith.addf %12, %13 : vector<16x128xf32>
      %c0_13 = arith.constant 0 : index
      %c0_14 = arith.constant 0 : index
      %15 = vector.load %arg6[%c0_13, %c0_14] : memref<16x128xf32, #tpu.memory_space<vmem>>, vector<16x128xf32>
      tpu.vector_store %arg6[%c0_13, %c0_14], %14 {strides = array<i32>} : memref<16x128xf32, #tpu.memory_space<vmem>>, vector<16x128xf32>,
    } else {
    }
    return
  }
  func.func @transform_0(%arg0: i32, %arg1: i32, %arg2: i32) -> (i32, i32) {
    %c0_i32 = arith.constant 0 : i32
    return %arg0, %arg2 : i32, i32
  }
  func.func @transform_1(%arg0: i32, %arg1: i32, %arg2: i32) -> (i32, i32) {
    %c0_i32 = arith.constant 0 : i32
    return %arg2, %arg1 : i32, i32
  }
  func.func @transform_2(%arg0: i32, %arg1: i32, %arg2: i32) -> (i32, i32) {
    %c0_i32 = arith.constant 0 : i32
    return %arg0, %arg1 : i32, i32
  }
  func.func @transform_3(%arg0: i32, %arg1: i32, %arg2: i32) -> (i32, i32) {
    %c0_i32 = arith.constant 0 : i32
    return %arg0, %arg1 : i32, i32
  }
}

</mosaic_0001>

<bundles_post_ra>
// kernel: neuro_t5_forward.31
= control target key start
LH: loop header
LB: loop body
LE: loop exit
PB: predicated region body
PF: predicated region fallthrough
CT: control target
= control target key end

     0   :  { %8 = vsyncpa [#allocation5], 0  ;;  %s1017_s0 = inlined_call_operand.vmem [shape: f32[32,256], index: 0, kind: input, shape index: {}]   ;;  %s1018_s1 = inlined_call_operand.hbm [shape: f32[256,128], index: 1, kind: input, shape index: {}]   ;;  %s1019_s2 = inlined_call_operand.vmem [shape: f32[1,128], index: 2, kind: input, shape index: {}]   ;;  %s1020_s3 = inlined_call_operand.vmem [shape: f32[32,128], index: 3, kind: output, shape index: {}]  }
   0x1   :  { %10 = vsyncpa [#allocation5 + $0x1], 0  ;;  %s860_s12 = smov 0   ;;  %s862_s13 = smov 0  }
   0x2   :  { %s864_s14 = smov 0   ;;  %s866_s15 = smov 0  }
   0x3   :  { %s868_s16 = smov 0   ;;  %s870_s17 = smov 0  }
   0x4 LB: > { %s577_s18 = sadd.s32 4294967295, %s834_s17   ;;  %s28_s19 = sadd.s32 1, %s830_s16  ;;  %s834_s17 = sphi %s870_s17, %s16_s17   ;;  %s830_s16 = sphi %s868_s16, %s1027_s16   ;;  %s826_s15 = sphi %s866_s15, %s1026_s15   ;;  %s822_s14 = sphi %s864_s14, %s1025_s14   ;;  %s818_s13 = sphi %s862_s13, %s1024_s13   ;;  %s814_s12 = sphi %s860_s12, %s1023_s12  }
   0x5   : > { %p29_p0 = scmp.ge.s32.totalorder %s28_s19, 2  ;;  %s44_s20 = sadd.s32 1, %s822_s14 }
   0x6   : > { %p51_p1 = scmp.ne.s32.totalorder %s822_s14, %s818_s13  ;;  %p52_p2 = scmp.eq.s32.totalorder %s834_s17, 0 }
   0x7   : > { %s1029_s19 = smov (%p29_p0, %s28_s19), 0  ;;  %p85_p4 = scmp.ne.s32.totalorder %s818_s13, %s814_s12 }
   0x8   : > { %p896_p3 = por %p52_p2, %p51_p1  ;;  %s40_s22 = ssub.s32 %s830_s16, %s1029_s19 }
   0x9   : > { %p86_p5 = scmp.eq.s32.totalorder %s577_s18, 0  ;;  %p42_p6 = scmp.eq.s32.totalorder %s40_s22, 0 }
   0xa   : > { %p580_p8 = scmp.ge.s32.totalorder %s834_s17, 2 }
   0xb   : > { %p903_p7 = por %p86_p5, %p85_p4 }
   0xc   : > { %s908_s24 = scalar_select %p42_p6, %s822_s14, %s44_s20  }
   0xd   : > { %165 = sbr.rel (%p580_p8) target bundleno = 53 (0x35), region = 20 }
  0x14   : > { %168 = sbr.rel (!%p896_p3) target bundleno = 27 (0x1b), region = 24  ;;  %s170_s25 = sand.u32 (%p896_p3), 1, %s822_s14  }
  0x15   : > { %s582_s26 = sshll.u32 (%p896_p3), %s830_s16, 3  ;;  %s581_s27 = sshll.u32 (%p896_p3), %s170_s25, 5 }
  0x16   : > { %s177_s30 = scalar_lea.vmem (%p896_p3), %s1017_s0, %s582_s26  ;;  %s172_s4 = scalar_lea.vmem (%p896_p3), [#allocation3], %s581_s27 }
  0x17   : > { %v211_v0 = vld [vmem:[%s177_s30] sm:$0xff] (%p896_p3)  ;;  %v213_v1 = vld [vmem:[%s177_s30 + $0x10] sm:$0xff] (%p896_p3) }
  0x18   : > { %v215_v2 = vld [vmem:[%s177_s30 + $0x20] sm:$0xff] (%p896_p3)  ;;  %212 = vst [vmem:[%s172_s4] sm:$0xff] (%p896_p3), %v211_v0  ;;  %214 = vst [vmem:[%s172_s4 + $0x8] sm:$0xff] (%p896_p3), %v213_v1  ;;  %v217_v3 = vld [vmem:[%s177_s30 + $0x30] sm:$0xff] (%p896_p3) }
  0x19   : > { %216 = vst [vmem:[%s172_s4 + $0x10] sm:$0xff] (%p896_p3), %v215_v2  ;;  %218 = vst [vmem:[%s172_s4 + $0x18] sm:$0xff] (%p896_p3), %v217_v3 }
  0x1b PF: > { %s225_s5 = sand.u32 1, %s822_s14   ;;  %s596_s6 = sshll.u32 %s830_s16, 11 }
  0x1c   : > { %s583_s7 = sshll.u32 %s225_s5, 7  ;;  %s923_s10 = scalar_lea.hbm %s1018_s1, %s596_s6 }
  0x1d   : > { %s229_s11 = scalar_lea.vmem [#allocation4], %s583_s7  ;;  %s927_s18 = scalar_lea.sflag [#allocation5], %s225_s5 }
  0x1e   : > { %s237_s12 = sshll.u32 %s229_s11, 4  ;;  %s756_s20 = scalar_lea.hbm %s923_s10, 2048  ;;  %s925_s12 = int_to_ptr.vmem [resolvable:$true] %s237_s12 }
  0x1f   : > { %p757_p9 = scmp.ne.s32.totalorder %s923_s10, %s756_s20  ;;  %s760_s26 = scalar_lea.hbm %s1018_s1, 4096 }
  0x20   : > { %p761_p12 = scmp.lt.u32.totalorder %s923_s10, %s1018_s1  ;;  %p762_p13 = scmp.lt.u32.totalorder %s760_s26, %s756_s20 }
  0x21   : > { %p758_p10 = pnand %p757_p9, %p896_p3  ;;  %p764_p1 = scmp.lt.u32.totalorder %s756_s20, %s923_s10 }
  0x22   : > { %p763_p0 = por %p762_p13, %p761_p12 }
  0x23   : > { %p759_p11 = pneg %p758_p10 }
  0x24   : > { %p765_p2 = por %p764_p1, %p763_p0 }
  0x26   : > { %p766_p4 = pnand %p765_p2, %p759_p11 }
  0x28   : > { %769 = shalt.err (!%p766_p4)
}
  0x29   : > { %s770_s29 = scalar_lea.vmem %s925_s12, 2048  ;;  %s836_s30 = smov [#allocation4]  }
  0x2a   : > { %p771_p5 = scmp.ne.s32.totalorder %s925_s12, %s770_s29  ;;  %s774_s4 = sshll.u32 %s836_s30, 4  ;;  %s775_s4 = int_to_ptr.vmem [resolvable:$false] %s774_s4 }
  0x2b   : > { %s776_s5 = scalar_lea.vmem %s775_s4, 4096  ;;  %p777_p9 = scmp.lt.s32.totalorder %s925_s12, %s775_s4 }
  0x2c   : > { %p772_p6 = pnand %p771_p5, %p896_p3  ;;  %p778_p10 = scmp.lt.s32.totalorder %s776_s5, %s770_s29 }
  0x2e   : > { %p773_p8 = pneg %p772_p6  ;;  %p779_p12 = por %p778_p10, %p777_p9 }
  0x30   : > { %p780_p13 = pnand %p779_p12, %p773_p8 }
  0x32   : > { %783 = shalt.err (!%p780_p13)
}
  0x33   : > { %s837_s6 = smov 128   ;;  %s838_s7 = smov 8  }
  0x34   : > { %703 = dma.hbm_to_vmem [thread:$0]  (%p896_p3), %s923_s10, 2048, %s925_s12, %s927_s18, %s837_s6, %s837_s6, %s838_s7  }
  0x35 PF: > { %p586_p11 = scmp.ge.s32.totalorder %s834_s17, 1  ;;  %p245_p0 = scmp.lt.s32.totalorder %s834_s17, 3 }
  0x37   : > { %p246_p1 = pnand %p586_p11, %p245_p0 }
  0x38   : > { %s252_s8 = sand.u32 (!%p246_p1), 1, %s818_s13  }
  0x39   : > { %249 = sbr.rel (%p246_p1) target bundleno = 335 (0x14f), region = 66  ;;  %s587_s9 = sshll.u32 (!%p246_p1), %s252_s8, 5 }
  0x3a   : > { %s588_s11 = sshll.u32 (!%p246_p1), %s252_s8, 7  ;;  %s954_s20 = scalar_lea.vmem (!%p246_p1), [#allocation3], %s587_s9 }
  0x3b   : > { %s259_s22 = scalar_lea.sflag (!%p246_p1), [#allocation5], %s252_s8  ;;  %s956_s25 = scalar_lea.vmem (!%p246_p1), [#allocation4], %s588_s11 }
  0x40   : > { %809 = dma.done.wait (%p903_p7), %s259_s22, 2048  }
  0x41   : > { %811 = vsyncadd (%p903_p7), %s259_s22, 4294965248  ;;  %p589_p3 = scmp.ne.s32.totalorder %s826_s15, 0 }
  0x42   : > { %v839_v4 = vmov (!%p589_p3), 0.0  }
  0x43   : > { %312 = sbr.rel (%p589_p3) target bundleno = 74 (0x4a), region = 78  ;;  %313 = vst [vmem:[#allocation2] sm:$0xff] (!%p589_p3), %v839_v4  ;;  %314 = vst [vmem:[#allocation2 + $0x8] sm:$0xff] (!%p589_p3), %v839_v4 }
  0x44   : > { %315 = vst [vmem:[#allocation2 + $0x10] sm:$0xff] (!%p589_p3), %v839_v4  ;;  %316 = vst [vmem:[#allocation2 + $0x18] sm:$0xff] (!%p589_p3), %v839_v4 }
  0x4a PF: > { %v325_v5 = vld [vmem:[%s956_s25] sm:$0xff]  ;;  %v326_v6 = vld [vmem:[%s956_s25 + $0x8] sm:$0xff]  ;;  %v327_v7 = vld [vmem:[%s956_s25 + $0x10] sm:$0xff]  ;;  %p590_p7 = scmp.ne.s32.totalorder %s826_s15, 1 }
  0x4b   : > { %v655_v8 = vpack.c.bf16 %v326_v6, %v325_v5  ;;  %v328_v9 = vld [vmem:[%s956_s25 + $0x18] sm:$0xff]  ;;  %v329_v11 = vld [vmem:[%s956_s25 + $0x20] sm:$0xff]  ;;  %v330_v12 = vld [vmem:[%s956_s25 + $0x28] sm:$0xff] }
  0x4c   : > { %v659_v10 = vpack.c.bf16 %v328_v9, %v327_v7  ;;  %v663_v13 = vpack.c.bf16 %v330_v12, %v329_v11  ;;  %v321_v14 = vld [vmem:[%s954_s20] sm:$0xff]  ;;  %v323_v15 = vld [vmem:[%s954_s20 + $0x10] sm:$0xff]  ;;  %v332_v17 = vld [vmem:[%s956_s25 + $0x38] sm:$0xff] }
  0x4d   : > { %656 = vmatprep.subr.bf16.mxu0 %v655_v8  ;;  %687 = vmatprep.subr.bf16.mxu1 %v655_v8  ;;  %v331_v16 = vld [vmem:[%s956_s25 + $0x30] sm:$0xff]  ;;  %v333_v19 = vld [vmem:[%s956_s25 + $0x40] sm:$0xff]  ;;  %v334_v20 = vld [vmem:[%s956_s25 + $0x48] sm:$0xff] }
  0x4e   : > { %658 = vmatpush3.bf16.msra.mxu0 %v655_v8  ;;  %695 = vmatpush3.bf16.msra.mxu1 %v655_v8  ;;  %v667_v18 = vpack.c.bf16 %v332_v17, %v331_v16  ;;  %v671_v21 = vpack.c.bf16 %v334_v20, %v333_v19  ;;  %v335_v22 = vld [vmem:[%s956_s25 + $0x50] sm:$0xff]  ;;  %v336_v23 = vld [vmem:[%s956_s25 + $0x58] sm:$0xff]  ;;  %v337_v25 = vld [vmem:[%s956_s25 + $0x60] sm:$0xff] }
  0x4f   : > { %660 = vmatprep.subr.bf16.mxu0 %v659_v10  ;;  %688 = vmatprep.subr.bf16.mxu1 %v659_v10  ;;  %v675_v24 = vpack.c.bf16 %v336_v23, %v335_v22  ;;  %v338_v26 = vld [vmem:[%s956_s25 + $0x68] sm:$0xff]  ;;  %v339_v28 = vld [vmem:[%s956_s25 + $0x70] sm:$0xff]  ;;  %v340_v29 = vld [vmem:[%s956_s25 + $0x78] sm:$0xff] }
  0x50   : > { %649 = vmatprep.mubr.f32.mxu0 %v321_v14  ;;  %652 = vmatprep.mubr.f32.mxu1 %v323_v15  ;;  %v679_v27 = vpack.c.bf16 %v338_v26, %v337_v25  ;;  %v683_v30 = vpack.c.bf16 %v340_v29, %v339_v28  ;;  %v322_v31 = vld [vmem:[%s954_s20 + $0x8] sm:$0xff]  ;;  %v324_v32 = vld [vmem:[%s954_s20 + $0x18] sm:$0xff]  ;;  %v317_v35 = vld [vmem:[#allocation2] sm:$0xff] }
  0x51   : > { %v318_v33 = vld [vmem:[#allocation2 + $0x8] sm:$0xff]  ;;  %v320_v34 = vld [vmem:[#allocation2 + $0x18] sm:$0xff]  ;;  %v319_v36 = vld [vmem:[#allocation2 + $0x10] sm:$0xff] }
  0x52   : > { %662 = vmatpush3.bf16.msra.mxu0 %v659_v10  ;;  %696 = vmatpush3.bf16.msra.mxu1 %v659_v10  ;;  %v591_v46 = vld [vmem:[%s1019_s2] ss:$0 sm:$0xff] (!%p590_p7) }
  0x53   : > { %664 = vmatprep.subr.bf16.mxu0 %v663_v13  ;;  %689 = vmatprep.subr.bf16.mxu1 %v663_v13 }
  0x56   : > { %666 = vmatpush3.bf16.msra.mxu0 %v663_v13  ;;  %697 = vmatpush3.bf16.msra.mxu1 %v663_v13 }
  0x57   : > { %668 = vmatprep.subr.bf16.mxu0 %v667_v18  ;;  %690 = vmatprep.subr.bf16.mxu1 %v667_v18 }
  0x5a   : > { %670 = vmatpush3.bf16.msra.mxu0 %v667_v18  ;;  %698 = vmatpush3.bf16.msra.mxu1 %v667_v18 }
  0x5b   : > { %672 = vmatprep.subr.bf16.mxu0 %v671_v21  ;;  %691 = vmatprep.subr.bf16.mxu1 %v671_v21 }
  0x5e   : > { %674 = vmatpush3.bf16.msra.mxu0 %v671_v21  ;;  %699 = vmatpush3.bf16.msra.mxu1 %v671_v21 }
  0x5f   : > { %676 = vmatprep.subr.bf16.mxu0 %v675_v24  ;;  %692 = vmatprep.subr.bf16.mxu1 %v675_v24 }
  0x62   : > { %678 = vmatpush3.bf16.msra.mxu0 %v675_v24  ;;  %700 = vmatpush3.bf16.msra.mxu1 %v675_v24 }
  0x63   : > { %680 = vmatprep.subr.bf16.mxu0 %v679_v27  ;;  %693 = vmatprep.subr.bf16.mxu1 %v679_v27 }
  0x66   : > { %682 = vmatpush3.bf16.msra.mxu0 %v679_v27  ;;  %701 = vmatpush3.bf16.msra.mxu1 %v679_v27 }
  0x67   : > { %684 = vmatprep.subr.bf16.mxu0 %v683_v30  ;;  %694 = vmatprep.subr.bf16.mxu1 %v683_v30 }
  0x6a   : > { %686 = vmatpush3.bf16.msra.mxu0 %v683_v30  ;;  %702 = vmatpush3.bf16.msra.mxu1 %v683_v30 }
  0x6d   : > { %650 = vmatmul.mubr.f32.vlgmr.msra.gmra.mrb[0].mxu0 %v322_v31  ;;  %653 = vmatmul.mubr.f32.vlgmr.msra.gmra.mrb[0].mxu1 %v324_v32 }
 0x13e   : > { %437 = sbr.rel (%p590_p7) target bundleno = 335 (0x14f), region = 82 }
 0x140   : > { %v651_v37 = vpop.f32.mrb[0].mxu0  ;;  %v654_v38 = vpop.f32.mrb[0].mxu1 }
 0x141   : > { %v427_v39 = vadd.f32 %v651_v37, %v318_v33  ;;  %v429_v40 = vadd.f32 %v654_v38, %v320_v34  ;;  %v407_v41 = vpop.f32.mrb[1].mxu0  ;;  %v417_v42 = vpop.f32.mrb[1].mxu1 }
 0x142   : > { %v426_v43 = vadd.f32 %v407_v41, %v317_v35  ;;  %v428_v44 = vadd.f32 %v417_v42, %v319_v36 }
 0x143   : > { %431 = vst [vmem:[#allocation2 + $0x8] sm:$0xff] %v427_v39  ;;  %433 = vst [vmem:[#allocation2 + $0x18] sm:$0xff] %v429_v40 }
 0x144   : > { %430 = vst [vmem:[#allocation2] sm:$0xff] %v426_v43  ;;  %432 = vst [vmem:[#allocation2 + $0x10] sm:$0xff] %v428_v44 }
 0x14a   : > { %v439_v47 = vld [vmem:[#allocation2 + $0x8] sm:$0xff]  ;;  %v441_v51 = vld [vmem:[#allocation2 + $0x18] sm:$0xff] }
 0x14b   : > { %v438_v45 = vld [vmem:[#allocation2] sm:$0xff]  ;;  %v450_v49 = vadd.f32 %v591_v46, %v439_v47  ;;  %v440_v50 = vld [vmem:[#allocation2 + $0x10] sm:$0xff]  ;;  %v452_v53 = vadd.f32 %v591_v46, %v441_v51 }
 0x14c   : > { %v449_v48 = vadd.f32 %v591_v46, %v438_v45  ;;  %v451_v52 = vadd.f32 %v591_v46, %v440_v50 }
 0x14d   : > { %454 = vst [vmem:[%s1020_s3 + $0x8] sm:$0xff] %v450_v49  ;;  %456 = vst [vmem:[%s1020_s3 + $0x18] sm:$0xff] %v452_v53 }
 0x14e   : > { %453 = vst [vmem:[%s1020_s3] sm:$0xff] %v449_v48  ;;  %455 = vst [vmem:[%s1020_s3 + $0x10] sm:$0xff] %v451_v52 }
 0x14f PF: > { %s16_s17 = sadd.s32 1, %s834_s17   ;;  %s1023_s12 = smov %s818_s13 }
 0x150   : > { %p13_p2 = scmp.ge.s32.totalorder %s16_s17, 4   ;;  %s1024_s13 = smov %s822_s14 }
 0x151   : > { %s1025_s14 = smov %s908_s24  ;;  %s1026_s15 = smov %s830_s16 }
 0x152   : > { %s1027_s16 = smov %s1029_s19  ;;  %15 = sbr.rel (!%p13_p2) target bundleno = 4 (0x4), region = 129 }
 0x159   :  { %485 = vsyncpa [#allocation5], 1 }
 0x15a   :  { %487 = vsyncpa [#allocation5 + $0x1], 1 }

// kernel: neuro_t5_forward.32
= control target key start
LH: loop header
LB: loop body
LE: loop exit
PB: predicated region body
PF: predicated region fallthrough
CT: control target
= control target key end

     0   :  { %s812_s12 = smov 0   ;;  %s814_s13 = smov 0   ;;  %s959_s0 = inlined_call_operand.vmem [shape: f32[32,128], index: 0, kind: input, shape index: {}]   ;;  %s960_s1 = inlined_call_operand.vmem [shape: f32[1,128], index: 1, kind: input, shape index: {}]   ;;  %s961_s2 = inlined_call_operand.vmem [shape: f32[128,384], index: 2, kind: input, shape index: {}]   ;;  %s962_s3 = inlined_call_operand.vmem [shape: f32[32,384], index: 3, kind: output, shape index: {}]  }
   0x1   :  { %s816_s14 = smov 0   ;;  %s818_s15 = smov 0  }
   0x2   :  { %s820_s16 = smov 0  }
   0x3 LB: > { %s22_s17 = sadd.s32 1, %s786_s15  ;;  %s583_s18 = sadd.s32 4294967295, %s790_s16   ;;  %s790_s16 = sphi %s820_s16, %s13_s16   ;;  %s786_s15 = sphi %s818_s15, %s967_s15   ;;  %s782_s14 = sphi %s816_s14, %s966_s14   ;;  %s778_s13 = sphi %s814_s13, %s965_s13   ;;  %s774_s12 = sphi %s812_s12, %s964_s12  }
   0x4   : > { %p23_p0 = scmp.ge.s32.totalorder %s22_s17, 3  ;;  %p86_p1 = scmp.ne.s32.totalorder %s778_s13, %s774_s12 }
   0x5   : > { %p87_p2 = scmp.eq.s32.totalorder %s790_s16, 0  ;;  %p118_p4 = scmp.eq.s32.totalorder %s583_s18, 2 }
   0x6   : > { %s969_s17 = smov (%p23_p0, %s22_s17), 0  ;;  %s79_s20 = sadd.s32 1, %s778_s13 }
   0x7   : > { %p88_p3 = por %p87_p2, %p86_p1  ;;  %s76_s19 = ssub.s32 %s786_s15, %s969_s17 }
   0x8   : > { %p77_p5 = scmp.eq.s32.totalorder %s76_s19, 0  ;;  %p847_p6 = por %p118_p4, %p86_p1 }
   0x9   : > { %p587_p7 = scmp.ge.s32.totalorder %s790_s16, 3 }
   0xa   : > { %s852_s22 = scalar_select %p77_p5, %s778_s13, %s79_s20  }
   0xb   : > { %152 = sbr.rel (%p587_p7) target bundleno = 30 (0x1e), region = 24 }
  0x12   : > { %155 = sbr.rel (!%p88_p3) target bundleno = 30 (0x1e), region = 28  ;;  %s157_s23 = sand.u32 (%p88_p3), 1, %s778_s13  }
  0x13   : > { %s589_s24 = sshll.u32 (%p88_p3), %s786_s15, 3  ;;  %s588_s25 = sshll.u32 (%p88_p3), %s157_s23, 7 }
  0x14   : > { %s860_s28 = scalar_lea.vmem (%p88_p3), %s961_s2, %s589_s24  ;;  %s159_s29 = scalar_lea.vmem (%p88_p3), [#allocation2], %s588_s25 }
  0x15   : > { %v219_v0 = vld [vmem:[%s860_s28] sm:$0xff] (%p88_p3)  ;;  %v221_v1 = vld [vmem:[%s860_s28 + $0x18] sm:$0xff] (%p88_p3)  ;;  %v223_v2 = vld [vmem:[%s860_s28 + $0x30] sm:$0xff] (%p88_p3) }
  0x16   : > { %220 = vst [vmem:[%s159_s29] sm:$0xff] (%p88_p3), %v219_v0  ;;  %222 = vst [vmem:[%s159_s29 + $0x8] sm:$0xff] (%p88_p3), %v221_v1  ;;  %v225_v3 = vld [vmem:[%s860_s28 + $0x48] sm:$0xff] (%p88_p3)  ;;  %v227_v4 = vld [vmem:[%s860_s28 + $0x60] sm:$0xff] (%p88_p3) }
  0x17   : > { %224 = vst [vmem:[%s159_s29 + $0x10] sm:$0xff] (%p88_p3), %v223_v2  ;;  %v229_v5 = vld [vmem:[%s860_s28 + $0x78] sm:$0xff] (%p88_p3)  ;;  %226 = vst [vmem:[%s159_s29 + $0x18] sm:$0xff] (%p88_p3), %v225_v3  ;;  %v231_v6 = vld [vmem:[%s860_s28 + $0x90] sm:$0xff] (%p88_p3) }
  0x18   : > { %228 = vst [vmem:[%s159_s29 + $0x20] sm:$0xff] (%p88_p3), %v227_v4  ;;  %230 = vst [vmem:[%s159_s29 + $0x28] sm:$0xff] (%p88_p3), %v229_v5  ;;  %v233_v7 = vld [vmem:[%s860_s28 + $0xa8] sm:$0xff] (%p88_p3)  ;;  %v235_v8 = vld [vmem:[%s860_s28 + $0xc0] sm:$0xff] (%p88_p3) }
  0x19   : > { %232 = vst [vmem:[%s159_s29 + $0x30] sm:$0xff] %v231_v6  ;;  %234 = vst [vmem:[%s159_s29 + $0x38] sm:$0xff] %v233_v7  ;;  %v237_v9 = vld [vmem:[%s860_s28 + $0xd8] sm:$0xff]  ;;  %v239_v10 = vld [vmem:[%s860_s28 + $0xf0] sm:$0xff] }
  0x1a   : > { %236 = vst [vmem:[%s159_s29 + $0x40] sm:$0xff] %v235_v8  ;;  %v241_v11 = vld [vmem:[%s860_s28 + $0x108] sm:$0xff]  ;;  %238 = vst [vmem:[%s159_s29 + $0x48] sm:$0xff] %v237_v9  ;;  %v243_v12 = vld [vmem:[%s860_s28 + $0x120] sm:$0xff] }
  0x1b   : > { %240 = vst [vmem:[%s159_s29 + $0x50] sm:$0xff] %v239_v10  ;;  %242 = vst [vmem:[%s159_s29 + $0x58] sm:$0xff] %v241_v11  ;;  %v245_v13 = vld [vmem:[%s860_s28 + $0x138] sm:$0xff]  ;;  %v247_v14 = vld [vmem:[%s860_s28 + $0x150] sm:$0xff] }
  0x1c   : > { %244 = vst [vmem:[%s159_s29 + $0x60] sm:$0xff] %v243_v12  ;;  %246 = vst [vmem:[%s159_s29 + $0x68] sm:$0xff] %v245_v13  ;;  %v249_v15 = vld [vmem:[%s860_s28 + $0x168] sm:$0xff] }
  0x1d   : > { %248 = vst [vmem:[%s159_s29 + $0x70] sm:$0xff] %v247_v14  ;;  %250 = vst [vmem:[%s159_s29 + $0x78] sm:$0xff] %v249_v15 }
  0x1e PF: > { %p590_p8 = scmp.ge.s32.totalorder %s790_s16, 1  ;;  %p255_p9 = scmp.lt.s32.totalorder %s790_s16, 4 }
  0x20   : > { %p256_p10 = pnand %p590_p8, %p255_p9 }
  0x21   : > { %v883_v16 = vld [vmem:[%s959_s0] sm:$0xff] (!%p256_p10)  ;;  %v888_v17 = vld [vmem:[%s959_s0 + $0x8] sm:$0xff] (!%p256_p10)  ;;  %v893_v18 = vld [vmem:[%s959_s0 + $0x10] sm:$0xff] (!%p256_p10)  ;;  %s262_s9 = sand.u32 (!%p256_p10), 1, %s774_s12  }
  0x22   : > { %259 = sbr.rel (%p256_p10) target bundleno = 424 (0x1a8), region = 66  ;;  %v300_v19 = vmul.f32 (!%p256_p10), %v883_v16, %v883_v16  ;;  %v301_v20 = vmul.f32 (!%p256_p10), %v888_v17, %v888_v17  ;;  %v903_v21 = vld [vmem:[%s959_s0 + $0x18] sm:$0xff] (!%p256_p10)  ;;  %s591_s18 = sshll.u32 (!%p256_p10), %s262_s9, 7  ;;  %v302_v22 = vmul.f32 (!%p256_p10), %v893_v18, %v893_v18  ;;  %v593_v61 = vld [vmem:[%s960_s1] ss:$0 sm:$0xff] (!%p256_p10) }
  0x23   : > { %v303_v23 = vmul.f32 (!%p256_p10), %v903_v21, %v903_v21  ;;  %s911_s19 = scalar_lea.vmem (!%p256_p10), [#allocation2], %s591_s18  ;;  %s592_s24 = sshll.u32 (!%p256_p10), %s262_s9, 5 }
  0x24   : > { %304 = vadd.xlane.f32.xlu0 (!%p256_p10), %v300_v19  ;;  %306 = vadd.xlane.f32.xlu1 (!%p256_p10), %v301_v20  ;;  %v340_v24 = vld [vmem:[%s911_s19] sm:$0xff] (!%p256_p10)  ;;  %v341_v25 = vld [vmem:[%s911_s19 + $0x8] sm:$0xff] (!%p256_p10)  ;;  %v342_v26 = vld [vmem:[%s911_s19 + $0x10] sm:$0xff] (!%p256_p10)  ;;  %s288_s25 = scalar_lea.vmem (!%p256_p10), [#allocation3], %s592_s24 }
  0x25   : > { %v656_v27 = vpack.c.bf16 (!%p256_p10), %v341_v25, %v340_v24  ;;  %v343_v28 = vld [vmem:[%s911_s19 + $0x18] sm:$0xff] (!%p256_p10)  ;;  %v344_v30 = vld [vmem:[%s911_s19 + $0x20] sm:$0xff] (!%p256_p10)  ;;  %v345_v31 = vld [vmem:[%s911_s19 + $0x28] sm:$0xff] (!%p256_p10) }
  0x26   : > { %v660_v29 = vpack.c.bf16 (!%p256_p10), %v343_v28, %v342_v26  ;;  %v664_v32 = vpack.c.bf16 (!%p256_p10), %v345_v31, %v344_v30  ;;  %v346_v33 = vld [vmem:[%s911_s19 + $0x30] sm:$0xff] (!%p256_p10)  ;;  %v347_v34 = vld [vmem:[%s911_s19 + $0x38] sm:$0xff] (!%p256_p10)  ;;  %v348_v36 = vld [vmem:[%s911_s19 + $0x40] sm:$0xff] (!%p256_p10) }
  0x27   : > { %657 = vmatprep.subr.bf16.mxu0 (!%p256_p10), %v656_v27  ;;  %688 = vmatprep.subr.bf16.mxu1 (!%p256_p10), %v656_v27  ;;  %v668_v35 = vpack.c.bf16 (!%p256_p10), %v347_v34, %v346_v33  ;;  %v349_v37 = vld [vmem:[%s911_s19 + $0x48] sm:$0xff] (!%p256_p10)  ;;  %v350_v39 = vld [vmem:[%s911_s19 + $0x50] sm:$0xff] (!%p256_p10)  ;;  %v351_v40 = vld [vmem:[%s911_s19 + $0x58] sm:$0xff] (!%p256_p10) }
  0x28   : > { %308 = vadd.xlane.f32.xlu0 (!%p256_p10), %v302_v22  ;;  %310 = vadd.xlane.f32.xlu1 (!%p256_p10), %v303_v23  ;;  %v672_v38 = vpack.c.bf16 (!%p256_p10), %v349_v37, %v348_v36  ;;  %v676_v41 = vpack.c.bf16 (!%p256_p10), %v351_v40, %v350_v39  ;;  %v352_v42 = vld [vmem:[%s911_s19 + $0x60] sm:$0xff] (!%p256_p10)  ;;  %v353_v43 = vld [vmem:[%s911_s19 + $0x68] sm:$0xff] (!%p256_p10)  ;;  %v354_v44 = vld [vmem:[%s911_s19 + $0x70] sm:$0xff] (!%p256_p10) }
  0x29   : > { %659 = vmatpush3.bf16.msra.mxu0 %v656_v27  ;;  %696 = vmatpush3.bf16.msra.mxu1 %v656_v27  ;;  %v680_v45 = vpack.c.bf16 %v353_v43, %v352_v42  ;;  %v355_v46 = vld [vmem:[%s911_s19 + $0x78] sm:$0xff]  ;;  %s595_s26 = sshll.u32 (%p847_p6), %s782_s14, 3 }
  0x2a   : > { %661 = vmatprep.subr.bf16.mxu0 %v660_v29  ;;  %689 = vmatprep.subr.bf16.mxu1 %v660_v29  ;;  %v684_v47 = vpack.c.bf16 %v355_v46, %v354_v44  ;;  %s456_s28 = scalar_lea.vmem (%p847_p6), %s962_s3, %s595_s26 }
  0x2d   : > { %663 = vmatpush3.bf16.msra.mxu0 %v660_v29  ;;  %697 = vmatpush3.bf16.msra.mxu1 %v660_v29 }
  0x2e   : > { %665 = vmatprep.subr.bf16.mxu0 %v664_v32  ;;  %690 = vmatprep.subr.bf16.mxu1 %v664_v32 }
  0x31   : > { %667 = vmatpush3.bf16.msra.mxu0 %v664_v32  ;;  %698 = vmatpush3.bf16.msra.mxu1 %v664_v32 }
  0x32   : > { %669 = vmatprep.subr.bf16.mxu0 %v668_v35  ;;  %691 = vmatprep.subr.bf16.mxu1 %v668_v35 }
  0x35   : > { %671 = vmatpush3.bf16.msra.mxu0 %v668_v35  ;;  %699 = vmatpush3.bf16.msra.mxu1 %v668_v35 }
  0x36   : > { %673 = vmatprep.subr.bf16.mxu0 %v672_v38  ;;  %692 = vmatprep.subr.bf16.mxu1 %v672_v38 }
  0x39   : > { %675 = vmatpush3.bf16.msra.mxu0 %v672_v38  ;;  %700 = vmatpush3.bf16.msra.mxu1 %v672_v38 }
  0x3a   : > { %677 = vmatprep.subr.bf16.mxu0 %v676_v41  ;;  %693 = vmatprep.subr.bf16.mxu1 %v676_v41 }
  0x3d   : > { %679 = vmatpush3.bf16.msra.mxu0 %v676_v41  ;;  %701 = vmatpush3.bf16.msra.mxu1 %v676_v41 }
  0x3e   : > { %681 = vmatprep.subr.bf16.mxu0 %v680_v45  ;;  %694 = vmatprep.subr.bf16.mxu1 %v680_v45 }
  0x41   : > { %683 = vmatpush3.bf16.msra.mxu0 %v680_v45  ;;  %702 = vmatpush3.bf16.msra.mxu1 %v680_v45 }
  0x42   : > { %685 = vmatprep.subr.bf16.mxu0 %v684_v47  ;;  %695 = vmatprep.subr.bf16.mxu1 %v684_v47 }
  0x45   : > { %687 = vmatpush3.bf16.msra.mxu0 %v684_v47  ;;  %703 = vmatpush3.bf16.msra.mxu1 %v684_v47 }
  0xb1   : > { %v305_v48 = vpop.xlane.xlu0 %304  ;;  %v307_v49 = vpop.xlane.xlu1 %306 }
  0xb2   : > { %v313_v50 = vmul.f32 0.0078125, %v305_v48  ;;  %v314_v51 = vmul.f32 0.0078125, %v307_v49 }
  0xb4   : > { %v317_v52 = vadd.f32 1e-06, %v313_v50  ;;  %v318_v53 = vadd.f32 1e-06, %v314_v51 }
  0xb5   : > { %v309_v54 = vpop.xlane.xlu0 %308  ;;  %v311_v55 = vpop.xlane.xlu1 %310 }
  0xb6   : > { %744 = vrsqrt.f32 %v317_v52  ;;  %v315_v56 = vmul.f32 0.0078125, %v309_v54  ;;  %v316_v57 = vmul.f32 0.0078125, %v311_v55 }
  0xb7   : > { %746 = vrsqrt.f32 %v318_v53 }
  0xb8   : > { %v319_v58 = vadd.f32 1e-06, %v315_v56  ;;  %v320_v59 = vadd.f32 1e-06, %v316_v57 }
  0xba   : > { %748 = vrsqrt.f32 %v319_v58 }
  0xbb   : > { %750 = vrsqrt.f32 %v320_v59 }
  0xc0   : > { %v745_v60 = vpop.eup %744 }
  0xc1   : > { %v747_v62 = vpop.eup %746  ;;  %v325_v63 = vmul.f32 %v745_v60, %v883_v16 }
  0xc2   : > { %v326_v0 = vmul.f32 %v747_v62, %v888_v17 }
  0xc3   : > { %v336_v1 = vmul.f32 %v593_v61, %v325_v63 }
  0xc4   : > { %v749_v2 = vpop.eup %748  ;;  %v337_v3 = vmul.f32 %v593_v61, %v326_v0 }
  0xc5   : > { %v751_v4 = vpop.eup %750  ;;  %650 = vmatprep.mubr.f32.mxu0 %v336_v1  ;;  %v327_v5 = vmul.f32 %v749_v2, %v893_v18 }
  0xc6   : > { %651 = vmatmul.mubr.f32.vlgmr.msra.gmra.mrb[0].mxu0 %v337_v3  ;;  %v328_v6 = vmul.f32 %v751_v4, %v903_v21 }
  0xc7   : > { %v338_v7 = vmul.f32 %v593_v61, %v327_v5 }
  0xc8   : > { %v339_v8 = vmul.f32 %v593_v61, %v328_v6 }
  0xc9   : > { %653 = vmatprep.mubr.f32.mxu1 %v338_v7 }
  0xca   : > { %654 = vmatmul.mubr.f32.vlgmr.msra.gmra.mrb[0].mxu1 %v339_v8 }
 0x199   : > { %v652_v9 = vpop.f32.mrb[0].mxu0  ;;  %451 = sbr.rel (!%p847_p6) target bundleno = 424 (0x1a8), region = 74 }
 0x19a   : > { %442 = vst [vmem:[%s288_s25 + $0x8] sm:$0xff] %v652_v9  ;;  %v422_v10 = vpop.f32.mrb[1].mxu0 }
 0x19b   : > { %441 = vst [vmem:[%s288_s25] sm:$0xff] %v422_v10 }
 0x19d   : > { %v655_v11 = vpop.f32.mrb[0].mxu1 }
 0x19e   : > { %444 = vst [vmem:[%s288_s25 + $0x18] sm:$0xff] %v655_v11  ;;  %v432_v12 = vpop.f32.mrb[1].mxu1 }
 0x19f   : > { %443 = vst [vmem:[%s288_s25 + $0x10] sm:$0xff] %v432_v12 }
 0x1a1   : > { %v492_v14 = vld [vmem:[%s288_s25 + $0x8] sm:$0xff] }
 0x1a2   : > { %v490_v13 = vld [vmem:[%s288_s25] sm:$0xff]  ;;  %493 = vst [vmem:[%s456_s28 + $0x18] sm:$0xff] %v492_v14 }
 0x1a3   : > { %491 = vst [vmem:[%s456_s28] sm:$0xff] %v490_v13 }
 0x1a5   : > { %v496_v16 = vld [vmem:[%s288_s25 + $0x18] sm:$0xff] }
 0x1a6   : > { %v494_v15 = vld [vmem:[%s288_s25 + $0x10] sm:$0xff]  ;;  %497 = vst [vmem:[%s456_s28 + $0x48] sm:$0xff] %v496_v16 }
 0x1a7   : > { %495 = vst [vmem:[%s456_s28 + $0x30] sm:$0xff] %v494_v15 }
 0x1a8 PF: > { %s13_s16 = sadd.s32 1, %s790_s16   ;;  %s964_s12 = smov %s778_s13 }
 0x1a9   : > { %p10_p11 = scmp.ge.s32.totalorder %s13_s16, 5   ;;  %s965_s13 = smov %s852_s22 }
 0x1aa   : > { %s966_s14 = smov %s786_s15  ;;  %s967_s15 = smov %s969_s17 }
 0x1ab   :  { %12 = sbr.rel (!%p10_p11) target bundleno = 3 (0x3), region = 146 }

// kernel: neuro_t5_forward.34
= control target key start
LH: loop header
LB: loop body
LE: loop exit
PB: predicated region body
PF: predicated region fallthrough
CT: control target
= control target key end

     0   :  { %s372_s1 = inlined_call_operand.vmem [shape: f32[128,128], index: 1, kind: input, shape index: {}]   ;;  %s373_s0 = inlined_call_operand.vmem [shape: f32[32,128], index: 0, kind: input, shape index: {}]   ;;  %s374_s2 = inlined_call_operand.vmem [shape: f32[32,128], index: 2, kind: input, shape index: {}]   ;;  %s375_s3 = inlined_call_operand.vmem [shape: f32[32,128], index: 3, kind: output, shape index: {}]  }
   0x1   :  { %v30_v0 = vld [vmem:[%s372_s1] sm:$0xff]  ;;  %v31_v1 = vld [vmem:[%s372_s1 + $0x8] sm:$0xff]  ;;  %v32_v2 = vld [vmem:[%s372_s1 + $0x10] sm:$0xff] }
   0x2   :  { %v220_v3 = vpack.c.bf16 %v31_v1, %v30_v0  ;;  %v33_v4 = vld [vmem:[%s372_s1 + $0x18] sm:$0xff]  ;;  %v34_v6 = vld [vmem:[%s372_s1 + $0x20] sm:$0xff]  ;;  %v35_v7 = vld [vmem:[%s372_s1 + $0x28] sm:$0xff] }
   0x3   :  { %v224_v5 = vpack.c.bf16 %v33_v4, %v32_v2  ;;  %v228_v8 = vpack.c.bf16 %v35_v7, %v34_v6  ;;  %v26_v9 = vld [vmem:[%s373_s0] sm:$0xff]  ;;  %v28_v10 = vld [vmem:[%s373_s0 + $0x10] sm:$0xff]  ;;  %v37_v12 = vld [vmem:[%s372_s1 + $0x38] sm:$0xff] }
   0x4   :  { %221 = vmatprep.subr.bf16.mxu0 %v220_v3  ;;  %252 = vmatprep.subr.bf16.mxu1 %v220_v3  ;;  %v36_v11 = vld [vmem:[%s372_s1 + $0x30] sm:$0xff]  ;;  %v38_v14 = vld [vmem:[%s372_s1 + $0x40] sm:$0xff]  ;;  %v39_v15 = vld [vmem:[%s372_s1 + $0x48] sm:$0xff] }
   0x5   :  { %223 = vmatpush3.bf16.msra.mxu0 %v220_v3  ;;  %260 = vmatpush3.bf16.msra.mxu1 %v220_v3  ;;  %v232_v13 = vpack.c.bf16 %v37_v12, %v36_v11  ;;  %v236_v16 = vpack.c.bf16 %v39_v15, %v38_v14  ;;  %v40_v17 = vld [vmem:[%s372_s1 + $0x50] sm:$0xff]  ;;  %v41_v18 = vld [vmem:[%s372_s1 + $0x58] sm:$0xff]  ;;  %v42_v20 = vld [vmem:[%s372_s1 + $0x60] sm:$0xff] }
   0x6   :  { %225 = vmatprep.subr.bf16.mxu0 %v224_v5  ;;  %253 = vmatprep.subr.bf16.mxu1 %v224_v5  ;;  %v240_v19 = vpack.c.bf16 %v41_v18, %v40_v17  ;;  %v43_v21 = vld [vmem:[%s372_s1 + $0x68] sm:$0xff]  ;;  %v44_v23 = vld [vmem:[%s372_s1 + $0x70] sm:$0xff]  ;;  %v45_v24 = vld [vmem:[%s372_s1 + $0x78] sm:$0xff] }
   0x7   :  { %214 = vmatprep.mubr.f32.mxu0 %v26_v9  ;;  %217 = vmatprep.mubr.f32.mxu1 %v28_v10  ;;  %v244_v22 = vpack.c.bf16 %v43_v21, %v42_v20  ;;  %v248_v25 = vpack.c.bf16 %v45_v24, %v44_v23  ;;  %v27_v26 = vld [vmem:[%s373_s0 + $0x8] sm:$0xff]  ;;  %v29_v27 = vld [vmem:[%s373_s0 + $0x18] sm:$0xff]  ;;  %v146_v30 = vld [vmem:[%s374_s2] sm:$0xff] }
   0x8   :  { %v147_v28 = vld [vmem:[%s374_s2 + $0x8] sm:$0xff]  ;;  %v149_v29 = vld [vmem:[%s374_s2 + $0x18] sm:$0xff]  ;;  %v148_v31 = vld [vmem:[%s374_s2 + $0x10] sm:$0xff] }
   0x9   :  { %227 = vmatpush3.bf16.msra.mxu0 %v224_v5  ;;  %261 = vmatpush3.bf16.msra.mxu1 %v224_v5 }
   0xa   :  { %229 = vmatprep.subr.bf16.mxu0 %v228_v8  ;;  %254 = vmatprep.subr.bf16.mxu1 %v228_v8 }
   0xd   :  { %231 = vmatpush3.bf16.msra.mxu0 %v228_v8  ;;  %262 = vmatpush3.bf16.msra.mxu1 %v228_v8 }
   0xe   :  { %233 = vmatprep.subr.bf16.mxu0 %v232_v13  ;;  %255 = vmatprep.subr.bf16.mxu1 %v232_v13 }
  0x11   :  { %235 = vmatpush3.bf16.msra.mxu0 %v232_v13  ;;  %263 = vmatpush3.bf16.msra.mxu1 %v232_v13 }
  0x12   :  { %237 = vmatprep.subr.bf16.mxu0 %v236_v16  ;;  %256 = vmatprep.subr.bf16.mxu1 %v236_v16 }
  0x15   :  { %239 = vmatpush3.bf16.msra.mxu0 %v236_v16  ;;  %264 = vmatpush3.bf16.msra.mxu1 %v236_v16 }
  0x16   :  { %241 = vmatprep.subr.bf16.mxu0 %v240_v19  ;;  %257 = vmatprep.subr.bf16.mxu1 %v240_v19 }
  0x19   :  { %243 = vmatpush3.bf16.msra.mxu0 %v240_v19  ;;  %265 = vmatpush3.bf16.msra.mxu1 %v240_v19 }
  0x1a   :  { %245 = vmatprep.subr.bf16.mxu0 %v244_v22  ;;  %258 = vmatprep.subr.bf16.mxu1 %v244_v22 }
  0x1d   :  { %247 = vmatpush3.bf16.msra.mxu0 %v244_v22  ;;  %266 = vmatpush3.bf16.msra.mxu1 %v244_v22 }
  0x1e   :  { %249 = vmatprep.subr.bf16.mxu0 %v248_v25  ;;  %259 = vmatprep.subr.bf16.mxu1 %v248_v25 }
  0x21   :  { %251 = vmatpush3.bf16.msra.mxu0 %v248_v25  ;;  %267 = vmatpush3.bf16.msra.mxu1 %v248_v25 }
  0x24   :  { %215 = vmatmul.mubr.f32.vlgmr.msra.gmra.mrb[0].mxu0 %v27_v26  ;;  %218 = vmatmul.mubr.f32.vlgmr.msra.gmra.mrb[0].mxu1 %v29_v27 }
  0xf7   :  { %v216_v32 = vpop.f32.mrb[0].mxu0  ;;  %v219_v33 = vpop.f32.mrb[0].mxu1 }
  0xf8   :  { %v151_v34 = vadd.f32 %v216_v32, %v147_v28  ;;  %v153_v35 = vadd.f32 %v219_v33, %v149_v29  ;;  %v112_v36 = vpop.f32.mrb[1].mxu0  ;;  %v122_v37 = vpop.f32.mrb[1].mxu1 }
  0xf9   :  { %v150_v38 = vadd.f32 %v146_v30, %v112_v36  ;;  %v152_v39 = vadd.f32 %v148_v31, %v122_v37 }
  0xfa   :  { %155 = vst [vmem:[%s375_s3 + $0x8] sm:$0xff] %v151_v34  ;;  %157 = vst [vmem:[%s375_s3 + $0x18] sm:$0xff] %v153_v35 }
  0xfb   :  { %154 = vst [vmem:[%s375_s3] sm:$0xff] %v150_v38  ;;  %156 = vst [vmem:[%s375_s3 + $0x10] sm:$0xff] %v152_v39 }

// kernel: neuro_t5_forward.33
= control target key start
LH: loop header
LB: loop body
LE: loop exit
PB: predicated region body
PF: predicated region fallthrough
CT: control target
= control target key end

     0   :  { %s938_s18 = smov 0   ;;  %s1004_s0 = inlined_call_operand.vmem [shape: f32[2,2,16,64], index: 0, kind: input, shape index: {}]   ;;  %s1005_s1 = inlined_call_operand.vmem [shape: f32[2,2,16,64], index: 1, kind: input, shape index: {}]   ;;  %s1006_s2 = inlined_call_operand.vmem [shape: f32[2,2,16,64], index: 2, kind: input, shape index: {}]   ;;  %s1007_s3 = inlined_call_operand.vmem [shape: f32[1,2,16,16], index: 3, kind: input, shape index: {}]   ;;  %s1008_s4 = inlined_call_operand.vmem [shape: f32[2,1,1,16], index: 4, kind: input, shape index: {}]   ;;  %s1009_s5 = inlined_call_operand.vmem [shape: f32[2,2,16,64], index: 5, kind: output, shape index: {}]  }
   0x1 LB: > { %s780_s19 = sadd.s32 4294967295, %s906_s18   ;;  %p784_p0 = scmp.ge.s32.totalorder %s906_s18, 1  ;;  %s906_s18 = sphi %s938_s18, %s15_s18  }
   0x2   : > { %p215_p1 = scmp.lt.s32.totalorder %s906_s18, 3 }
   0x4   : > { %p216_p2 = pnand %p784_p0, %p215_p1 }
   0x5   : > { %p256_p3 = scmp.lt.s32.totalorder (!%p216_p2), %s780_s19, 1  ;;  %vm306_vm0 = vcmask (!%p216_p2), 523264   ;;  %v292_v10 = vld [vmem:[%s1007_s3 + $0x8] sm:$0xff] (!%p216_p2)  ;;  %v291_v12 = vld [vmem:[%s1007_s3] sm:$0xff] (!%p216_p2)  ;;  %v294_v13 = vld [vmem:[%s1007_s3 + $0x18] sm:$0xff] (!%p216_p2)  ;;  %vm481_vm2 = vcmask (!%p216_p2), 130048  }
   0x6   : > { %219 = sbr.rel (%p216_p2) target bundleno = 778 (0x30a), region = 40  ;;  %vm857_vm1 = vmpackc.low (!%p216_p2), %vm306_vm0, %vm306_vm0  ;;  %v293_v14 = vld [vmem:[%s1007_s3 + $0x10] sm:$0xff] (!%p216_p2) }
   0xd   : > { %s1011_s19 = smov (!%p256_p3, %s780_s19), 1 }
   0xe   : > { %s946_s20 = sshll.u32 %s1011_s19, 5  ;;  %s273_s29 = scalar_lea.vmem %s1008_s4, %s1011_s19 }
   0xf   : > { %s265_s23 = scalar_lea.vmem %s1005_s1, %s946_s20  ;;  %s260_s26 = scalar_lea.vmem %s1004_s0, %s946_s20  ;;  %v793_v11 = vld [vmem:[%s273_s29] ss:$0 sm:$0xff] }
  0x10   : > { %v283_v0 = vld [vmem:[%s265_s23] sm:$0xff]  ;;  %v284_v1 = vld [vmem:[%s265_s23 + $0x8] sm:$0xff]  ;;  %v285_v2 = vld [vmem:[%s265_s23 + $0x10] sm:$0xff]  ;;  %v303_v15 = vadd.f32 %v793_v11, %v292_v10  ;;  %v302_v16 = vadd.f32 %v793_v11, %v291_v12  ;;  %v305_v17 = vadd.f32 %v793_v11, %v294_v13  ;;  %v304_v18 = vadd.f32 %v793_v11, %v293_v14  ;;  %s270_s15 = scalar_lea.vmem %s1006_s2, %s946_s20  ;;  %s278_s19 = scalar_lea.vmem %s1009_s5, %s946_s20 }
  0x11   : > { %v856_v3 = vpack.c.bf16 %v284_v1, %v283_v0  ;;  %v286_v4 = vld [vmem:[%s265_s23 + $0x18] sm:$0xff]  ;;  %v279_v5 = vld [vmem:[%s260_s26] sm:$0xff]  ;;  %v281_v7 = vld [vmem:[%s260_s26 + $0x10] sm:$0xff] }
  0x12   : > { %v862_v6 = vpack.c.bf16 %v286_v4, %v285_v2  ;;  %832 = vmatprep.mubr.msk.f32.mxu0 %vm306_vm0, %v279_v5  ;;  %839 = vmatprep.mubr.msk.f32.mxu1 %vm306_vm0, %v281_v7  ;;  %v280_v8 = vld [vmem:[%s260_s26 + $0x8] sm:$0xff]  ;;  %v282_v9 = vld [vmem:[%s260_s26 + $0x18] sm:$0xff]  ;;  %v287_v51 = vld [vmem:[%s270_s15] sm:$0xff] }
  0x13   : > { %858 = vmatprep.subr.msk.bf16.mxu0 %vm857_vm1, %v856_v3  ;;  %v288_v52 = vld [vmem:[%s270_s15 + $0x8] sm:$0xff]  ;;  %v289_v54 = vld [vmem:[%s270_s15 + $0x10] sm:$0xff]  ;;  %v290_v55 = vld [vmem:[%s270_s15 + $0x18] sm:$0xff] }
  0x14   : > { %861 = vmatpush3.bf16.xpose.msk.msra.mxu0 %vm857_vm1, %v856_v3  ;;  %864 = vmatprep.subr.msk.bf16.mxu1 %vm857_vm1, %v862_v6  ;;  %v868_v53 = vpack.c.bf16 %v288_v52, %v287_v51  ;;  %v872_v56 = vpack.c.bf16 %v290_v55, %v289_v54 }
  0x15   : > { %867 = vmatpush3.bf16.xpose.msk.msra.mxu1 %vm857_vm1, %v862_v6 }
  0x16   : > { %869 = vmatprep.subr.bf16.mxu0 %v868_v53  ;;  %873 = vmatprep.subr.bf16.mxu1 %v872_v56 }
  0x1b   : > { %833 = vmatmul.mubr.msk.f32.vlgmr.msra.gmra.mrb[0].mxu0 %vm306_vm0, %v280_v8 }
  0x1c   : > { %840 = vmatmul.mubr.msk.f32.vlgmr.msra.gmra.mrb[0].mxu1 %vm306_vm0, %v282_v9  ;;  %871 = vmatpush3.bf16.msra.mxu0 %v868_v53 }
  0x1d   : > { %875 = vmatpush3.bf16.msra.mxu1 %v872_v56 }
  0xee   : > { %v834_v19 = vpop.f32.mrb[0].mxu0 }
  0xef   : > { %v391_v20 = vadd.f32 %v834_v19, %v303_v15  ;;  %v385_v21 = vpop.f32.mrb[1].mxu0  ;;  %v841_v22 = vpop.f32.mrb[0].mxu1 }
  0xf0   : > { %v386_v23 = vadd.f32 %v385_v21, %v302_v16  ;;  %v478_v24 = vadd.f32 %v841_v22, %v305_v17  ;;  %v472_v25 = vpop.f32.mrb[1].mxu1 }
  0xf1   : > { %v473_v26 = vadd.f32 %v472_v25, %v304_v18  ;;  %v485_v27 = vsel %vm481_vm2, %v391_v20, -inf }
  0xf2   : > { %486 = vmax.xlane.f32.xlu1 %v485_v27  ;;  %v482_v28 = vsel %vm481_vm2, %v386_v23, -inf  ;;  %v491_v29 = vsel %vm481_vm2, %v478_v24, -inf }
  0xf3   : > { %483 = vmax.xlane.f32.xlu0 %v482_v28  ;;  %v488_v30 = vsel %vm481_vm2, %v473_v26, -inf }
  0xf6   : > { %492 = vmax.xlane.f32.xlu1 %v491_v29 }
  0xf7   : > { %489 = vmax.xlane.f32.xlu0 %v488_v30 }
 0x17f   : > { %v487_v31 = vpop.xlane.xlu1 %486 }
 0x180   : > { %v495_v32 = vsub.f32 %v391_v20, %v487_v31  ;;  %v484_v33 = vpop.xlane.xlu0 %483 }
 0x181   : > { %v494_v34 = vsub.f32 %v386_v23, %v484_v33 }
 0x182   : > { %v500_v35 = vmul.f32 1.442695, %v495_v32 }
 0x183   : > { %v498_v36 = vmul.f32 1.442695, %v494_v34  ;;  %v493_v37 = vpop.xlane.xlu1 %492 }
 0x184   : > { %v497_v38 = vsub.f32 %v478_v24, %v493_v37  ;;  %v490_v39 = vpop.xlane.xlu0 %489 }
 0x185   : > { %884 = vpow2.f32 %v498_v36  ;;  %v496_v40 = vsub.f32 %v473_v26, %v490_v39 }
 0x186   : > { %886 = vpow2.f32 %v500_v35  ;;  %v504_v41 = vmul.f32 1.442695, %v497_v38 }
 0x187   : > { %v502_v42 = vmul.f32 1.442695, %v496_v40 }
 0x189   : > { %888 = vpow2.f32 %v502_v42 }
 0x18a   : > { %890 = vpow2.f32 %v504_v41 }
 0x18f   : > { %v885_v43 = vpop.eup %884 }
 0x190   : > { %v506_v44 = vsel %vm481_vm2, %v885_v43, 0.0  ;;  %v887_v45 = vpop.eup %886 }
 0x191   : > { %507 = vadd.xlane.f32.xlu0 %v506_v44  ;;  %v509_v47 = vsel %vm481_vm2, %v887_v45, 0.0 }
 0x193   : > { %v889_v46 = vpop.eup %888 }
 0x194   : > { %v512_v48 = vsel %vm481_vm2, %v889_v46, 0.0  ;;  %v891_v49 = vpop.eup %890 }
 0x195   : > { %510 = vadd.xlane.f32.xlu0 %v509_v47  ;;  %513 = vadd.xlane.f32.xlu1 %v512_v48  ;;  %v515_v50 = vsel %vm481_vm2, %v891_v49, 0.0 }
 0x199   : > { %516 = vadd.xlane.f32.xlu1 %v515_v50 }
 0x21e   : > { %v508_v57 = vpop.xlane.xlu0 %507 }
 0x21f   : > { %892 = vrcp.f32 %v508_v57 }
 0x222   : > { %v514_v58 = vpop.xlane.xlu1 %513  ;;  %v511_v59 = vpop.xlane.xlu0 %510 }
 0x223   : > { %894 = vrcp.f32 %v514_v58 }
 0x224   : > { %896 = vrcp.f32 %v511_v59 }
 0x226   : > { %v517_v60 = vpop.xlane.xlu1 %516 }
 0x227   : > { %898 = vrcp.f32 %v517_v60 }
 0x229   : > { %v893_v61 = vpop.eup %892 }
 0x22a   : > { %v522_v62 = vmul.f32 %v893_v61, %v885_v43 }
 0x22c   : > { %846 = vmatprep.mubr.msk.f32.mxu0 %vm481_vm2, %v522_v62 }
 0x22d   : > { %v895_v63 = vpop.eup %894 }
 0x22e   : > { %v897_v0 = vpop.eup %896  ;;  %v524_v1 = vmul.f32 %v895_v63, %v889_v46 }
 0x22f   : > { %v523_v2 = vmul.f32 %v897_v0, %v887_v45 }
 0x230   : > { %853 = vmatprep.mubr.msk.f32.mxu1 %vm481_vm2, %v524_v1 }
 0x231   : > { %v899_v3 = vpop.eup %898  ;;  %847 = vmatmul.mubr.msk.f32.vlgmr.msra.gmra.mrb[2].mxu0 %vm481_vm2, %v523_v2 }
 0x232   : > { %v525_v4 = vmul.f32 %v899_v3, %v891_v49 }
 0x234   : > { %854 = vmatmul.mubr.msk.f32.vlgmr.msra.gmra.mrb[2].mxu1 %vm481_vm2, %v525_v4 }
 0x304   : > { %v848_v5 = vpop.f32.mrb[2].mxu0 }
 0x305   : > { %689 = vst.msk [vmem:[%s278_s19 + $0x8] sm:$0xff] %vm306_vm0, %v848_v5  ;;  %v598_v6 = vpop.f32.mrb[3].mxu0 }
 0x306   : > { %688 = vst.msk [vmem:[%s278_s19] sm:$0xff] %vm306_vm0, %v598_v6 }
 0x307   : > { %v855_v7 = vpop.f32.mrb[2].mxu1 }
 0x308   : > { %691 = vst.msk [vmem:[%s278_s19 + $0x18] sm:$0xff] %vm306_vm0, %v855_v7  ;;  %v679_v8 = vpop.f32.mrb[3].mxu1 }
 0x309   : > { %690 = vst.msk [vmem:[%s278_s19 + $0x10] sm:$0xff] %vm306_vm0, %v679_v8 }
 0x30a PF: > { %s15_s18 = sadd.s32 1, %s906_s18  }
 0x30b   : > { %p12_p4 = scmp.ge.s32.totalorder %s15_s18, 4  }
 0x30d   :  { %14 = sbr.rel (!%p12_p4) target bundleno = 1 (0x1), region = 79 }

// kernel: neuro_t5_forward.35
= control target key start
LH: loop header
LB: loop body
LE: loop exit
PB: predicated region body
PF: predicated region fallthrough
CT: control target
= control target key end

     0   :  { %s829_s0 = inlined_call_operand.vmem [shape: f32[32,128], index: 0, kind: input, shape index: {}]   ;;  %s830_s2 = inlined_call_operand.vmem [shape: f32[128,256], index: 2, kind: input, shape index: {}]   ;;  %s831_s3 = inlined_call_operand.vmem [shape: f32[128,256], index: 3, kind: input, shape index: {}]   ;;  %s832_s1 = inlined_call_operand.vmem [shape: f32[1,128], index: 1, kind: input, shape index: {}]   ;;  %s833_s4 = inlined_call_operand.vmem [shape: f32[32,256], index: 4, kind: output, shape index: {}]  }
   0x1   :  { %v514_v0 = vld [vmem:[%s829_s0] sm:$0xff]  ;;  %v519_v1 = vld [vmem:[%s829_s0 + $0x8] sm:$0xff]  ;;  %v524_v2 = vld [vmem:[%s829_s0 + $0x10] sm:$0xff] }
   0x2   :  { %v21_v3 = vmul.f32 %v514_v0, %v514_v0  ;;  %v23_v4 = vmul.f32 %v524_v2, %v524_v2  ;;  %v533_v5 = vld [vmem:[%s829_s0 + $0x18] sm:$0xff]  ;;  %v62_v6 = vld [vmem:[%s830_s2 + $0x8] sm:$0xff]  ;;  %v61_v11 = vld [vmem:[%s830_s2] sm:$0xff]  ;;  %v22_v12 = vmul.f32 %v519_v1, %v519_v1 }
   0x3   :  { %v64_v7 = vld [vmem:[%s830_s2 + $0x18] sm:$0xff]  ;;  %v183_v9 = vld [vmem:[%s831_s3 + $0x8] sm:$0xff]  ;;  %v24_v13 = vmul.f32 %v533_v5, %v533_v5  ;;  %v63_v15 = vld [vmem:[%s830_s2 + $0x10] sm:$0xff] }
   0x4   :  { %v396_v8 = vpack.c.bf16 %v64_v7, %v62_v6  ;;  %v185_v10 = vld [vmem:[%s831_s3 + $0x18] sm:$0xff]  ;;  %25 = vadd.xlane.f32.xlu0 %v21_v3  ;;  %29 = vadd.xlane.f32.xlu1 %v23_v4  ;;  %v182_v16 = vld [vmem:[%s831_s3] sm:$0xff]  ;;  %v184_v17 = vld [vmem:[%s831_s3 + $0x10] sm:$0xff]  ;;  %v398_v18 = vpack.c.bf16 %v63_v15, %v61_v11 }
   0x5   :  { %v428_v14 = vpack.c.bf16 %v185_v10, %v183_v9  ;;  %v430_v19 = vpack.c.bf16 %v184_v17, %v182_v16  ;;  %v66_v20 = vld [vmem:[%s830_s2 + $0x28] sm:$0xff]  ;;  %v68_v21 = vld [vmem:[%s830_s2 + $0x38] sm:$0xff]  ;;  %v65_v25 = vld [vmem:[%s830_s2 + $0x20] sm:$0xff] }
   0x6   :  { %397 = vmatprep.subr.bf16.mxu0 %v396_v8  ;;  %v187_v22 = vld [vmem:[%s831_s3 + $0x28] sm:$0xff]  ;;  %v400_v23 = vpack.c.bf16 %v68_v21, %v66_v20  ;;  %v189_v24 = vld [vmem:[%s831_s3 + $0x38] sm:$0xff]  ;;  %v67_v26 = vld [vmem:[%s830_s2 + $0x30] sm:$0xff] }
   0x7   :  { %429 = vmatprep.subr.bf16.mxu1 %v428_v14  ;;  %399 = vmatpush1.bf16.msra.mxu0 %v398_v18  ;;  %v432_v27 = vpack.c.bf16 %v189_v24, %v187_v22  ;;  %v402_v28 = vpack.c.bf16 %v67_v26, %v65_v25  ;;  %v186_v29 = vld [vmem:[%s831_s3 + $0x20] sm:$0xff]  ;;  %v188_v30 = vld [vmem:[%s831_s3 + $0x30] sm:$0xff]  ;;  %v70_v31 = vld [vmem:[%s830_s2 + $0x48] sm:$0xff] }
   0x8   :  { %431 = vmatpush1.bf16.msra.mxu1 %v430_v19  ;;  %27 = vadd.xlane.f32.xlu0 %v22_v12  ;;  %v434_v32 = vpack.c.bf16 %v188_v30, %v186_v29  ;;  %v72_v33 = vld [vmem:[%s830_s2 + $0x58] sm:$0xff]  ;;  %v191_v34 = vld [vmem:[%s831_s3 + $0x48] sm:$0xff]  ;;  %v69_v38 = vld [vmem:[%s830_s2 + $0x40] sm:$0xff] }
   0x9   :  { %31 = vadd.xlane.f32.xlu1 %v24_v13  ;;  %v193_v35 = vld [vmem:[%s831_s3 + $0x58] sm:$0xff]  ;;  %401 = vmatprep.subr.bf16.mxu0 %v400_v23  ;;  %v404_v36 = vpack.c.bf16 %v72_v33, %v70_v31  ;;  %v71_v39 = vld [vmem:[%s830_s2 + $0x50] sm:$0xff]  ;;  %v190_v40 = vld [vmem:[%s831_s3 + $0x40] sm:$0xff] }
   0xa   :  { %433 = vmatprep.subr.bf16.mxu1 %v432_v27  ;;  %v436_v37 = vpack.c.bf16 %v193_v35, %v191_v34  ;;  %v192_v41 = vld [vmem:[%s831_s3 + $0x50] sm:$0xff]  ;;  %v74_v42 = vld [vmem:[%s830_s2 + $0x68] sm:$0xff]  ;;  %v76_v43 = vld [vmem:[%s830_s2 + $0x78] sm:$0xff]  ;;  %v406_v44 = vpack.c.bf16 %v71_v39, %v69_v38 }
   0xb   :  { %403 = vmatpush1.bf16.msra.mxu0 %v402_v28  ;;  %v438_v45 = vpack.c.bf16 %v192_v41, %v190_v40  ;;  %v195_v46 = vld [vmem:[%s831_s3 + $0x68] sm:$0xff]  ;;  %v197_v47 = vld [vmem:[%s831_s3 + $0x78] sm:$0xff]  ;;  %v408_v48 = vpack.c.bf16 %v76_v43, %v74_v42  ;;  %v73_v50 = vld [vmem:[%s830_s2 + $0x60] sm:$0xff] }
   0xc   :  { %435 = vmatpush1.bf16.msra.mxu1 %v434_v32  ;;  %405 = vmatprep.subr.bf16.mxu0 %v404_v36  ;;  %v440_v49 = vpack.c.bf16 %v197_v47, %v195_v46  ;;  %v75_v51 = vld [vmem:[%s830_s2 + $0x70] sm:$0xff]  ;;  %v194_v52 = vld [vmem:[%s831_s3 + $0x60] sm:$0xff]  ;;  %v78_v56 = vld [vmem:[%s830_s2 + $0x88] sm:$0xff]  ;;  %v485_v32 = vmov 0.0  }
   0xd   :  { %437 = vmatprep.subr.bf16.mxu1 %v436_v37  ;;  %v410_v53 = vpack.c.bf16 %v75_v51, %v73_v50  ;;  %v196_v54 = vld [vmem:[%s831_s3 + $0x70] sm:$0xff]  ;;  %v80_v57 = vld [vmem:[%s830_s2 + $0x98] sm:$0xff]  ;;  %v199_v58 = vld [vmem:[%s831_s3 + $0x88] sm:$0xff]  ;;  %157 = vmatprep.mubr.f32.mxu0 %v485_v32 }
   0xe   :  { %v442_v55 = vpack.c.bf16 %v196_v54, %v194_v52  ;;  %v412_v59 = vpack.c.bf16 %v80_v57, %v78_v56  ;;  %v201_v60 = vld [vmem:[%s831_s3 + $0x98] sm:$0xff]  ;;  %v77_v61 = vld [vmem:[%s830_s2 + $0x80] sm:$0xff]  ;;  %v79_v62 = vld [vmem:[%s830_s2 + $0x90] sm:$0xff]  ;;  %278 = vmatprep.mubr.f32.mxu1 %v485_v32 }
   0xf   :  { %407 = vmatpush1.bf16.msra.mxu0 %v406_v44  ;;  %v444_v63 = vpack.c.bf16 %v201_v60, %v199_v58  ;;  %v414_v3 = vpack.c.bf16 %v79_v62, %v77_v61  ;;  %v198_v4 = vld [vmem:[%s831_s3 + $0x80] sm:$0xff]  ;;  %v200_v6 = vld [vmem:[%s831_s3 + $0x90] sm:$0xff]  ;;  %v82_v8 = vld [vmem:[%s830_s2 + $0xa8] sm:$0xff] }
  0x10   :  { %439 = vmatpush1.bf16.msra.mxu1 %v438_v45  ;;  %409 = vmatprep.subr.bf16.mxu0 %v408_v48  ;;  %v446_v7 = vpack.c.bf16 %v200_v6, %v198_v4  ;;  %v84_v9 = vld [vmem:[%s830_s2 + $0xb8] sm:$0xff]  ;;  %v203_v10 = vld [vmem:[%s831_s3 + $0xa8] sm:$0xff]  ;;  %v81_v13 = vld [vmem:[%s830_s2 + $0xa0] sm:$0xff] }
  0x11   :  { %441 = vmatprep.subr.bf16.mxu1 %v440_v49  ;;  %v416_v11 = vpack.c.bf16 %v84_v9, %v82_v8  ;;  %v205_v12 = vld [vmem:[%s831_s3 + $0xb8] sm:$0xff]  ;;  %v83_v14 = vld [vmem:[%s830_s2 + $0xb0] sm:$0xff]  ;;  %v202_v17 = vld [vmem:[%s831_s3 + $0xa0] sm:$0xff] }
  0x12   :  { %v448_v15 = vpack.c.bf16 %v205_v12, %v203_v10  ;;  %v418_v16 = vpack.c.bf16 %v83_v14, %v81_v13  ;;  %v204_v18 = vld [vmem:[%s831_s3 + $0xb0] sm:$0xff]  ;;  %v86_v20 = vld [vmem:[%s830_s2 + $0xc8] sm:$0xff]  ;;  %v88_v21 = vld [vmem:[%s830_s2 + $0xd8] sm:$0xff] }
  0x13   :  { %411 = vmatpush1.bf16.msra.mxu0 %v410_v53  ;;  %v450_v19 = vpack.c.bf16 %v204_v18, %v202_v17  ;;  %v207_v22 = vld [vmem:[%s831_s3 + $0xc8] sm:$0xff]  ;;  %v420_v23 = vpack.c.bf16 %v88_v21, %v86_v20  ;;  %v209_v24 = vld [vmem:[%s831_s3 + $0xd8] sm:$0xff]  ;;  %v85_v25 = vld [vmem:[%s830_s2 + $0xc0] sm:$0xff] }
  0x14   :  { %443 = vmatpush1.bf16.msra.mxu1 %v442_v55  ;;  %413 = vmatprep.subr.bf16.mxu0 %v412_v59  ;;  %v87_v26 = vld [vmem:[%s830_s2 + $0xd0] sm:$0xff]  ;;  %v452_v27 = vpack.c.bf16 %v209_v24, %v207_v22  ;;  %v206_v29 = vld [vmem:[%s831_s3 + $0xc0] sm:$0xff]  ;;  %v90_v31 = vld [vmem:[%s830_s2 + $0xe8] sm:$0xff] }
  0x15   :  { %445 = vmatprep.subr.bf16.mxu1 %v444_v63  ;;  %v422_v28 = vpack.c.bf16 %v87_v26, %v85_v25  ;;  %v208_v30 = vld [vmem:[%s831_s3 + $0xd0] sm:$0xff]  ;;  %v92_v34 = vld [vmem:[%s830_s2 + $0xf8] sm:$0xff]  ;;  %v211_v35 = vld [vmem:[%s831_s3 + $0xe8] sm:$0xff] }
  0x16   :  { %v454_v33 = vpack.c.bf16 %v208_v30, %v206_v29  ;;  %v213_v36 = vld [vmem:[%s831_s3 + $0xf8] sm:$0xff]  ;;  %v424_v37 = vpack.c.bf16 %v92_v34, %v90_v31  ;;  %v89_v39 = vld [vmem:[%s830_s2 + $0xe0] sm:$0xff]  ;;  %v91_v40 = vld [vmem:[%s830_s2 + $0xf0] sm:$0xff] }
  0x17   :  { %415 = vmatpush1.bf16.msra.mxu0 %v414_v3  ;;  %v456_v38 = vpack.c.bf16 %v213_v36, %v211_v35  ;;  %v210_v41 = vld [vmem:[%s831_s3 + $0xe0] sm:$0xff]  ;;  %v426_v42 = vpack.c.bf16 %v91_v40, %v89_v39  ;;  %v212_v43 = vld [vmem:[%s831_s3 + $0xf0] sm:$0xff] }
  0x18   :  { %447 = vmatpush1.bf16.msra.mxu1 %v446_v7  ;;  %417 = vmatprep.subr.bf16.mxu0 %v416_v11  ;;  %v458_v44 = vpack.c.bf16 %v212_v43, %v210_v41  ;;  %v395_v58 = vld [vmem:[%s832_s1] ss:$0 sm:$0xff] }
  0x19   :  { %449 = vmatprep.subr.bf16.mxu1 %v448_v15 }
  0x1b   :  { %419 = vmatpush1.bf16.msra.mxu0 %v418_v16 }
  0x1c   :  { %451 = vmatpush1.bf16.msra.mxu1 %v450_v19  ;;  %421 = vmatprep.subr.bf16.mxu0 %v420_v23 }
  0x1d   :  { %453 = vmatprep.subr.bf16.mxu1 %v452_v27 }
  0x1f   :  { %423 = vmatpush1.bf16.msra.mxu0 %v422_v28 }
  0x20   :  { %455 = vmatpush1.bf16.msra.mxu1 %v454_v33  ;;  %425 = vmatprep.subr.bf16.mxu0 %v424_v37 }
  0x21   :  { %457 = vmatprep.subr.bf16.mxu1 %v456_v38 }
  0x23   :  { %427 = vmatpush1.bf16.msra.mxu0 %v426_v42 }
  0x24   :  { %459 = vmatpush1.bf16.msra.mxu1 %v458_v44 }
  0x91   :  { %v26_v45 = vpop.xlane.xlu0 %25  ;;  %v30_v46 = vpop.xlane.xlu1 %29 }
  0x92   :  { %v34_v47 = vmul.f32 0.0078125, %v26_v45  ;;  %v36_v48 = vmul.f32 0.0078125, %v30_v46 }
  0x94   :  { %v38_v49 = vadd.f32 1e-06, %v34_v47  ;;  %v40_v50 = vadd.f32 1e-06, %v36_v48 }
  0x95   :  { %v28_v51 = vpop.xlane.xlu0 %27 }
  0x96   :  { %v32_v52 = vpop.xlane.xlu1 %31  ;;  %461 = vrsqrt.f32 %v38_v49  ;;  %v35_v53 = vmul.f32 0.0078125, %v28_v51 }
  0x97   :  { %v37_v54 = vmul.f32 0.0078125, %v32_v52  ;;  %463 = vrsqrt.f32 %v40_v50 }
  0x98   :  { %v39_v55 = vadd.f32 1e-06, %v35_v53 }
  0x99   :  { %v41_v56 = vadd.f32 1e-06, %v37_v54 }
  0x9a   :  { %465 = vrsqrt.f32 %v39_v55 }
  0x9b   :  { %467 = vrsqrt.f32 %v41_v56 }
  0xa0   :  { %v462_v57 = vpop.eup %461 }
  0xa1   :  { %v46_v59 = vmul.f32 %v462_v57, %v514_v0  ;;  %v464_v60 = vpop.eup %463 }
  0xa2   :  { %v48_v3 = vmul.f32 %v464_v60, %v524_v2 }
  0xa3   :  { %v57_v61 = vmul.f32 %v395_v58, %v46_v59 }
  0xa4   :  { %v466_v62 = vpop.eup %465  ;;  %v59_v7 = vmul.f32 %v395_v58, %v48_v3 }
  0xa5   :  { %158 = vmatmul.mubr.f32.vlgmr.msra.gmra.mrb[0].mxu0 %v57_v61  ;;  %279 = vmatmul.mubr.f32.vlgmr.msra.gmra.mrb[0].mxu1 %v57_v61  ;;  %v47_v63 = vmul.f32 %v466_v62, %v519_v1  ;;  %v468_v4 = vpop.eup %467 }
  0xa6   :  { %163 = vmatprep.mubr.f32.mxu0 %v485_v32  ;;  %284 = vmatprep.mubr.f32.mxu1 %v485_v32  ;;  %v49_v0 = vmul.f32 %v468_v4, %v533_v5 }
  0xa7   :  { %v58_v6 = vmul.f32 %v395_v58, %v47_v63 }
  0xa8   :  { %v60_v1 = vmul.f32 %v395_v58, %v49_v0 }
  0xa9   :  { %164 = vmatmul.mubr.f32.gmra.mrb[2].mxu0 %v58_v6  ;;  %285 = vmatmul.mubr.f32.gmra.mrb[2].mxu1 %v58_v6 }
  0xaa   :  { %169 = vmatprep.mubr.f32.mxu0 %v485_v32  ;;  %290 = vmatprep.mubr.f32.mxu1 %v485_v32 }
  0xad   :  { %170 = vmatmul.mubr.f32.gmra.mrb[4].mxu0 %v59_v7  ;;  %291 = vmatmul.mubr.f32.gmra.mrb[4].mxu1 %v59_v7 }
  0xae   :  { %175 = vmatprep.mubr.f32.mxu0 %v485_v32  ;;  %296 = vmatprep.mubr.f32.mxu1 %v485_v32 }
  0xb1   :  { %176 = vmatmul.mubr.f32.gmra.mrb[6].mxu0 %v60_v1  ;;  %297 = vmatmul.mubr.f32.gmra.mrb[6].mxu1 %v60_v1 }
 0x178   :  { %v159_v2 = vpop.f32.mrb[0].mxu0  ;;  %v746_v8 = vpop.f32.mrb[0].mxu1 }
 0x179   :  { %v311_v9 = vmul.f32 0.044715, %v159_v2  ;;  %v161_v10 = vpop.f32.mrb[1].mxu0  ;;  %v748_v11 = vpop.f32.mrb[1].mxu1  ;;  %v303_v63 = vmul.f32 0.5, %v159_v2 }
 0x17a   :  { %v312_v5 = vmul.f32 0.044715, %v161_v10  ;;  %v304_v6 = vmul.f32 0.5, %v161_v10 }
 0x17b   :  { %v319_v12 = vmul.f32 %v311_v9, %v159_v2 }
 0x17c   :  { %v320_v13 = vmul.f32 %v312_v5, %v161_v10  ;;  %v750_v14 = vpop.f32.mrb[2].mxu0  ;;  %v752_v15 = vpop.f32.mrb[2].mxu1 }
 0x17d   :  { %v327_v16 = vmul.f32 %v319_v12, %v159_v2  ;;  %v313_v17 = vmul.f32 0.044715, %v750_v14  ;;  %v755_v18 = vpop.f32.mrb[3].mxu0  ;;  %v757_v19 = vpop.f32.mrb[3].mxu1 }
 0x17e   :  { %v328_v20 = vmul.f32 %v320_v13, %v161_v10  ;;  %v314_v21 = vmul.f32 0.044715, %v755_v18  ;;  %v305_v13 = vmul.f32 0.5, %v750_v14 }
 0x17f   :  { %v335_v22 = vadd.f32 %v327_v16, %v159_v2  ;;  %v321_v23 = vmul.f32 %v313_v17, %v750_v14 }
 0x180   :  { %v336_v24 = vadd.f32 %v328_v20, %v161_v10  ;;  %v322_v25 = vmul.f32 %v314_v21, %v755_v18  ;;  %v762_v26 = vpop.f32.mrb[4].mxu0  ;;  %v764_v27 = vpop.f32.mrb[4].mxu1  ;;  %v306_v20 = vmul.f32 0.5, %v755_v18 }
 0x181   :  { %v343_v28 = vmul.f32 0.7978846, %v335_v22  ;;  %v329_v29 = vmul.f32 %v321_v23, %v750_v14  ;;  %v315_v30 = vmul.f32 0.044715, %v762_v26  ;;  %v768_v31 = vpop.f32.mrb[5].mxu0  ;;  %v772_v35 = vpop.f32.mrb[5].mxu1 }
 0x182   :  { %v344_v32 = vmul.f32 0.7978846, %v336_v24  ;;  %v330_v33 = vmul.f32 %v322_v25, %v755_v18  ;;  %v316_v34 = vmul.f32 0.044715, %v768_v31  ;;  %v307_v23 = vmul.f32 0.5, %v762_v26 }
 0x183   :  { %469 = vtanh.f32 %v343_v28  ;;  %v337_v36 = vadd.f32 %v329_v29, %v750_v14  ;;  %v323_v37 = vmul.f32 %v315_v30, %v762_v26  ;;  %v308_v24 = vmul.f32 0.5, %v768_v31 }
 0x184   :  { %471 = vtanh.f32 %v344_v32  ;;  %v338_v38 = vadd.f32 %v330_v33, %v755_v18  ;;  %v324_v39 = vmul.f32 %v316_v34, %v768_v31  ;;  %v778_v40 = vpop.f32.mrb[6].mxu0  ;;  %v780_v41 = vpop.f32.mrb[6].mxu1 }
 0x185   :  { %v345_v42 = vmul.f32 0.7978846, %v337_v36  ;;  %v331_v43 = vmul.f32 %v323_v37, %v762_v26  ;;  %v317_v44 = vmul.f32 0.044715, %v778_v40  ;;  %v179_v45 = vpop.f32.mrb[7].mxu0  ;;  %v785_v49 = vpop.f32.mrb[7].mxu1 }
 0x186   :  { %v346_v46 = vmul.f32 0.7978846, %v338_v38  ;;  %v332_v47 = vmul.f32 %v324_v39, %v768_v31  ;;  %v318_v48 = vmul.f32 0.044715, %v179_v45  ;;  %v309_v32 = vmul.f32 0.5, %v778_v40 }
 0x187   :  { %473 = vtanh.f32 %v345_v42  ;;  %v339_v50 = vadd.f32 %v331_v43, %v762_v26  ;;  %v325_v51 = vmul.f32 %v317_v44, %v778_v40  ;;  %v310_v33 = vmul.f32 0.5, %v179_v45 }
 0x188   :  { %475 = vtanh.f32 %v346_v46  ;;  %v340_v52 = vadd.f32 %v332_v47, %v768_v31  ;;  %v326_v53 = vmul.f32 %v318_v48, %v179_v45 }
 0x189   :  { %v347_v54 = vmul.f32 0.7978846, %v339_v50  ;;  %v333_v55 = vmul.f32 %v325_v51, %v778_v40 }
 0x18a   :  { %v348_v56 = vmul.f32 0.7978846, %v340_v52  ;;  %v334_v57 = vmul.f32 %v326_v53, %v179_v45 }
 0x18b   :  { %477 = vtanh.f32 %v347_v54  ;;  %v341_v58 = vadd.f32 %v333_v55, %v778_v40 }
 0x18c   :  { %479 = vtanh.f32 %v348_v56  ;;  %v342_v59 = vadd.f32 %v334_v57, %v179_v45 }
 0x18d   :  { %v470_v60 = vpop.eup %469  ;;  %v349_v61 = vmul.f32 0.7978846, %v341_v58 }
 0x18e   :  { %v472_v62 = vpop.eup %471  ;;  %v359_v3 = vadd.f32 1.0, %v470_v60  ;;  %v350_v4 = vmul.f32 0.7978846, %v342_v59 }
 0x18f   :  { %v360_v7 = vadd.f32 1.0, %v472_v62  ;;  %481 = vtanh.f32 %v349_v61 }
 0x190   :  { %v367_v0 = vmul.f32 %v359_v3, %v303_v63  ;;  %483 = vtanh.f32 %v350_v4 }
 0x191   :  { %v474_v1 = vpop.eup %473  ;;  %v368_v9 = vmul.f32 %v360_v7, %v304_v6 }
 0x192   :  { %v476_v5 = vpop.eup %475  ;;  %v375_v12 = vmul.f32 %v367_v0, %v746_v8  ;;  %v361_v16 = vadd.f32 1.0, %v474_v1 }
 0x193   :  { %v376_v17 = vmul.f32 %v368_v9, %v748_v11  ;;  %v362_v2 = vadd.f32 1.0, %v476_v5 }
 0x194   :  { %383 = vst [vmem:[%s833_s4] sm:$0xff] %v375_v12  ;;  %v369_v10 = vmul.f32 %v361_v16, %v305_v13 }
 0x195   :  { %v478_v21 = vpop.eup %477  ;;  %384 = vst [vmem:[%s833_s4 + $0x8] sm:$0xff] %v376_v17  ;;  %v370_v22 = vmul.f32 %v362_v2, %v306_v20 }
 0x196   :  { %v480_v8 = vpop.eup %479  ;;  %v377_v14 = vmul.f32 %v369_v10, %v752_v15  ;;  %v363_v11 = vadd.f32 1.0, %v478_v21 }
 0x197   :  { %v378_v18 = vmul.f32 %v370_v22, %v757_v19  ;;  %v364_v25 = vadd.f32 1.0, %v480_v8 }
 0x198   :  { %385 = vst [vmem:[%s833_s4 + $0x10] sm:$0xff] %v377_v14  ;;  %v371_v28 = vmul.f32 %v363_v11, %v307_v23 }
 0x199   :  { %v482_v29 = vpop.eup %481  ;;  %386 = vst [vmem:[%s833_s4 + $0x18] sm:$0xff] %v378_v18  ;;  %v372_v30 = vmul.f32 %v364_v25, %v308_v24 }
 0x19a   :  { %v484_v15 = vpop.eup %483  ;;  %v379_v26 = vmul.f32 %v371_v28, %v764_v27  ;;  %v365_v19 = vadd.f32 1.0, %v482_v29 }
 0x19b   :  { %v380_v31 = vmul.f32 %v372_v30, %v772_v35  ;;  %v366_v34 = vadd.f32 1.0, %v484_v15 }
 0x19c   :  { %387 = vst [vmem:[%s833_s4 + $0x20] sm:$0xff] %v379_v26  ;;  %v373_v36 = vmul.f32 %v365_v19, %v309_v32 }
 0x19d   :  { %388 = vst [vmem:[%s833_s4 + $0x28] sm:$0xff] %v380_v31  ;;  %v374_v37 = vmul.f32 %v366_v34, %v310_v33 }
 0x19e   :  { %v381_v38 = vmul.f32 %v373_v36, %v780_v41 }
 0x19f   :  { %v382_v27 = vmul.f32 %v374_v37, %v785_v49 }
 0x1a0   :  { %389 = vst [vmem:[%s833_s4 + $0x30] sm:$0xff] %v381_v38 }
 0x1a1   :  { %390 = vst [vmem:[%s833_s4 + $0x38] sm:$0xff] %v382_v27 }

// kernel: neuro_t5_forward.36
= control target key start
LH: loop header
LB: loop body
LE: loop exit
PB: predicated region body
PF: predicated region fallthrough
CT: control target
= control target key end

     0   :  { %s802_s12 = smov 0   ;;  %s804_s13 = smov 0   ;;  %s917_s0 = inlined_call_operand.vmem [shape: f32[32,256], index: 0, kind: input, shape index: {}]   ;;  %s918_s1 = inlined_call_operand.vmem [shape: f32[256,128], index: 1, kind: input, shape index: {}]   ;;  %s919_s2 = inlined_call_operand.vmem [shape: f32[32,128], index: 2, kind: input, shape index: {}]   ;;  %s920_s3 = inlined_call_operand.vmem [shape: f32[32,128], index: 3, kind: output, shape index: {}]  }
   0x1   :  { %s806_s14 = smov 0   ;;  %s808_s15 = smov 0  }
   0x2   :  { %s810_s16 = smov 0  }
   0x3 LB: > { %s25_s17 = sadd.s32 1, %s775_s15  ;;  %p48_p1 = scmp.ne.s32.totalorder %s767_s13, %s763_s12  ;;  %s779_s16 = sphi %s810_s16, %s13_s16   ;;  %s775_s15 = sphi %s808_s15, %s924_s15   ;;  %s771_s14 = sphi %s806_s14, %s923_s14   ;;  %s767_s13 = sphi %s804_s13, %s922_s13   ;;  %s763_s12 = sphi %s802_s12, %s921_s12  }
   0x4   : > { %p26_p0 = scmp.ge.s32.totalorder %s25_s17, 2  ;;  %p49_p2 = scmp.eq.s32.totalorder %s779_s16, 0 }
   0x5   : > { %s41_s19 = sadd.s32 1, %s767_s13  ;;  %p581_p5 = scmp.ge.s32.totalorder %s779_s16, 2 }
   0x6   : > { %s926_s17 = smov (%p26_p0, %s25_s17), 0  ;;  %p50_p3 = por %p49_p2, %p48_p1 }
   0x7   : > { %s37_s18 = ssub.s32 %s775_s15, %s926_s17  ;;  %170 = sbr.rel (%p581_p5) target bundleno = 21 (0x15), region = 20 }
   0x8   : > { %p39_p4 = scmp.eq.s32.totalorder %s37_s18, 0 }
   0xa   : > { %s837_s20 = scalar_select %p39_p4, %s767_s13, %s41_s19  }
   0xe   : > { %173 = sbr.rel (!%p50_p3) target bundleno = 21 (0x15), region = 24  ;;  %s175_s21 = sand.u32 (%p50_p3), 1, %s767_s13  }
   0xf   : > { %s583_s22 = sshll.u32 (%p50_p3), %s775_s15, 3  ;;  %s582_s23 = sshll.u32 (%p50_p3), %s175_s21, 5 }
  0x10   : > { %s182_s26 = scalar_lea.vmem (%p50_p3), %s917_s0, %s583_s22  ;;  %s177_s27 = scalar_lea.vmem (%p50_p3), [#allocation3], %s582_s23 }
  0x11   : > { %v216_v0 = vld [vmem:[%s182_s26] sm:$0xff] (%p50_p3)  ;;  %v218_v1 = vld [vmem:[%s182_s26 + $0x10] sm:$0xff] (%p50_p3) }
  0x12   : > { %v220_v2 = vld [vmem:[%s182_s26 + $0x20] sm:$0xff] (%p50_p3)  ;;  %217 = vst [vmem:[%s177_s27] sm:$0xff] (%p50_p3), %v216_v0  ;;  %219 = vst [vmem:[%s177_s27 + $0x8] sm:$0xff] (%p50_p3), %v218_v1  ;;  %v222_v3 = vld [vmem:[%s182_s26 + $0x30] sm:$0xff] (%p50_p3) }
  0x13   : > { %221 = vst [vmem:[%s177_s27 + $0x10] sm:$0xff] (%p50_p3), %v220_v2  ;;  %223 = vst [vmem:[%s177_s27 + $0x18] sm:$0xff] (%p50_p3), %v222_v3 }
  0x15 PF: > { %p584_p6 = scmp.ge.s32.totalorder %s779_s16, 1  ;;  %p240_p7 = scmp.lt.s32.totalorder %s779_s16, 3 }
  0x17   : > { %p241_p8 = pnand %p584_p6, %p240_p7 }
  0x18   : > { %s247_s28 = sand.u32 (!%p241_p8), 1, %s763_s12   ;;  %s586_s29 = sshll.u32 (!%p241_p8), %s771_s14, 4 }
  0x19   : > { %244 = sbr.rel (%p241_p8) target bundleno = 300 (0x12c), region = 66  ;;  %s585_s30 = sshll.u32 (!%p241_p8), %s247_s28, 5 }
  0x1a   : > { %p291_p9 = scmp.lt.s32.totalorder (!%p241_p8), %s586_s29, 31  ;;  %s854_s8 = scalar_lea.vmem (!%p241_p8), [#allocation3], %s585_s30 }
  0x1b   : > { %p588_p10 = scmp.ne.s32.totalorder (!%p241_p8), %s771_s14, 0 }
  0x20   : > { %s928_s29 = smov (!%p291_p9, %s586_s29), 31  ;;  %320 = sbr.rel (%p588_p10) target bundleno = 39 (0x27), region = 74 }
  0x21   : > { %s587_s4 = sshll.u32 %s928_s29, 3  ;;  %v781_v4 = vmov (!%p588_p10), 0.0  }
  0x22   : > { %s852_s7 = scalar_lea.vmem %s918_s1, %s587_s4  ;;  %321 = vst [vmem:[#allocation2] sm:$0xff] (!%p588_p10), %v781_v4  ;;  %322 = vst [vmem:[#allocation2 + $0x8] sm:$0xff] (!%p588_p10), %v781_v4 }
  0x23   : > { %323 = vst [vmem:[#allocation2 + $0x10] sm:$0xff] (!%p588_p10), %v781_v4  ;;  %324 = vst [vmem:[#allocation2 + $0x18] sm:$0xff] (!%p588_p10), %v781_v4 }
  0x27 PF: > { %v333_v5 = vld [vmem:[%s852_s7] sm:$0xff]  ;;  %v334_v6 = vld [vmem:[%s852_s7 + $0x8] sm:$0xff]  ;;  %v335_v7 = vld [vmem:[%s852_s7 + $0x10] sm:$0xff]  ;;  %p589_p11 = scmp.ne.s32.totalorder %s771_s14, 1 }
  0x28   : > { %v652_v8 = vpack.c.bf16 %v334_v6, %v333_v5  ;;  %v336_v9 = vld [vmem:[%s852_s7 + $0x18] sm:$0xff]  ;;  %v337_v11 = vld [vmem:[%s852_s7 + $0x20] sm:$0xff]  ;;  %v338_v12 = vld [vmem:[%s852_s7 + $0x28] sm:$0xff] }
  0x29   : > { %v656_v10 = vpack.c.bf16 %v336_v9, %v335_v7  ;;  %v660_v13 = vpack.c.bf16 %v338_v12, %v337_v11  ;;  %v329_v14 = vld [vmem:[%s854_s8] sm:$0xff]  ;;  %v331_v15 = vld [vmem:[%s854_s8 + $0x10] sm:$0xff]  ;;  %v340_v17 = vld [vmem:[%s852_s7 + $0x38] sm:$0xff] }
  0x2a   : > { %653 = vmatprep.subr.bf16.mxu0 %v652_v8  ;;  %684 = vmatprep.subr.bf16.mxu1 %v652_v8  ;;  %v339_v16 = vld [vmem:[%s852_s7 + $0x30] sm:$0xff]  ;;  %v341_v19 = vld [vmem:[%s852_s7 + $0x40] sm:$0xff]  ;;  %v342_v20 = vld [vmem:[%s852_s7 + $0x48] sm:$0xff] }
  0x2b   : > { %655 = vmatpush3.bf16.msra.mxu0 %v652_v8  ;;  %692 = vmatpush3.bf16.msra.mxu1 %v652_v8  ;;  %v664_v18 = vpack.c.bf16 %v340_v17, %v339_v16  ;;  %v668_v21 = vpack.c.bf16 %v342_v20, %v341_v19  ;;  %v343_v22 = vld [vmem:[%s852_s7 + $0x50] sm:$0xff]  ;;  %v344_v23 = vld [vmem:[%s852_s7 + $0x58] sm:$0xff]  ;;  %v345_v25 = vld [vmem:[%s852_s7 + $0x60] sm:$0xff] }
  0x2c   : > { %657 = vmatprep.subr.bf16.mxu0 %v656_v10  ;;  %685 = vmatprep.subr.bf16.mxu1 %v656_v10  ;;  %v672_v24 = vpack.c.bf16 %v344_v23, %v343_v22  ;;  %v346_v26 = vld [vmem:[%s852_s7 + $0x68] sm:$0xff]  ;;  %v347_v28 = vld [vmem:[%s852_s7 + $0x70] sm:$0xff]  ;;  %v348_v29 = vld [vmem:[%s852_s7 + $0x78] sm:$0xff] }
  0x2d   : > { %646 = vmatprep.mubr.f32.mxu0 %v329_v14  ;;  %649 = vmatprep.mubr.f32.mxu1 %v331_v15  ;;  %v676_v27 = vpack.c.bf16 %v346_v26, %v345_v25  ;;  %v680_v30 = vpack.c.bf16 %v348_v29, %v347_v28  ;;  %v330_v31 = vld [vmem:[%s854_s8 + $0x8] sm:$0xff]  ;;  %v332_v32 = vld [vmem:[%s854_s8 + $0x18] sm:$0xff]  ;;  %v325_v35 = vld [vmem:[#allocation2] sm:$0xff] }
  0x2e   : > { %v326_v33 = vld [vmem:[#allocation2 + $0x8] sm:$0xff]  ;;  %v328_v34 = vld [vmem:[#allocation2 + $0x18] sm:$0xff]  ;;  %v327_v36 = vld [vmem:[#allocation2 + $0x10] sm:$0xff] }
  0x2f   : > { %659 = vmatpush3.bf16.msra.mxu0 %v656_v10  ;;  %693 = vmatpush3.bf16.msra.mxu1 %v656_v10  ;;  %v450_v46 = vld [vmem:[%s919_s2] sm:$0xff] (!%p589_p11)  ;;  %v451_v49 = vld [vmem:[%s919_s2 + $0x8] sm:$0xff] (!%p589_p11)  ;;  %v452_v51 = vld [vmem:[%s919_s2 + $0x10] sm:$0xff] (!%p589_p11) }
  0x30   : > { %661 = vmatprep.subr.bf16.mxu0 %v660_v13  ;;  %686 = vmatprep.subr.bf16.mxu1 %v660_v13  ;;  %v453_v55 = vld [vmem:[%s919_s2 + $0x18] sm:$0xff] (!%p589_p11) }
  0x33   : > { %663 = vmatpush3.bf16.msra.mxu0 %v660_v13  ;;  %694 = vmatpush3.bf16.msra.mxu1 %v660_v13 }
  0x34   : > { %665 = vmatprep.subr.bf16.mxu0 %v664_v18  ;;  %687 = vmatprep.subr.bf16.mxu1 %v664_v18 }
  0x37   : > { %667 = vmatpush3.bf16.msra.mxu0 %v664_v18  ;;  %695 = vmatpush3.bf16.msra.mxu1 %v664_v18 }
  0x38   : > { %669 = vmatprep.subr.bf16.mxu0 %v668_v21  ;;  %688 = vmatprep.subr.bf16.mxu1 %v668_v21 }
  0x3b   : > { %671 = vmatpush3.bf16.msra.mxu0 %v668_v21  ;;  %696 = vmatpush3.bf16.msra.mxu1 %v668_v21 }
  0x3c   : > { %673 = vmatprep.subr.bf16.mxu0 %v672_v24  ;;  %689 = vmatprep.subr.bf16.mxu1 %v672_v24 }
  0x3f   : > { %675 = vmatpush3.bf16.msra.mxu0 %v672_v24  ;;  %697 = vmatpush3.bf16.msra.mxu1 %v672_v24 }
  0x40   : > { %677 = vmatprep.subr.bf16.mxu0 %v676_v27  ;;  %690 = vmatprep.subr.bf16.mxu1 %v676_v27 }
  0x43   : > { %679 = vmatpush3.bf16.msra.mxu0 %v676_v27  ;;  %698 = vmatpush3.bf16.msra.mxu1 %v676_v27 }
  0x44   : > { %681 = vmatprep.subr.bf16.mxu0 %v680_v30  ;;  %691 = vmatprep.subr.bf16.mxu1 %v680_v30 }
  0x47   : > { %683 = vmatpush3.bf16.msra.mxu0 %v680_v30  ;;  %699 = vmatpush3.bf16.msra.mxu1 %v680_v30 }
  0x4a   : > { %647 = vmatmul.mubr.f32.vlgmr.msra.gmra.mrb[0].mxu0 %v330_v31  ;;  %650 = vmatmul.mubr.f32.vlgmr.msra.gmra.mrb[0].mxu1 %v332_v32 }
 0x11b   : > { %445 = sbr.rel (%p589_p11) target bundleno = 300 (0x12c), region = 78 }
 0x11d   : > { %v648_v37 = vpop.f32.mrb[0].mxu0  ;;  %v651_v38 = vpop.f32.mrb[0].mxu1 }
 0x11e   : > { %v435_v39 = vadd.f32 %v648_v37, %v326_v33  ;;  %v437_v40 = vadd.f32 %v651_v38, %v328_v34  ;;  %v415_v41 = vpop.f32.mrb[1].mxu0  ;;  %v425_v42 = vpop.f32.mrb[1].mxu1 }
 0x11f   : > { %v434_v43 = vadd.f32 %v415_v41, %v325_v35  ;;  %v436_v44 = vadd.f32 %v425_v42, %v327_v36 }
 0x120   : > { %439 = vst [vmem:[#allocation2 + $0x8] sm:$0xff] %v435_v39  ;;  %441 = vst [vmem:[#allocation2 + $0x18] sm:$0xff] %v437_v40 }
 0x121   : > { %438 = vst [vmem:[#allocation2] sm:$0xff] %v434_v43  ;;  %440 = vst [vmem:[#allocation2 + $0x10] sm:$0xff] %v436_v44 }
 0x127   : > { %v447_v47 = vld [vmem:[#allocation2 + $0x8] sm:$0xff]  ;;  %v449_v54 = vld [vmem:[#allocation2 + $0x18] sm:$0xff] }
 0x128   : > { %v446_v45 = vld [vmem:[#allocation2] sm:$0xff]  ;;  %v448_v50 = vld [vmem:[#allocation2 + $0x10] sm:$0xff]  ;;  %v455_v52 = vadd.f32 %v451_v49, %v447_v47  ;;  %v457_v56 = vadd.f32 %v453_v55, %v449_v54 }
 0x129   : > { %v454_v48 = vadd.f32 %v450_v46, %v446_v45  ;;  %v456_v53 = vadd.f32 %v452_v51, %v448_v50 }
 0x12a   : > { %459 = vst [vmem:[%s920_s3 + $0x8] sm:$0xff] %v455_v52  ;;  %461 = vst [vmem:[%s920_s3 + $0x18] sm:$0xff] %v457_v56 }
 0x12b   : > { %458 = vst [vmem:[%s920_s3] sm:$0xff] %v454_v48  ;;  %460 = vst [vmem:[%s920_s3 + $0x10] sm:$0xff] %v456_v53 }
 0x12c PF: > { %s13_s16 = sadd.s32 1, %s779_s16   ;;  %s921_s12 = smov %s767_s13 }
 0x12d   : > { %p10_p12 = scmp.ge.s32.totalorder %s13_s16, 4   ;;  %s922_s13 = smov %s837_s20 }
 0x12e   : > { %s923_s14 = smov %s775_s15  ;;  %s924_s15 = smov %s926_s17 }
 0x12f   :  { %12 = sbr.rel (!%p10_p12) target bundleno = 3 (0x3), region = 119 }

// kernel: neuro_t5_forward.42
= control target key start
LH: loop header
LB: loop body
LE: loop exit
PB: predicated region body
PF: predicated region fallthrough
CT: control target
= control target key end

     0   :  { %s114_s0 = inlined_call_operand.vmem [shape: f32[32,128], index: 0, kind: input, shape index: {}]   ;;  %s115_s1 = inlined_call_operand.vmem [shape: f32[1,128], index: 1, kind: input, shape index: {}]   ;;  %s116_s2 = inlined_call_operand.vmem [shape: f32[32,128], index: 2, kind: output, shape index: {}]  }
   0x1   :  { %v13_v0 = vld [vmem:[%s114_s0 + $0x10] sm:$0xff]  ;;  %v11_v1 = vld [vmem:[%s114_s0] sm:$0xff]  ;;  %v14_v2 = vld [vmem:[%s114_s0 + $0x18] sm:$0xff] }
   0x2   :  { %v17_v3 = vmul.f32 %v13_v0, %v13_v0  ;;  %v15_v4 = vmul.f32 %v11_v1, %v11_v1  ;;  %v12_v5 = vld [vmem:[%s114_s0 + $0x8] sm:$0xff]  ;;  %v18_v6 = vmul.f32 %v14_v2, %v14_v2  ;;  %v63_v21 = vld [vmem:[%s115_s1] ss:$0 sm:$0xff] }
   0x3   :  { %v16_v7 = vmul.f32 %v12_v5, %v12_v5 }
   0x4   :  { %23 = vadd.xlane.f32.xlu1 %v17_v3  ;;  %19 = vadd.xlane.f32.xlu0 %v15_v4 }
   0x8   :  { %25 = vadd.xlane.f32.xlu1 %v18_v6  ;;  %21 = vadd.xlane.f32.xlu0 %v16_v7 }
  0x91   :  { %v24_v8 = vpop.xlane.xlu1 %23  ;;  %v20_v9 = vpop.xlane.xlu0 %19 }
  0x92   :  { %v30_v10 = vmul.f32 0.0078125, %v24_v8  ;;  %v28_v11 = vmul.f32 0.0078125, %v20_v9 }
  0x94   :  { %v34_v12 = vadd.f32 1e-06, %v30_v10  ;;  %v32_v13 = vadd.f32 1e-06, %v28_v11 }
  0x95   :  { %v26_v14 = vpop.xlane.xlu1 %25  ;;  %v22_v15 = vpop.xlane.xlu0 %21 }
  0x96   :  { %64 = vrsqrt.f32 %v34_v12  ;;  %v31_v16 = vmul.f32 0.0078125, %v26_v14  ;;  %v29_v17 = vmul.f32 0.0078125, %v22_v15 }
  0x97   :  { %66 = vrsqrt.f32 %v32_v13 }
  0x98   :  { %v35_v18 = vadd.f32 1e-06, %v31_v16  ;;  %v33_v19 = vadd.f32 1e-06, %v29_v17 }
  0x9a   :  { %68 = vrsqrt.f32 %v35_v18 }
  0x9b   :  { %70 = vrsqrt.f32 %v33_v19 }
  0xa0   :  { %v65_v20 = vpop.eup %64 }
  0xa1   :  { %v67_v22 = vpop.eup %66  ;;  %v42_v23 = vmul.f32 %v65_v20, %v13_v0 }
  0xa2   :  { %v40_v24 = vmul.f32 %v67_v22, %v11_v1 }
  0xa3   :  { %v53_v25 = vmul.f32 %v63_v21, %v42_v23 }
  0xa4   :  { %v69_v26 = vpop.eup %68  ;;  %v51_v27 = vmul.f32 %v63_v21, %v40_v24 }
  0xa5   :  { %v71_v28 = vpop.eup %70  ;;  %57 = vst [vmem:[%s116_s2 + $0x10] sm:$0xff] %v53_v25  ;;  %v43_v29 = vmul.f32 %v69_v26, %v14_v2 }
  0xa6   :  { %55 = vst [vmem:[%s116_s2] sm:$0xff] %v51_v27  ;;  %v41_v30 = vmul.f32 %v71_v28, %v12_v5 }
  0xa7   :  { %v54_v31 = vmul.f32 %v63_v21, %v43_v29 }
  0xa8   :  { %v52_v32 = vmul.f32 %v63_v21, %v41_v30 }
  0xa9   :  { %58 = vst [vmem:[%s116_s2 + $0x18] sm:$0xff] %v54_v31 }
  0xaa   :  { %56 = vst [vmem:[%s116_s2 + $0x8] sm:$0xff] %v52_v32 }

// kernel: neuro_t5_forward.47
= control target key start
LH: loop header
LB: loop body
LE: loop exit
PB: predicated region body
PF: predicated region fallthrough
CT: control target
= control target key end

     0   :  { %v244_v3 = vmov 0.0   ;;  %s396_s1 = inlined_call_operand.vmem [shape: f32[128,256], index: 1, kind: input, shape index: {}]   ;;  %s397_s0 = inlined_call_operand.vmem [shape: f32[32,128], index: 0, kind: input, shape index: {}]   ;;  %s398_s2 = inlined_call_operand.vmem [shape: f32[32,256], index: 2, kind: output, shape index: {}]  }
   0x1   :  { %v36_v0 = vld [vmem:[%s396_s1 + $0x8] sm:$0xff]  ;;  %v38_v1 = vld [vmem:[%s396_s1 + $0x18] sm:$0xff]  ;;  %v35_v2 = vld [vmem:[%s396_s1] sm:$0xff]  ;;  %131 = vmatprep.mubr.f32.mxu0 %v244_v3  ;;  %143 = vmatprep.mubr.f32.mxu1 %v244_v3 }
   0x2   :  { %v195_v4 = vpack.c.bf16 %v38_v1, %v36_v0  ;;  %v37_v5 = vld [vmem:[%s396_s1 + $0x10] sm:$0xff]  ;;  %v40_v6 = vld [vmem:[%s396_s1 + $0x28] sm:$0xff]  ;;  %v42_v7 = vld [vmem:[%s396_s1 + $0x38] sm:$0xff] }
   0x3   :  { %v197_v8 = vpack.c.bf16 %v37_v5, %v35_v2  ;;  %v199_v9 = vpack.c.bf16 %v42_v7, %v40_v6  ;;  %v39_v10 = vld [vmem:[%s396_s1 + $0x20] sm:$0xff]  ;;  %v41_v11 = vld [vmem:[%s396_s1 + $0x30] sm:$0xff]  ;;  %v44_v12 = vld [vmem:[%s396_s1 + $0x48] sm:$0xff] }
   0x4   :  { %196 = vmatprep.subr.bf16.mxu0 %v195_v4  ;;  %227 = vmatprep.subr.bf16.mxu1 %v195_v4  ;;  %v46_v13 = vld [vmem:[%s396_s1 + $0x58] sm:$0xff]  ;;  %v201_v14 = vpack.c.bf16 %v41_v11, %v39_v10  ;;  %v43_v16 = vld [vmem:[%s396_s1 + $0x40] sm:$0xff]  ;;  %v45_v17 = vld [vmem:[%s396_s1 + $0x50] sm:$0xff] }
   0x5   :  { %198 = vmatpush1.bf16.msra.mxu0 %v197_v8  ;;  %235 = vmatpush1.bf16.msra.mxu1 %v197_v8  ;;  %v203_v15 = vpack.c.bf16 %v46_v13, %v44_v12  ;;  %v48_v18 = vld [vmem:[%s396_s1 + $0x68] sm:$0xff]  ;;  %v50_v19 = vld [vmem:[%s396_s1 + $0x78] sm:$0xff]  ;;  %v205_v20 = vpack.c.bf16 %v45_v17, %v43_v16  ;;  %v47_v22 = vld [vmem:[%s396_s1 + $0x60] sm:$0xff] }
   0x6   :  { %200 = vmatprep.subr.bf16.mxu0 %v199_v9  ;;  %228 = vmatprep.subr.bf16.mxu1 %v199_v9  ;;  %v207_v21 = vpack.c.bf16 %v50_v19, %v48_v18  ;;  %v49_v23 = vld [vmem:[%s396_s1 + $0x70] sm:$0xff]  ;;  %v52_v24 = vld [vmem:[%s396_s1 + $0x88] sm:$0xff]  ;;  %v54_v25 = vld [vmem:[%s396_s1 + $0x98] sm:$0xff] }
   0x7   :  { %v209_v26 = vpack.c.bf16 %v49_v23, %v47_v22  ;;  %v211_v27 = vpack.c.bf16 %v54_v25, %v52_v24  ;;  %v51_v28 = vld [vmem:[%s396_s1 + $0x80] sm:$0xff]  ;;  %v53_v29 = vld [vmem:[%s396_s1 + $0x90] sm:$0xff]  ;;  %v56_v30 = vld [vmem:[%s396_s1 + $0xa8] sm:$0xff] }
   0x8   :  { %v58_v31 = vld [vmem:[%s396_s1 + $0xb8] sm:$0xff]  ;;  %v213_v32 = vpack.c.bf16 %v53_v29, %v51_v28  ;;  %v55_v34 = vld [vmem:[%s396_s1 + $0xa0] sm:$0xff]  ;;  %v57_v35 = vld [vmem:[%s396_s1 + $0xb0] sm:$0xff] }
   0x9   :  { %202 = vmatpush1.bf16.msra.mxu0 %v201_v14  ;;  %236 = vmatpush1.bf16.msra.mxu1 %v201_v14  ;;  %v215_v33 = vpack.c.bf16 %v58_v31, %v56_v30  ;;  %v60_v36 = vld [vmem:[%s396_s1 + $0xc8] sm:$0xff]  ;;  %v62_v37 = vld [vmem:[%s396_s1 + $0xd8] sm:$0xff]  ;;  %v217_v38 = vpack.c.bf16 %v57_v35, %v55_v34  ;;  %v59_v40 = vld [vmem:[%s396_s1 + $0xc0] sm:$0xff] }
   0xa   :  { %204 = vmatprep.subr.bf16.mxu0 %v203_v15  ;;  %229 = vmatprep.subr.bf16.mxu1 %v203_v15  ;;  %v219_v39 = vpack.c.bf16 %v62_v37, %v60_v36  ;;  %v61_v41 = vld [vmem:[%s396_s1 + $0xd0] sm:$0xff]  ;;  %v64_v42 = vld [vmem:[%s396_s1 + $0xe8] sm:$0xff]  ;;  %v66_v43 = vld [vmem:[%s396_s1 + $0xf8] sm:$0xff] }
   0xb   :  { %v221_v44 = vpack.c.bf16 %v61_v41, %v59_v40  ;;  %v223_v45 = vpack.c.bf16 %v66_v43, %v64_v42  ;;  %v63_v46 = vld [vmem:[%s396_s1 + $0xe0] sm:$0xff]  ;;  %v65_v47 = vld [vmem:[%s396_s1 + $0xf0] sm:$0xff]  ;;  %v32_v51 = vld [vmem:[%s397_s0 + $0x8] sm:$0xff] }
   0xc   :  { %v225_v48 = vpack.c.bf16 %v65_v47, %v63_v46  ;;  %v31_v49 = vld [vmem:[%s397_s0] sm:$0xff]  ;;  %v33_v50 = vld [vmem:[%s397_s0 + $0x10] sm:$0xff]  ;;  %v34_v52 = vld [vmem:[%s397_s0 + $0x18] sm:$0xff] }
   0xd   :  { %206 = vmatpush1.bf16.msra.mxu0 %v205_v20  ;;  %237 = vmatpush1.bf16.msra.mxu1 %v205_v20 }
   0xe   :  { %208 = vmatprep.subr.bf16.mxu0 %v207_v21  ;;  %230 = vmatprep.subr.bf16.mxu1 %v207_v21 }
  0x11   :  { %210 = vmatpush1.bf16.msra.mxu0 %v209_v26  ;;  %238 = vmatpush1.bf16.msra.mxu1 %v209_v26 }
  0x12   :  { %212 = vmatprep.subr.bf16.mxu0 %v211_v27  ;;  %231 = vmatprep.subr.bf16.mxu1 %v211_v27 }
  0x15   :  { %214 = vmatpush1.bf16.msra.mxu0 %v213_v32  ;;  %239 = vmatpush1.bf16.msra.mxu1 %v213_v32 }
  0x16   :  { %216 = vmatprep.subr.bf16.mxu0 %v215_v33  ;;  %232 = vmatprep.subr.bf16.mxu1 %v215_v33 }
  0x19   :  { %218 = vmatpush1.bf16.msra.mxu0 %v217_v38  ;;  %240 = vmatpush1.bf16.msra.mxu1 %v217_v38 }
  0x1a   :  { %220 = vmatprep.subr.bf16.mxu0 %v219_v39  ;;  %233 = vmatprep.subr.bf16.mxu1 %v219_v39 }
  0x1d   :  { %222 = vmatpush1.bf16.msra.mxu0 %v221_v44  ;;  %241 = vmatpush1.bf16.msra.mxu1 %v221_v44 }
  0x1e   :  { %224 = vmatprep.subr.bf16.mxu0 %v223_v45  ;;  %234 = vmatprep.subr.bf16.mxu1 %v223_v45 }
  0x21   :  { %226 = vmatpush1.bf16.msra.mxu0 %v225_v48  ;;  %242 = vmatpush1.bf16.msra.mxu1 %v225_v48 }
  0x24   :  { %132 = vmatmul.mubr.f32.vlgmr.msra.gmra.mrb[0].mxu0 %v31_v49  ;;  %144 = vmatmul.mubr.f32.vlgmr.msra.gmra.mrb[0].mxu1 %v33_v50 }
  0x25   :  { %137 = vmatprep.mubr.f32.mxu0 %v244_v3  ;;  %149 = vmatprep.mubr.f32.mxu1 %v244_v3 }
  0x28   :  { %138 = vmatmul.mubr.f32.gmra.mrb[2].mxu0 %v32_v51  ;;  %150 = vmatmul.mubr.f32.gmra.mrb[2].mxu1 %v34_v52 }
  0xf7   :  { %v133_v53 = vpop.f32.mrb[0].mxu0  ;;  %v145_v54 = vpop.f32.mrb[0].mxu1 }
  0xf8   :  { %183 = vst [vmem:[%s398_s2] sm:$0xff] %v133_v53  ;;  %187 = vst [vmem:[%s398_s2 + $0x20] sm:$0xff] %v145_v54  ;;  %v135_v55 = vpop.f32.mrb[1].mxu0  ;;  %v147_v56 = vpop.f32.mrb[1].mxu1 }
  0xf9   :  { %184 = vst [vmem:[%s398_s2 + $0x8] sm:$0xff] %v135_v55  ;;  %188 = vst [vmem:[%s398_s2 + $0x28] sm:$0xff] %v147_v56 }
  0xfb   :  { %v139_v57 = vpop.f32.mrb[2].mxu0  ;;  %v151_v58 = vpop.f32.mrb[2].mxu1 }
  0xfc   :  { %185 = vst [vmem:[%s398_s2 + $0x10] sm:$0xff] %v139_v57  ;;  %189 = vst [vmem:[%s398_s2 + $0x30] sm:$0xff] %v151_v58  ;;  %v141_v59 = vpop.f32.mrb[3].mxu0  ;;  %v153_v60 = vpop.f32.mrb[3].mxu1 }
  0xfd   :  { %186 = vst [vmem:[%s398_s2 + $0x18] sm:$0xff] %v141_v59  ;;  %190 = vst [vmem:[%s398_s2 + $0x38] sm:$0xff] %v153_v60 }

// kernel: neuro_t5_forward.43
= control target key start
LH: loop header
LB: loop body
LE: loop exit
PB: predicated region body
PF: predicated region fallthrough
CT: control target
= control target key end

     0   :  { %s749_s12 = smov 0   ;;  %s751_s13 = smov 0   ;;  %s870_s0 = inlined_call_operand.vmem [shape: f32[16,128], index: 0, kind: input, shape index: {}]   ;;  %s871_s1 = inlined_call_operand.vmem [shape: f32[1,128], index: 1, kind: input, shape index: {}]   ;;  %s872_s2 = inlined_call_operand.vmem [shape: f32[128,384], index: 2, kind: input, shape index: {}]   ;;  %s873_s3 = inlined_call_operand.vmem [shape: f32[16,384], index: 3, kind: output, shape index: {}]  }
   0x1   :  { %s753_s14 = smov 0   ;;  %s755_s15 = smov 0  }
   0x2   :  { %s757_s16 = smov 0  }
   0x3 LB: > { %s22_s17 = sadd.s32 1, %s723_s15  ;;  %s545_s18 = sadd.s32 4294967295, %s727_s16   ;;  %s727_s16 = sphi %s757_s16, %s13_s16   ;;  %s723_s15 = sphi %s755_s15, %s878_s15   ;;  %s719_s14 = sphi %s753_s14, %s877_s14   ;;  %s715_s13 = sphi %s751_s13, %s876_s13   ;;  %s711_s12 = sphi %s749_s12, %s875_s12  }
   0x4   : > { %p23_p0 = scmp.ge.s32.totalorder %s22_s17, 3  ;;  %p86_p1 = scmp.ne.s32.totalorder %s715_s13, %s711_s12 }
   0x5   : > { %p87_p2 = scmp.eq.s32.totalorder %s727_s16, 0  ;;  %p118_p4 = scmp.eq.s32.totalorder %s545_s18, 2 }
   0x6   : > { %s880_s17 = smov (%p23_p0, %s22_s17), 0  ;;  %s79_s20 = sadd.s32 1, %s715_s13 }
   0x7   : > { %p88_p3 = por %p87_p2, %p86_p1  ;;  %s76_s19 = ssub.s32 %s723_s15, %s880_s17 }
   0x8   : > { %p77_p5 = scmp.eq.s32.totalorder %s76_s19, 0  ;;  %p784_p6 = por %p118_p4, %p86_p1 }
   0x9   : > { %p549_p7 = scmp.ge.s32.totalorder %s727_s16, 3 }
   0xa   : > { %s789_s22 = scalar_select %p77_p5, %s715_s13, %s79_s20  }
   0xb   : > { %152 = sbr.rel (%p549_p7) target bundleno = 30 (0x1e), region = 24 }
  0x12   : > { %155 = sbr.rel (!%p88_p3) target bundleno = 30 (0x1e), region = 28  ;;  %s157_s23 = sand.u32 (%p88_p3), 1, %s715_s13  }
  0x13   : > { %s551_s24 = sshll.u32 (%p88_p3), %s723_s15, 3  ;;  %s550_s25 = sshll.u32 (%p88_p3), %s157_s23, 7 }
  0x14   : > { %s797_s28 = scalar_lea.vmem (%p88_p3), %s872_s2, %s551_s24  ;;  %s159_s29 = scalar_lea.vmem (%p88_p3), [#allocation2], %s550_s25 }
  0x15   : > { %v219_v0 = vld [vmem:[%s797_s28] sm:$0xff] (%p88_p3)  ;;  %v221_v1 = vld [vmem:[%s797_s28 + $0x18] sm:$0xff] (%p88_p3)  ;;  %v223_v2 = vld [vmem:[%s797_s28 + $0x30] sm:$0xff] (%p88_p3) }
  0x16   : > { %220 = vst [vmem:[%s159_s29] sm:$0xff] (%p88_p3), %v219_v0  ;;  %222 = vst [vmem:[%s159_s29 + $0x8] sm:$0xff] (%p88_p3), %v221_v1  ;;  %v225_v3 = vld [vmem:[%s797_s28 + $0x48] sm:$0xff] (%p88_p3)  ;;  %v227_v4 = vld [vmem:[%s797_s28 + $0x60] sm:$0xff] (%p88_p3) }
  0x17   : > { %224 = vst [vmem:[%s159_s29 + $0x10] sm:$0xff] (%p88_p3), %v223_v2  ;;  %v229_v5 = vld [vmem:[%s797_s28 + $0x78] sm:$0xff] (%p88_p3)  ;;  %226 = vst [vmem:[%s159_s29 + $0x18] sm:$0xff] (%p88_p3), %v225_v3  ;;  %v231_v6 = vld [vmem:[%s797_s28 + $0x90] sm:$0xff] (%p88_p3) }
  0x18   : > { %228 = vst [vmem:[%s159_s29 + $0x20] sm:$0xff] (%p88_p3), %v227_v4  ;;  %230 = vst [vmem:[%s159_s29 + $0x28] sm:$0xff] (%p88_p3), %v229_v5  ;;  %v233_v7 = vld [vmem:[%s797_s28 + $0xa8] sm:$0xff] (%p88_p3)  ;;  %v235_v8 = vld [vmem:[%s797_s28 + $0xc0] sm:$0xff] (%p88_p3) }
  0x19   : > { %232 = vst [vmem:[%s159_s29 + $0x30] sm:$0xff] %v231_v6  ;;  %234 = vst [vmem:[%s159_s29 + $0x38] sm:$0xff] %v233_v7  ;;  %v237_v9 = vld [vmem:[%s797_s28 + $0xd8] sm:$0xff]  ;;  %v239_v10 = vld [vmem:[%s797_s28 + $0xf0] sm:$0xff] }
  0x1a   : > { %236 = vst [vmem:[%s159_s29 + $0x40] sm:$0xff] %v235_v8  ;;  %v241_v11 = vld [vmem:[%s797_s28 + $0x108] sm:$0xff]  ;;  %238 = vst [vmem:[%s159_s29 + $0x48] sm:$0xff] %v237_v9  ;;  %v243_v12 = vld [vmem:[%s797_s28 + $0x120] sm:$0xff] }
  0x1b   : > { %240 = vst [vmem:[%s159_s29 + $0x50] sm:$0xff] %v239_v10  ;;  %242 = vst [vmem:[%s159_s29 + $0x58] sm:$0xff] %v241_v11  ;;  %v245_v13 = vld [vmem:[%s797_s28 + $0x138] sm:$0xff]  ;;  %v247_v14 = vld [vmem:[%s797_s28 + $0x150] sm:$0xff] }
  0x1c   : > { %244 = vst [vmem:[%s159_s29 + $0x60] sm:$0xff] %v243_v12  ;;  %246 = vst [vmem:[%s159_s29 + $0x68] sm:$0xff] %v245_v13  ;;  %v249_v15 = vld [vmem:[%s797_s28 + $0x168] sm:$0xff] }
  0x1d   : > { %248 = vst [vmem:[%s159_s29 + $0x70] sm:$0xff] %v247_v14  ;;  %250 = vst [vmem:[%s159_s29 + $0x78] sm:$0xff] %v249_v15 }
  0x1e PF: > { %p552_p8 = scmp.ge.s32.totalorder %s727_s16, 1  ;;  %p255_p9 = scmp.lt.s32.totalorder %s727_s16, 4 }
  0x20   : > { %p256_p10 = pnand %p552_p8, %p255_p9 }
  0x21   : > { %v296_v16 = vld [vmem:[%s870_s0] sm:$0xff] (!%p256_p10)  ;;  %v297_v17 = vld [vmem:[%s870_s0 + $0x8] sm:$0xff] (!%p256_p10)  ;;  %s262_s7 = sand.u32 (!%p256_p10), 1, %s711_s12  }
  0x22   : > { %259 = sbr.rel (%p256_p10) target bundleno = 423 (0x1a7), region = 66  ;;  %v298_v18 = vmul.f32 (!%p256_p10), %v296_v16, %v296_v16  ;;  %s553_s8 = sshll.u32 (!%p256_p10), %s262_s7, 7  ;;  %v299_v19 = vmul.f32 (!%p256_p10), %v297_v17, %v297_v17  ;;  %v555_v51 = vld [vmem:[%s871_s1] ss:$0 sm:$0xff] (!%p256_p10) }
  0x23   : > { %s826_s9 = scalar_lea.vmem (!%p256_p10), [#allocation2], %s553_s8  ;;  %s554_s18 = sshll.u32 (!%p256_p10), %s262_s7, 4 }
  0x24   : > { %300 = vadd.xlane.f32.xlu0 (!%p256_p10), %v298_v18  ;;  %v322_v20 = vld [vmem:[%s826_s9] sm:$0xff] (!%p256_p10)  ;;  %v323_v21 = vld [vmem:[%s826_s9 + $0x8] sm:$0xff] (!%p256_p10)  ;;  %v324_v22 = vld [vmem:[%s826_s9 + $0x10] sm:$0xff] (!%p256_p10)  ;;  %s288_s19 = scalar_lea.vmem (!%p256_p10), [#allocation3], %s554_s18 }
  0x25   : > { %v613_v23 = vpack.c.bf16 (!%p256_p10), %v323_v21, %v322_v20  ;;  %v325_v24 = vld [vmem:[%s826_s9 + $0x18] sm:$0xff] (!%p256_p10)  ;;  %v326_v26 = vld [vmem:[%s826_s9 + $0x20] sm:$0xff] (!%p256_p10)  ;;  %v327_v27 = vld [vmem:[%s826_s9 + $0x28] sm:$0xff] (!%p256_p10) }
  0x26   : > { %v617_v25 = vpack.c.bf16 (!%p256_p10), %v325_v24, %v324_v22  ;;  %v621_v28 = vpack.c.bf16 (!%p256_p10), %v327_v27, %v326_v26  ;;  %v328_v29 = vld [vmem:[%s826_s9 + $0x30] sm:$0xff] (!%p256_p10)  ;;  %v329_v30 = vld [vmem:[%s826_s9 + $0x38] sm:$0xff] (!%p256_p10)  ;;  %v330_v32 = vld [vmem:[%s826_s9 + $0x40] sm:$0xff] (!%p256_p10) }
  0x27   : > { %614 = vmatprep.subr.bf16.mxu0 (!%p256_p10), %v613_v23  ;;  %v625_v31 = vpack.c.bf16 (!%p256_p10), %v329_v30, %v328_v29  ;;  %v331_v33 = vld [vmem:[%s826_s9 + $0x48] sm:$0xff] (!%p256_p10)  ;;  %v332_v35 = vld [vmem:[%s826_s9 + $0x50] sm:$0xff] (!%p256_p10)  ;;  %v333_v36 = vld [vmem:[%s826_s9 + $0x58] sm:$0xff] (!%p256_p10) }
  0x28   : > { %302 = vadd.xlane.f32.xlu0 (!%p256_p10), %v299_v19  ;;  %616 = vmatpush3.bf16.msra.mxu0 (!%p256_p10), %v613_v23  ;;  %v629_v34 = vpack.c.bf16 (!%p256_p10), %v331_v33, %v330_v32  ;;  %v334_v37 = vld [vmem:[%s826_s9 + $0x60] sm:$0xff] (!%p256_p10)  ;;  %v633_v38 = vpack.c.bf16 (!%p256_p10), %v333_v36, %v332_v35  ;;  %v335_v39 = vld [vmem:[%s826_s9 + $0x68] sm:$0xff] (!%p256_p10)  ;;  %v336_v41 = vld [vmem:[%s826_s9 + $0x70] sm:$0xff] (!%p256_p10) }
  0x29   : > { %618 = vmatprep.subr.bf16.mxu0 %v617_v25  ;;  %v637_v40 = vpack.c.bf16 %v335_v39, %v334_v37  ;;  %v337_v42 = vld [vmem:[%s826_s9 + $0x78] sm:$0xff]  ;;  %s557_s20 = sshll.u32 (%p784_p6), %s719_s14, 3 }
  0x2a   : > { %v641_v43 = vpack.c.bf16 %v337_v42, %v336_v41  ;;  %s426_s25 = scalar_lea.vmem (%p784_p6), %s873_s3, %s557_s20 }
  0x2c   : > { %620 = vmatpush3.bf16.msra.mxu0 %v617_v25 }
  0x2d   : > { %622 = vmatprep.subr.bf16.mxu0 %v621_v28 }
  0x30   : > { %624 = vmatpush3.bf16.msra.mxu0 %v621_v28 }
  0x31   : > { %626 = vmatprep.subr.bf16.mxu0 %v625_v31 }
  0x34   : > { %628 = vmatpush3.bf16.msra.mxu0 %v625_v31 }
  0x35   : > { %630 = vmatprep.subr.bf16.mxu0 %v629_v34 }
  0x38   : > { %632 = vmatpush3.bf16.msra.mxu0 %v629_v34 }
  0x39   : > { %634 = vmatprep.subr.bf16.mxu0 %v633_v38 }
  0x3c   : > { %636 = vmatpush3.bf16.msra.mxu0 %v633_v38 }
  0x3d   : > { %638 = vmatprep.subr.bf16.mxu0 %v637_v40 }
  0x40   : > { %640 = vmatpush3.bf16.msra.mxu0 %v637_v40 }
  0x41   : > { %642 = vmatprep.subr.bf16.mxu0 %v641_v43 }
  0x44   : > { %644 = vmatpush3.bf16.msra.mxu0 %v641_v43 }
  0xb1   : > { %v301_v44 = vpop.xlane.xlu0 %300 }
  0xb2   : > { %v305_v45 = vmul.f32 0.0078125, %v301_v44 }
  0xb4   : > { %v307_v46 = vadd.f32 1e-06, %v305_v45 }
  0xb5   : > { %v303_v47 = vpop.xlane.xlu0 %302 }
  0xb6   : > { %685 = vrsqrt.f32 %v307_v46  ;;  %v306_v48 = vmul.f32 0.0078125, %v303_v47 }
  0xb8   : > { %v308_v49 = vadd.f32 1e-06, %v306_v48 }
  0xba   : > { %687 = vrsqrt.f32 %v308_v49 }
  0xc0   : > { %v686_v50 = vpop.eup %685 }
  0xc1   : > { %v311_v52 = vmul.f32 %v686_v50, %v296_v16 }
  0xc3   : > { %v320_v53 = vmul.f32 %v555_v51, %v311_v52 }
  0xc4   : > { %v688_v54 = vpop.eup %687 }
  0xc5   : > { %v312_v55 = vmul.f32 %v688_v54, %v297_v17  ;;  %610 = vmatprep.mubr.f32.mxu0 %v320_v53 }
  0xc7   : > { %v321_v56 = vmul.f32 %v555_v51, %v312_v55 }
  0xc9   : > { %611 = vmatmul.mubr.f32.vlgmr.msra.gmra.mrb[0].mxu0 %v321_v56 }
 0x198   : > { %421 = sbr.rel (!%p784_p6) target bundleno = 423 (0x1a7), region = 74 }
 0x19c   : > { %v612_v57 = vpop.f32.mrb[0].mxu0 }
 0x19d   : > { %414 = vst [vmem:[%s288_s19 + $0x8] sm:$0xff] %v612_v57  ;;  %v404_v58 = vpop.f32.mrb[1].mxu0 }
 0x19e   : > { %413 = vst [vmem:[%s288_s19] sm:$0xff] %v404_v58 }
 0x1a4   : > { %v458_v60 = vld [vmem:[%s288_s19 + $0x8] sm:$0xff] }
 0x1a5   : > { %v456_v59 = vld [vmem:[%s288_s19] sm:$0xff]  ;;  %459 = vst [vmem:[%s426_s25 + $0x18] sm:$0xff] %v458_v60 }
 0x1a6   : > { %457 = vst [vmem:[%s426_s25] sm:$0xff] %v456_v59 }
 0x1a7 PF: > { %s13_s16 = sadd.s32 1, %s727_s16   ;;  %s875_s12 = smov %s715_s13 }
 0x1a8   : > { %p10_p11 = scmp.ge.s32.totalorder %s13_s16, 5   ;;  %s876_s13 = smov %s789_s22 }
 0x1a9   : > { %s877_s14 = smov %s723_s15  ;;  %s878_s15 = smov %s880_s17 }
 0x1aa   :  { %12 = sbr.rel (!%p10_p11) target bundleno = 3 (0x3), region = 146 }

// kernel: neuro_t5_forward.45
= control target key start
LH: loop header
LB: loop body
LE: loop exit
PB: predicated region body
PF: predicated region fallthrough
CT: control target
= control target key end

     0   :  { %s305_s1 = inlined_call_operand.vmem [shape: f32[128,128], index: 1, kind: input, shape index: {}]   ;;  %s306_s0 = inlined_call_operand.vmem [shape: f32[16,128], index: 0, kind: input, shape index: {}]   ;;  %s307_s2 = inlined_call_operand.vmem [shape: f32[16,128], index: 2, kind: input, shape index: {}]   ;;  %s308_s3 = inlined_call_operand.vmem [shape: f32[16,128], index: 3, kind: output, shape index: {}]  }
   0x1   :  { %v24_v0 = vld [vmem:[%s305_s1] sm:$0xff]  ;;  %v25_v1 = vld [vmem:[%s305_s1 + $0x8] sm:$0xff]  ;;  %v26_v2 = vld [vmem:[%s305_s1 + $0x10] sm:$0xff] }
   0x2   :  { %v187_v3 = vpack.c.bf16 %v25_v1, %v24_v0  ;;  %v27_v4 = vld [vmem:[%s305_s1 + $0x18] sm:$0xff]  ;;  %v28_v6 = vld [vmem:[%s305_s1 + $0x20] sm:$0xff]  ;;  %v29_v7 = vld [vmem:[%s305_s1 + $0x28] sm:$0xff] }
   0x3   :  { %v191_v5 = vpack.c.bf16 %v27_v4, %v26_v2  ;;  %v195_v8 = vpack.c.bf16 %v29_v7, %v28_v6  ;;  %v22_v9 = vld [vmem:[%s306_s0] sm:$0xff]  ;;  %v30_v10 = vld [vmem:[%s305_s1 + $0x30] sm:$0xff]  ;;  %v31_v11 = vld [vmem:[%s305_s1 + $0x38] sm:$0xff] }
   0x4   :  { %188 = vmatprep.subr.bf16.mxu0 %v187_v3  ;;  %184 = vmatprep.mubr.f32.mxu0 %v22_v9  ;;  %v199_v12 = vpack.c.bf16 %v31_v11, %v30_v10  ;;  %v32_v13 = vld [vmem:[%s305_s1 + $0x40] sm:$0xff]  ;;  %v33_v14 = vld [vmem:[%s305_s1 + $0x48] sm:$0xff]  ;;  %v34_v16 = vld [vmem:[%s305_s1 + $0x50] sm:$0xff] }
   0x5   :  { %190 = vmatpush3.bf16.msra.mxu0 %v187_v3  ;;  %v203_v15 = vpack.c.bf16 %v33_v14, %v32_v13  ;;  %v35_v17 = vld [vmem:[%s305_s1 + $0x58] sm:$0xff]  ;;  %v36_v19 = vld [vmem:[%s305_s1 + $0x60] sm:$0xff]  ;;  %v37_v20 = vld [vmem:[%s305_s1 + $0x68] sm:$0xff] }
   0x6   :  { %192 = vmatprep.subr.bf16.mxu0 %v191_v5  ;;  %v207_v18 = vpack.c.bf16 %v35_v17, %v34_v16  ;;  %v211_v21 = vpack.c.bf16 %v37_v20, %v36_v19  ;;  %v38_v22 = vld [vmem:[%s305_s1 + $0x70] sm:$0xff]  ;;  %v39_v23 = vld [vmem:[%s305_s1 + $0x78] sm:$0xff]  ;;  %v23_v25 = vld [vmem:[%s306_s0 + $0x8] sm:$0xff] }
   0x7   :  { %v215_v24 = vpack.c.bf16 %v39_v23, %v38_v22  ;;  %v125_v26 = vld [vmem:[%s307_s2 + $0x8] sm:$0xff]  ;;  %v124_v27 = vld [vmem:[%s307_s2] sm:$0xff] }
   0x9   :  { %194 = vmatpush3.bf16.msra.mxu0 %v191_v5 }
   0xa   :  { %196 = vmatprep.subr.bf16.mxu0 %v195_v8 }
   0xd   :  { %198 = vmatpush3.bf16.msra.mxu0 %v195_v8 }
   0xe   :  { %200 = vmatprep.subr.bf16.mxu0 %v199_v12 }
  0x11   :  { %202 = vmatpush3.bf16.msra.mxu0 %v199_v12 }
  0x12   :  { %204 = vmatprep.subr.bf16.mxu0 %v203_v15 }
  0x15   :  { %206 = vmatpush3.bf16.msra.mxu0 %v203_v15 }
  0x16   :  { %208 = vmatprep.subr.bf16.mxu0 %v207_v18 }
  0x19   :  { %210 = vmatpush3.bf16.msra.mxu0 %v207_v18 }
  0x1a   :  { %212 = vmatprep.subr.bf16.mxu0 %v211_v21 }
  0x1d   :  { %214 = vmatpush3.bf16.msra.mxu0 %v211_v21 }
  0x1e   :  { %216 = vmatprep.subr.bf16.mxu0 %v215_v24 }
  0x21   :  { %218 = vmatpush3.bf16.msra.mxu0 %v215_v24 }
  0x24   :  { %185 = vmatmul.mubr.f32.vlgmr.msra.gmra.mrb[0].mxu0 %v23_v25 }
  0xf7   :  { %v186_v28 = vpop.f32.mrb[0].mxu0 }
  0xf8   :  { %v127_v29 = vadd.f32 %v186_v28, %v125_v26  ;;  %v106_v30 = vpop.f32.mrb[1].mxu0 }
  0xf9   :  { %v126_v31 = vadd.f32 %v124_v27, %v106_v30 }
  0xfa   :  { %129 = vst [vmem:[%s308_s3 + $0x8] sm:$0xff] %v127_v29 }
  0xfb   :  { %128 = vst [vmem:[%s308_s3] sm:$0xff] %v126_v31 }

// kernel: neuro_t5_forward.44
= control target key start
LH: loop header
LB: loop body
LE: loop exit
PB: predicated region body
PF: predicated region fallthrough
CT: control target
= control target key end

     0   :  { %s820_s18 = smov 0   ;;  %s874_s0 = inlined_call_operand.vmem [shape: f32[2,2,8,64], index: 0, kind: input, shape index: {}]   ;;  %s875_s1 = inlined_call_operand.vmem [shape: f32[2,2,8,64], index: 1, kind: input, shape index: {}]   ;;  %s876_s2 = inlined_call_operand.vmem [shape: f32[2,2,8,64], index: 2, kind: input, shape index: {}]   ;;  %s877_s3 = inlined_call_operand.vmem [shape: f32[1,2,8,8], index: 3, kind: input, shape index: {}]   ;;  %s878_s4 = inlined_call_operand.vmem [shape: f32[2,1,1,8], index: 4, kind: input, shape index: {}]   ;;  %s879_s5 = inlined_call_operand.vmem [shape: f32[2,2,8,64], index: 5, kind: output, shape index: {}]  }
   0x1 LB: > { %s708_s19 = sadd.s32 4294967295, %s786_s18   ;;  %p712_p0 = scmp.ge.s32.totalorder %s786_s18, 1  ;;  %s786_s18 = sphi %s820_s18, %s15_s18  }
   0x2   : > { %p215_p1 = scmp.lt.s32.totalorder %s786_s18, 3 }
   0x4   : > { %p216_p2 = pnand %p712_p0, %p215_p1 }
   0x5   : > { %p256_p3 = scmp.lt.s32.totalorder (!%p216_p2), %s708_s19, 1  ;;  %v788_v0 = vmov (!%p216_p2), 0.0   ;;  %vm789_vm0 = vmmov (!%p216_p2), 0   ;;  %vm296_vm1 = vcmask (!%p216_p2), 523264   ;;  %v285_v5 = vld [vmem:[%s877_s3] sm:$0xff] (!%p216_p2)  ;;  %v286_v7 = vld [vmem:[%s877_s3 + $0x8] sm:$0xff] (!%p216_p2) }
   0x6   : > { %219 = sbr.rel (%p216_p2) target bundleno = 765 (0x2fd), region = 40  ;;  %742 = vmatprep.subr.mxu0 (!%p216_p2), %v788_v0  ;;  %744 = vmatprep.mubr.msk.f32.mxu0 (!%p216_p2), %vm789_vm0, %v788_v0  ;;  %vm449_vm2 = vcmask (!%p216_p2), 64512  }
   0x7   : > { %747 = vmatprep.subr.mxu1 (!%p216_p2), %v788_v0  ;;  %749 = vmatprep.mubr.msk.f32.mxu1 (!%p216_p2), %vm789_vm0, %v788_v0 }
   0xd   : > { %s881_s19 = smov (!%p256_p3, %s708_s19), 1 }
   0xe   : > { %s830_s20 = sshll.u32 %s881_s19, 4  ;;  %s273_s29 = scalar_lea.vmem %s878_s4, %s881_s19 }
   0xf   : > { %s265_s23 = scalar_lea.vmem %s875_s1, %s830_s20  ;;  %s260_s26 = scalar_lea.vmem %s874_s0, %s830_s20  ;;  %v721_v6 = vld [vmem:[%s273_s29] ss:$0 sm:$0xff] }
  0x10   : > { %v281_v1 = vld [vmem:[%s265_s23] sm:$0xff]  ;;  %v282_v2 = vld [vmem:[%s265_s23 + $0x8] sm:$0xff]  ;;  %v294_v8 = vadd.f32 %v721_v6, %v285_v5  ;;  %v295_v9 = vadd.f32 %v721_v6, %v286_v7  ;;  %s270_s11 = scalar_lea.vmem %s876_s2, %s830_s20  ;;  %s278_s14 = scalar_lea.vmem %s879_s5, %s830_s20 }
  0x11   : > { %743 = vmatpush3.xpose.msk.msra.mxu0 %vm296_vm1, %v281_v1  ;;  %v279_v3 = vld [vmem:[%s260_s26] sm:$0xff]  ;;  %748 = vmatpush3.xpose.msk.msra.mxu1 %vm296_vm1, %v282_v2  ;;  %v280_v4 = vld [vmem:[%s260_s26 + $0x8] sm:$0xff] }
  0x12   : > { %752 = vmatprep.subr.mxu0 %v788_v0  ;;  %757 = vmatprep.subr.mxu1 %v788_v0  ;;  %v283_v28 = vld [vmem:[%s270_s11] sm:$0xff]  ;;  %v284_v29 = vld [vmem:[%s270_s11 + $0x8] sm:$0xff] }
  0x14   : > { %745 = vmatmul.mubr.msk.f32.vlgmr.msra.gmra.mrb[0].mxu0 %vm296_vm1, %v279_v3  ;;  %750 = vmatmul.mubr.msk.f32.vlgmr.msra.gmra.mrb[0].mxu1 %vm296_vm1, %v280_v4 }
  0x15   : > { %754 = vmatprep.mubr.msk.f32.mxu0 %vm789_vm0, %v788_v0  ;;  %759 = vmatprep.mubr.msk.f32.mxu1 %vm789_vm0, %v788_v0 }
  0x16   : > { %753 = vmatpush3.msra.mxu0 %v283_v28  ;;  %758 = vmatpush3.msra.mxu1 %v284_v29 }
  0xe7   : > { %v369_v10 = vpop.f32.mrb[0].mxu0  ;;  %v445_v11 = vpop.f32.mrb[0].mxu1 }
  0xe8   : > { %v370_v12 = vadd.f32 %v369_v10, %v294_v8  ;;  %v746_v13 = vpop.f32.mrb[1].mxu0  ;;  %v446_v14 = vadd.f32 %v445_v11, %v295_v9  ;;  %v751_v15 = vpop.f32.mrb[1].mxu1 }
  0xea   : > { %v450_v16 = vsel %vm449_vm2, %v370_v12, -inf  ;;  %v453_v17 = vsel %vm449_vm2, %v446_v14, -inf }
  0xeb   : > { %451 = vmax.xlane.f32.xlu0 %v450_v16 }
  0xef   : > { %454 = vmax.xlane.f32.xlu0 %v453_v17 }
 0x178   : > { %v452_v18 = vpop.xlane.xlu0 %451 }
 0x179   : > { %v456_v19 = vsub.f32 %v370_v12, %v452_v18 }
 0x17b   : > { %v458_v20 = vmul.f32 1.442695, %v456_v19 }
 0x17c   : > { %v455_v21 = vpop.xlane.xlu0 %454 }
 0x17d   : > { %772 = vpow2.f32 %v458_v20  ;;  %v457_v22 = vsub.f32 %v446_v14, %v455_v21 }
 0x17f   : > { %v460_v23 = vmul.f32 1.442695, %v457_v22 }
 0x181   : > { %774 = vpow2.f32 %v460_v23 }
 0x187   : > { %v773_v24 = vpop.eup %772 }
 0x188   : > { %v462_v25 = vsel %vm449_vm2, %v773_v24, 0.0 }
 0x189   : > { %463 = vadd.xlane.f32.xlu1 %v462_v25 }
 0x18b   : > { %v775_v26 = vpop.eup %774 }
 0x18c   : > { %v465_v27 = vsel %vm449_vm2, %v775_v26, 0.0 }
 0x18d   : > { %466 = vadd.xlane.f32.xlu1 %v465_v27 }
 0x216   : > { %v464_v30 = vpop.xlane.xlu1 %463 }
 0x217   : > { %776 = vrcp.f32 %v464_v30 }
 0x21a   : > { %v467_v31 = vpop.xlane.xlu1 %466 }
 0x21b   : > { %778 = vrcp.f32 %v467_v31 }
 0x221   : > { %v777_v32 = vpop.eup %776 }
 0x222   : > { %v470_v33 = vmul.f32 %v777_v32, %v773_v24 }
 0x224   : > { %755 = vmatmul.mubr.msk.f32.vlgmr.msra.gmra.mrb[2].mxu0 %vm449_vm2, %v470_v33 }
 0x225   : > { %v779_v34 = vpop.eup %778 }
 0x226   : > { %v471_v35 = vmul.f32 %v779_v34, %v775_v26 }
 0x228   : > { %760 = vmatmul.mubr.msk.f32.vlgmr.msra.gmra.mrb[2].mxu1 %vm449_vm2, %v471_v35 }
 0x2f7   : > { %v541_v36 = vpop.f32.mrb[2].mxu0 }
 0x2f8   : > { %618 = vst.msk [vmem:[%s278_s14] sm:$0xff] %vm296_vm1, %v541_v36  ;;  %v756_v37 = vpop.f32.mrb[3].mxu0 }
 0x2fb   : > { %v614_v38 = vpop.f32.mrb[2].mxu1 }
 0x2fc   : > { %619 = vst.msk [vmem:[%s278_s14 + $0x8] sm:$0xff] %vm296_vm1, %v614_v38  ;;  %v761_v39 = vpop.f32.mrb[3].mxu1 }
 0x2fd PF: > { %s15_s18 = sadd.s32 1, %s786_s18  }
 0x2fe   : > { %p12_p4 = scmp.ge.s32.totalorder %s15_s18, 4  }
 0x300   :  { %14 = sbr.rel (!%p12_p4) target bundleno = 1 (0x1), region = 79 }

// kernel: neuro_t5_forward.46
= control target key start
LH: loop header
LB: loop body
LE: loop exit
PB: predicated region body
PF: predicated region fallthrough
CT: control target
= control target key end

     0   :  { %s310_s0 = inlined_call_operand.vmem [shape: f32[16,128], index: 0, kind: input, shape index: {}]   ;;  %s311_s2 = inlined_call_operand.vmem [shape: f32[128,128], index: 2, kind: input, shape index: {}]   ;;  %s312_s1 = inlined_call_operand.vmem [shape: f32[1,128], index: 1, kind: input, shape index: {}]   ;;  %s313_s3 = inlined_call_operand.vmem [shape: f32[16,128], index: 3, kind: output, shape index: {}]  }
   0x1   :  { %v14_v0 = vld [vmem:[%s310_s0] sm:$0xff]  ;;  %v15_v1 = vld [vmem:[%s310_s0 + $0x8] sm:$0xff]  ;;  %v42_v5 = vld [vmem:[%s311_s2 + $0x10] sm:$0xff] }
   0x2   :  { %v40_v2 = vld [vmem:[%s311_s2] sm:$0xff]  ;;  %v16_v3 = vmul.f32 %v14_v0, %v14_v0  ;;  %v41_v4 = vld [vmem:[%s311_s2 + $0x8] sm:$0xff]  ;;  %v43_v6 = vld [vmem:[%s311_s2 + $0x18] sm:$0xff]  ;;  %v17_v9 = vmul.f32 %v15_v1, %v15_v1 }
   0x3   :  { %v191_v7 = vpack.c.bf16 %v41_v4, %v40_v2  ;;  %v195_v8 = vpack.c.bf16 %v43_v6, %v42_v5  ;;  %v44_v10 = vld [vmem:[%s311_s2 + $0x20] sm:$0xff]  ;;  %v45_v11 = vld [vmem:[%s311_s2 + $0x28] sm:$0xff]  ;;  %v46_v13 = vld [vmem:[%s311_s2 + $0x30] sm:$0xff] }
   0x4   :  { %18 = vadd.xlane.f32.xlu0 %v16_v3  ;;  %v199_v12 = vpack.c.bf16 %v45_v11, %v44_v10  ;;  %v47_v14 = vld [vmem:[%s311_s2 + $0x38] sm:$0xff]  ;;  %v48_v16 = vld [vmem:[%s311_s2 + $0x40] sm:$0xff]  ;;  %v49_v17 = vld [vmem:[%s311_s2 + $0x48] sm:$0xff] }
   0x5   :  { %192 = vmatprep.subr.bf16.mxu0 %v191_v7  ;;  %v203_v15 = vpack.c.bf16 %v47_v14, %v46_v13  ;;  %v207_v18 = vpack.c.bf16 %v49_v17, %v48_v16  ;;  %v50_v19 = vld [vmem:[%s311_s2 + $0x50] sm:$0xff]  ;;  %v51_v20 = vld [vmem:[%s311_s2 + $0x58] sm:$0xff]  ;;  %v52_v21 = vld [vmem:[%s311_s2 + $0x60] sm:$0xff] }
   0x6   :  { %194 = vmatpush3.bf16.msra.mxu0 %v191_v7  ;;  %v211_v22 = vpack.c.bf16 %v51_v20, %v50_v19  ;;  %v53_v23 = vld [vmem:[%s311_s2 + $0x68] sm:$0xff]  ;;  %v54_v25 = vld [vmem:[%s311_s2 + $0x70] sm:$0xff]  ;;  %v55_v26 = vld [vmem:[%s311_s2 + $0x78] sm:$0xff] }
   0x7   :  { %196 = vmatprep.subr.bf16.mxu0 %v195_v8  ;;  %v215_v24 = vpack.c.bf16 %v53_v23, %v52_v21  ;;  %v219_v27 = vpack.c.bf16 %v55_v26, %v54_v25  ;;  %v137_v35 = vld [vmem:[%s312_s1] ss:$0 sm:$0xff] }
   0x8   :  { %20 = vadd.xlane.f32.xlu0 %v17_v9 }
   0xa   :  { %198 = vmatpush3.bf16.msra.mxu0 %v195_v8 }
   0xb   :  { %200 = vmatprep.subr.bf16.mxu0 %v199_v12 }
   0xe   :  { %202 = vmatpush3.bf16.msra.mxu0 %v199_v12 }
   0xf   :  { %204 = vmatprep.subr.bf16.mxu0 %v203_v15 }
  0x12   :  { %206 = vmatpush3.bf16.msra.mxu0 %v203_v15 }
  0x13   :  { %208 = vmatprep.subr.bf16.mxu0 %v207_v18 }
  0x16   :  { %210 = vmatpush3.bf16.msra.mxu0 %v207_v18 }
  0x17   :  { %212 = vmatprep.subr.bf16.mxu0 %v211_v22 }
  0x1a   :  { %214 = vmatpush3.bf16.msra.mxu0 %v211_v22 }
  0x1b   :  { %216 = vmatprep.subr.bf16.mxu0 %v215_v24 }
  0x1e   :  { %218 = vmatpush3.bf16.msra.mxu0 %v215_v24 }
  0x1f   :  { %220 = vmatprep.subr.bf16.mxu0 %v219_v27 }
  0x22   :  { %222 = vmatpush3.bf16.msra.mxu0 %v219_v27 }
  0x91   :  { %v19_v28 = vpop.xlane.xlu0 %18 }
  0x92   :  { %v23_v29 = vmul.f32 0.0078125, %v19_v28 }
  0x94   :  { %v25_v30 = vadd.f32 1e-06, %v23_v29 }
  0x95   :  { %v21_v31 = vpop.xlane.xlu0 %20 }
  0x96   :  { %223 = vrsqrt.f32 %v25_v30  ;;  %v24_v32 = vmul.f32 0.0078125, %v21_v31 }
  0x98   :  { %v26_v33 = vadd.f32 1e-06, %v24_v32 }
  0x9a   :  { %225 = vrsqrt.f32 %v26_v33 }
  0xa0   :  { %v224_v34 = vpop.eup %223 }
  0xa1   :  { %v29_v36 = vmul.f32 %v224_v34, %v14_v0 }
  0xa3   :  { %v38_v37 = vmul.f32 %v137_v35, %v29_v36 }
  0xa4   :  { %v226_v38 = vpop.eup %225 }
  0xa5   :  { %v30_v39 = vmul.f32 %v226_v38, %v15_v1  ;;  %188 = vmatprep.mubr.f32.mxu0 %v38_v37 }
  0xa7   :  { %v39_v40 = vmul.f32 %v137_v35, %v30_v39 }
  0xa9   :  { %189 = vmatmul.mubr.f32.vlgmr.msra.gmra.mrb[0].mxu0 %v39_v40 }
 0x17c   :  { %v190_v41 = vpop.f32.mrb[0].mxu0 }
 0x17d   :  { %132 = vst [vmem:[%s313_s3 + $0x8] sm:$0xff] %v190_v41  ;;  %v122_v42 = vpop.f32.mrb[1].mxu0 }
 0x17e   :  { %131 = vst [vmem:[%s313_s3] sm:$0xff] %v122_v42 }

// kernel: neuro_t5_forward.48
= control target key start
LH: loop header
LB: loop body
LE: loop exit
PB: predicated region body
PF: predicated region fallthrough
CT: control target
= control target key end

     0   :  { %s860_s18 = smov 0   ;;  %s921_s0 = inlined_call_operand.vmem [shape: f32[2,2,8,64], index: 0, kind: input, shape index: {}]   ;;  %s922_s1 = inlined_call_operand.vmem [shape: f32[2,2,16,64], index: 1, kind: input, shape index: {}]   ;;  %s923_s2 = inlined_call_operand.vmem [shape: f32[2,2,16,64], index: 2, kind: input, shape index: {}]   ;;  %s924_s3 = inlined_call_operand.vmem [shape: f32[1,2,8,16], index: 3, kind: input, shape index: {}]   ;;  %s925_s4 = inlined_call_operand.vmem [shape: f32[2,1,1,16], index: 4, kind: input, shape index: {}]   ;;  %s926_s5 = inlined_call_operand.vmem [shape: f32[2,2,8,64], index: 5, kind: output, shape index: {}]  }
   0x1 LB: > { %s718_s19 = sadd.s32 4294967295, %s825_s18   ;;  %p722_p0 = scmp.ge.s32.totalorder %s825_s18, 1  ;;  %s825_s18 = sphi %s860_s18, %s15_s18  }
   0x2   : > { %p215_p1 = scmp.lt.s32.totalorder %s825_s18, 3 }
   0x4   : > { %p216_p2 = pnand %p722_p0, %p215_p1 }
   0x5   : > { %p256_p3 = scmp.lt.s32.totalorder (!%p216_p2), %s718_s19, 1  ;;  %v827_v0 = vmov (!%p216_p2), 0.0|0.0   ;;  %vm300_vm0 = vcmask (!%p216_p2), 523264   ;;  %vm828_vm1 = vmmov (!%p216_p2), 0   ;;  %v829_v1 = vmov (!%p216_p2), 0.0   ;;  %v289_v10 = vld [vmem:[%s924_s3] sm:$0xff] (!%p216_p2) }
   0x6   : > { %219 = sbr.rel (%p216_p2) target bundleno = 771 (0x303), region = 40  ;;  %786 = vmatprep.subr.bf16.mxu0 (!%p216_p2), %v827_v0  ;;  %790 = vmatprep.subr.bf16.mxu1 (!%p216_p2), %v827_v0  ;;  %vm788_vm2 = vmpackc.low (!%p216_p2), %vm300_vm0, %vm300_vm0  ;;  %v290_v12 = vld [vmem:[%s924_s3 + $0x8] sm:$0xff] (!%p216_p2)  ;;  %vm459_vm3 = vcmask (!%p216_p2), 130048  }
   0x7   : > { %762 = vmatprep.mubr.msk.f32.mxu0 (!%p216_p2), %vm828_vm1, %v829_v1  ;;  %769 = vmatprep.mubr.msk.f32.mxu1 (!%p216_p2), %vm828_vm1, %v829_v1 }
   0xd   : > { %s928_s19 = smov (!%p256_p3, %s718_s19), 1 }
   0xe   : > { %s743_s20 = sshll.u32 %s928_s19, 5  ;;  %s742_s24 = sshll.u32 %s928_s19, 4 }
   0xf   : > { %s265_s23 = scalar_lea.vmem %s922_s1, %s743_s20  ;;  %s260_s27 = scalar_lea.vmem %s921_s0, %s742_s24 }
  0x10   : > { %v281_v2 = vld [vmem:[%s265_s23] sm:$0xff]  ;;  %v282_v3 = vld [vmem:[%s265_s23 + $0x8] sm:$0xff]  ;;  %v283_v4 = vld [vmem:[%s265_s23 + $0x10] sm:$0xff]  ;;  %s273_s30 = scalar_lea.vmem %s925_s4, %s928_s19  ;;  %s270_s12 = scalar_lea.vmem %s923_s2, %s743_s20 }
  0x11   : > { %v787_v5 = vpack.c.bf16 %v282_v3, %v281_v2  ;;  %v284_v6 = vld [vmem:[%s265_s23 + $0x18] sm:$0xff]  ;;  %v279_v8 = vld [vmem:[%s260_s27] sm:$0xff]  ;;  %v280_v9 = vld [vmem:[%s260_s27 + $0x8] sm:$0xff]  ;;  %s278_s15 = scalar_lea.vmem %s926_s5, %s742_s24 }
  0x12   : > { %v791_v7 = vpack.c.bf16 %v284_v6, %v283_v4  ;;  %v731_v11 = vld [vmem:[%s273_s30] ss:$0 sm:$0xff]  ;;  %v286_v34 = vld [vmem:[%s270_s12 + $0x8] sm:$0xff]  ;;  %v287_v36 = vld [vmem:[%s270_s12 + $0x10] sm:$0xff] }
  0x13   : > { %789 = vmatpush3.bf16.xpose.msk.msra.mxu0 %vm788_vm2, %v787_v5  ;;  %v298_v13 = vadd.f32 %v731_v11, %v289_v10  ;;  %v299_v14 = vadd.f32 %v731_v11, %v290_v12  ;;  %v285_v33 = vld [vmem:[%s270_s12] sm:$0xff]  ;;  %v288_v37 = vld [vmem:[%s270_s12 + $0x18] sm:$0xff] }
  0x14   : > { %793 = vmatpush3.bf16.xpose.msk.msra.mxu1 %vm788_vm2, %v791_v7  ;;  %794 = vmatprep.subr.bf16.mxu0 %v827_v0  ;;  %v795_v35 = vpack.c.bf16 %v286_v34, %v285_v33  ;;  %v798_v38 = vpack.c.bf16 %v288_v37, %v287_v36 }
  0x15   : > { %797 = vmatprep.subr.bf16.mxu1 %v827_v0 }
  0x1a   : > { %763 = vmatmul.mubr.msk.f32.vlgmr.msra.gmra.mrb[0].mxu0 %vm300_vm0, %v279_v8 }
  0x1b   : > { %770 = vmatmul.mubr.msk.f32.vlgmr.msra.gmra.mrb[0].mxu1 %vm300_vm0, %v280_v9  ;;  %776 = vmatprep.mubr.msk.f32.mxu0 %vm828_vm1, %v829_v1 }
  0x1c   : > { %783 = vmatprep.mubr.msk.f32.mxu1 %vm828_vm1, %v829_v1  ;;  %796 = vmatpush3.bf16.msra.mxu0 %v795_v35 }
  0x1d   : > { %799 = vmatpush3.bf16.msra.mxu1 %v798_v38 }
  0xed   : > { %v376_v15 = vpop.f32.mrb[0].mxu0 }
  0xee   : > { %v377_v16 = vadd.f32 %v376_v15, %v298_v13  ;;  %v764_v17 = vpop.f32.mrb[1].mxu0  ;;  %v455_v18 = vpop.f32.mrb[0].mxu1 }
  0xef   : > { %v456_v19 = vadd.f32 %v455_v18, %v299_v14  ;;  %v771_v20 = vpop.f32.mrb[1].mxu1 }
  0xf0   : > { %v460_v21 = vsel %vm459_vm3, %v377_v16, -inf }
  0xf1   : > { %461 = vmax.xlane.f32.xlu0 %v460_v21  ;;  %v463_v22 = vsel %vm459_vm3, %v456_v19, -inf }
  0xf5   : > { %464 = vmax.xlane.f32.xlu0 %v463_v22 }
 0x17e   : > { %v462_v23 = vpop.xlane.xlu0 %461 }
 0x17f   : > { %v466_v24 = vsub.f32 %v377_v16, %v462_v23 }
 0x181   : > { %v468_v25 = vmul.f32 1.442695, %v466_v24 }
 0x182   : > { %v465_v26 = vpop.xlane.xlu0 %464 }
 0x183   : > { %811 = vpow2.f32 %v468_v25  ;;  %v467_v27 = vsub.f32 %v456_v19, %v465_v26 }
 0x185   : > { %v470_v28 = vmul.f32 1.442695, %v467_v27 }
 0x187   : > { %813 = vpow2.f32 %v470_v28 }
 0x18d   : > { %v812_v29 = vpop.eup %811 }
 0x18e   : > { %v472_v30 = vsel %vm459_vm3, %v812_v29, 0.0 }
 0x18f   : > { %473 = vadd.xlane.f32.xlu1 %v472_v30 }
 0x191   : > { %v814_v31 = vpop.eup %813 }
 0x192   : > { %v475_v32 = vsel %vm459_vm3, %v814_v31, 0.0 }
 0x193   : > { %476 = vadd.xlane.f32.xlu1 %v475_v32 }
 0x21c   : > { %v474_v39 = vpop.xlane.xlu1 %473 }
 0x21d   : > { %815 = vrcp.f32 %v474_v39 }
 0x220   : > { %v477_v40 = vpop.xlane.xlu1 %476 }
 0x221   : > { %817 = vrcp.f32 %v477_v40 }
 0x227   : > { %v816_v41 = vpop.eup %815 }
 0x228   : > { %v480_v42 = vmul.f32 %v816_v41, %v812_v29 }
 0x22a   : > { %777 = vmatmul.mubr.msk.f32.vlgmr.msra.gmra.mrb[2].mxu0 %vm459_vm3, %v480_v42 }
 0x22b   : > { %v818_v43 = vpop.eup %817 }
 0x22c   : > { %v481_v44 = vmul.f32 %v818_v43, %v814_v31 }
 0x22e   : > { %784 = vmatmul.mubr.msk.f32.vlgmr.msra.gmra.mrb[2].mxu1 %vm459_vm3, %v481_v44 }
 0x2fd   : > { %v551_v45 = vpop.f32.mrb[2].mxu0 }
 0x2fe   : > { %628 = vst.msk [vmem:[%s278_s15] sm:$0xff] %vm300_vm0, %v551_v45  ;;  %v778_v46 = vpop.f32.mrb[3].mxu0 }
 0x301   : > { %v624_v47 = vpop.f32.mrb[2].mxu1 }
 0x302   : > { %629 = vst.msk [vmem:[%s278_s15 + $0x8] sm:$0xff] %vm300_vm0, %v624_v47  ;;  %v785_v48 = vpop.f32.mrb[3].mxu1 }
 0x303 PF: > { %s15_s18 = sadd.s32 1, %s825_s18  }
 0x304   : > { %p12_p4 = scmp.ge.s32.totalorder %s15_s18, 4  }
 0x306   :  { %14 = sbr.rel (!%p12_p4) target bundleno = 1 (0x1), region = 79 }

// kernel: neuro_t5_forward.50
= control target key start
LH: loop header
LB: loop body
LE: loop exit
PB: predicated region body
PF: predicated region fallthrough
CT: control target
= control target key end

     0   :  { %s636_s0 = inlined_call_operand.vmem [shape: f32[16,128], index: 0, kind: input, shape index: {}]   ;;  %s637_s2 = inlined_call_operand.vmem [shape: f32[128,256], index: 2, kind: input, shape index: {}]   ;;  %s638_s3 = inlined_call_operand.vmem [shape: f32[128,256], index: 3, kind: input, shape index: {}]   ;;  %s639_s1 = inlined_call_operand.vmem [shape: f32[1,128], index: 1, kind: input, shape index: {}]   ;;  %s640_s4 = inlined_call_operand.vmem [shape: f32[16,256], index: 4, kind: output, shape index: {}]  }
   0x1   :  { %v416_v0 = vld [vmem:[%s636_s0] sm:$0xff]  ;;  %v421_v1 = vld [vmem:[%s636_s0 + $0x8] sm:$0xff]  ;;  %v46_v4 = vld [vmem:[%s637_s2 + $0x18] sm:$0xff] }
   0x2   :  { %v44_v2 = vld [vmem:[%s637_s2 + $0x8] sm:$0xff]  ;;  %v19_v3 = vmul.f32 %v416_v0, %v416_v0  ;;  %v155_v6 = vld [vmem:[%s638_s3 + $0x18] sm:$0xff]  ;;  %v43_v9 = vld [vmem:[%s637_s2] sm:$0xff]  ;;  %v20_v12 = vmul.f32 %v421_v1, %v421_v1 }
   0x3   :  { %v153_v5 = vld [vmem:[%s638_s3 + $0x8] sm:$0xff]  ;;  %v310_v7 = vpack.c.bf16 %v46_v4, %v44_v2  ;;  %v45_v10 = vld [vmem:[%s637_s2 + $0x10] sm:$0xff]  ;;  %v152_v11 = vld [vmem:[%s638_s3] sm:$0xff] }
   0x4   :  { %v342_v8 = vpack.c.bf16 %v155_v6, %v153_v5  ;;  %21 = vadd.xlane.f32.xlu0 %v19_v3  ;;  %v312_v13 = vpack.c.bf16 %v45_v10, %v43_v9  ;;  %v154_v14 = vld [vmem:[%s638_s3 + $0x10] sm:$0xff]  ;;  %v48_v15 = vld [vmem:[%s637_s2 + $0x28] sm:$0xff]  ;;  %v50_v16 = vld [vmem:[%s637_s2 + $0x38] sm:$0xff] }
   0x5   :  { %311 = vmatprep.subr.bf16.mxu0 %v310_v7  ;;  %v344_v17 = vpack.c.bf16 %v154_v14, %v152_v11  ;;  %v314_v18 = vpack.c.bf16 %v50_v16, %v48_v15  ;;  %v157_v19 = vld [vmem:[%s638_s3 + $0x28] sm:$0xff]  ;;  %v159_v20 = vld [vmem:[%s638_s3 + $0x38] sm:$0xff]  ;;  %v47_v21 = vld [vmem:[%s637_s2 + $0x20] sm:$0xff] }
   0x6   :  { %343 = vmatprep.subr.bf16.mxu1 %v342_v8  ;;  %313 = vmatpush1.bf16.msra.mxu0 %v312_v13  ;;  %v346_v22 = vpack.c.bf16 %v159_v20, %v157_v19  ;;  %v49_v23 = vld [vmem:[%s637_s2 + $0x30] sm:$0xff]  ;;  %v156_v24 = vld [vmem:[%s638_s3 + $0x20] sm:$0xff]  ;;  %v52_v28 = vld [vmem:[%s637_s2 + $0x48] sm:$0xff] }
   0x7   :  { %v158_v25 = vld [vmem:[%s638_s3 + $0x30] sm:$0xff]  ;;  %345 = vmatpush1.bf16.msra.mxu1 %v344_v17  ;;  %315 = vmatprep.subr.bf16.mxu0 %v314_v18  ;;  %v316_v26 = vpack.c.bf16 %v49_v23, %v47_v21  ;;  %v54_v29 = vld [vmem:[%s637_s2 + $0x58] sm:$0xff]  ;;  %v161_v30 = vld [vmem:[%s638_s3 + $0x48] sm:$0xff]  ;;  %v387_v21 = vmov 0.0  }
   0x8   :  { %v348_v27 = vpack.c.bf16 %v158_v25, %v156_v24  ;;  %23 = vadd.xlane.f32.xlu0 %v20_v12  ;;  %347 = vmatprep.subr.bf16.mxu1 %v346_v22  ;;  %v318_v31 = vpack.c.bf16 %v54_v29, %v52_v28  ;;  %v163_v32 = vld [vmem:[%s638_s3 + $0x58] sm:$0xff]  ;;  %v51_v33 = vld [vmem:[%s637_s2 + $0x40] sm:$0xff]  ;;  %v53_v34 = vld [vmem:[%s637_s2 + $0x50] sm:$0xff] }
   0x9   :  { %v350_v35 = vpack.c.bf16 %v163_v32, %v161_v30  ;;  %v160_v36 = vld [vmem:[%s638_s3 + $0x40] sm:$0xff]  ;;  %v162_v37 = vld [vmem:[%s638_s3 + $0x50] sm:$0xff]  ;;  %v56_v38 = vld [vmem:[%s637_s2 + $0x68] sm:$0xff]  ;;  %v320_v39 = vpack.c.bf16 %v53_v34, %v51_v33  ;;  %139 = vmatprep.mubr.f32.mxu0 %v387_v21  ;;  %248 = vmatprep.mubr.f32.mxu1 %v387_v21 }
   0xa   :  { %317 = vmatpush1.bf16.msra.mxu0 %v316_v26  ;;  %v58_v40 = vld [vmem:[%s637_s2 + $0x78] sm:$0xff]  ;;  %v165_v41 = vld [vmem:[%s638_s3 + $0x68] sm:$0xff]  ;;  %v352_v43 = vpack.c.bf16 %v162_v37, %v160_v36  ;;  %v55_v46 = vld [vmem:[%s637_s2 + $0x60] sm:$0xff] }
   0xb   :  { %v167_v42 = vld [vmem:[%s638_s3 + $0x78] sm:$0xff]  ;;  %349 = vmatpush1.bf16.msra.mxu1 %v348_v27  ;;  %319 = vmatprep.subr.bf16.mxu0 %v318_v31  ;;  %v322_v44 = vpack.c.bf16 %v58_v40, %v56_v38  ;;  %v57_v47 = vld [vmem:[%s637_s2 + $0x70] sm:$0xff]  ;;  %v164_v48 = vld [vmem:[%s638_s3 + $0x60] sm:$0xff] }
   0xc   :  { %351 = vmatprep.subr.bf16.mxu1 %v350_v35  ;;  %v354_v45 = vpack.c.bf16 %v167_v42, %v165_v41  ;;  %v324_v49 = vpack.c.bf16 %v57_v47, %v55_v46  ;;  %v166_v50 = vld [vmem:[%s638_s3 + $0x70] sm:$0xff]  ;;  %v60_v52 = vld [vmem:[%s637_s2 + $0x88] sm:$0xff]  ;;  %v62_v53 = vld [vmem:[%s637_s2 + $0x98] sm:$0xff] }
   0xd   :  { %v356_v51 = vpack.c.bf16 %v166_v50, %v164_v48  ;;  %v169_v54 = vld [vmem:[%s638_s3 + $0x88] sm:$0xff]  ;;  %v326_v55 = vpack.c.bf16 %v62_v53, %v60_v52  ;;  %v171_v56 = vld [vmem:[%s638_s3 + $0x98] sm:$0xff]  ;;  %v59_v57 = vld [vmem:[%s637_s2 + $0x80] sm:$0xff] }
   0xe   :  { %321 = vmatpush1.bf16.msra.mxu0 %v320_v39  ;;  %v61_v58 = vld [vmem:[%s637_s2 + $0x90] sm:$0xff]  ;;  %v358_v59 = vpack.c.bf16 %v171_v56, %v169_v54  ;;  %v168_v61 = vld [vmem:[%s638_s3 + $0x80] sm:$0xff]  ;;  %v64_v2 = vld [vmem:[%s637_s2 + $0xa8] sm:$0xff] }
   0xf   :  { %353 = vmatpush1.bf16.msra.mxu1 %v352_v43  ;;  %323 = vmatprep.subr.bf16.mxu0 %v322_v44  ;;  %v328_v60 = vpack.c.bf16 %v61_v58, %v59_v57  ;;  %v170_v62 = vld [vmem:[%s638_s3 + $0x90] sm:$0xff]  ;;  %v66_v3 = vld [vmem:[%s637_s2 + $0xb8] sm:$0xff]  ;;  %v173_v4 = vld [vmem:[%s638_s3 + $0xa8] sm:$0xff] }
  0x10   :  { %355 = vmatprep.subr.bf16.mxu1 %v354_v45  ;;  %v360_v63 = vpack.c.bf16 %v170_v62, %v168_v61  ;;  %v330_v5 = vpack.c.bf16 %v66_v3, %v64_v2  ;;  %v175_v6 = vld [vmem:[%s638_s3 + $0xb8] sm:$0xff]  ;;  %v63_v7 = vld [vmem:[%s637_s2 + $0xa0] sm:$0xff]  ;;  %v65_v8 = vld [vmem:[%s637_s2 + $0xb0] sm:$0xff] }
  0x11   :  { %v362_v9 = vpack.c.bf16 %v175_v6, %v173_v4  ;;  %v332_v10 = vpack.c.bf16 %v65_v8, %v63_v7  ;;  %v172_v11 = vld [vmem:[%s638_s3 + $0xa0] sm:$0xff]  ;;  %v174_v12 = vld [vmem:[%s638_s3 + $0xb0] sm:$0xff]  ;;  %v68_v14 = vld [vmem:[%s637_s2 + $0xc8] sm:$0xff] }
  0x12   :  { %325 = vmatpush1.bf16.msra.mxu0 %v324_v49  ;;  %v364_v13 = vpack.c.bf16 %v174_v12, %v172_v11  ;;  %v70_v15 = vld [vmem:[%s637_s2 + $0xd8] sm:$0xff]  ;;  %v177_v16 = vld [vmem:[%s638_s3 + $0xc8] sm:$0xff]  ;;  %v67_v19 = vld [vmem:[%s637_s2 + $0xc0] sm:$0xff] }
  0x13   :  { %357 = vmatpush1.bf16.msra.mxu1 %v356_v51  ;;  %327 = vmatprep.subr.bf16.mxu0 %v326_v55  ;;  %v334_v17 = vpack.c.bf16 %v70_v15, %v68_v14  ;;  %v179_v18 = vld [vmem:[%s638_s3 + $0xd8] sm:$0xff]  ;;  %v69_v20 = vld [vmem:[%s637_s2 + $0xd0] sm:$0xff]  ;;  %v176_v24 = vld [vmem:[%s638_s3 + $0xc0] sm:$0xff] }
  0x14   :  { %359 = vmatprep.subr.bf16.mxu1 %v358_v59  ;;  %v366_v22 = vpack.c.bf16 %v179_v18, %v177_v16  ;;  %v336_v23 = vpack.c.bf16 %v69_v20, %v67_v19  ;;  %v178_v25 = vld [vmem:[%s638_s3 + $0xd0] sm:$0xff]  ;;  %v72_v26 = vld [vmem:[%s637_s2 + $0xe8] sm:$0xff]  ;;  %v74_v28 = vld [vmem:[%s637_s2 + $0xf8] sm:$0xff] }
  0x15   :  { %v368_v27 = vpack.c.bf16 %v178_v25, %v176_v24  ;;  %v181_v29 = vld [vmem:[%s638_s3 + $0xe8] sm:$0xff]  ;;  %v183_v30 = vld [vmem:[%s638_s3 + $0xf8] sm:$0xff]  ;;  %v338_v31 = vpack.c.bf16 %v74_v28, %v72_v26  ;;  %v71_v33 = vld [vmem:[%s637_s2 + $0xe0] sm:$0xff] }
  0x16   :  { %329 = vmatpush1.bf16.msra.mxu0 %v328_v60  ;;  %v370_v32 = vpack.c.bf16 %v183_v30, %v181_v29  ;;  %v73_v34 = vld [vmem:[%s637_s2 + $0xf0] sm:$0xff]  ;;  %v180_v35 = vld [vmem:[%s638_s3 + $0xe0] sm:$0xff] }
  0x17   :  { %361 = vmatpush1.bf16.msra.mxu1 %v360_v63  ;;  %331 = vmatprep.subr.bf16.mxu0 %v330_v5  ;;  %v340_v36 = vpack.c.bf16 %v73_v34, %v71_v33  ;;  %v182_v37 = vld [vmem:[%s638_s3 + $0xf0] sm:$0xff]  ;;  %v309_v46 = vld [vmem:[%s639_s1] ss:$0 sm:$0xff] }
  0x18   :  { %363 = vmatprep.subr.bf16.mxu1 %v362_v9  ;;  %v372_v38 = vpack.c.bf16 %v182_v37, %v180_v35 }
  0x1a   :  { %333 = vmatpush1.bf16.msra.mxu0 %v332_v10 }
  0x1b   :  { %365 = vmatpush1.bf16.msra.mxu1 %v364_v13  ;;  %335 = vmatprep.subr.bf16.mxu0 %v334_v17 }
  0x1c   :  { %367 = vmatprep.subr.bf16.mxu1 %v366_v22 }
  0x1e   :  { %337 = vmatpush1.bf16.msra.mxu0 %v336_v23 }
  0x1f   :  { %369 = vmatpush1.bf16.msra.mxu1 %v368_v27  ;;  %339 = vmatprep.subr.bf16.mxu0 %v338_v31 }
  0x20   :  { %371 = vmatprep.subr.bf16.mxu1 %v370_v32 }
  0x22   :  { %341 = vmatpush1.bf16.msra.mxu0 %v340_v36 }
  0x23   :  { %373 = vmatpush1.bf16.msra.mxu1 %v372_v38 }
  0x91   :  { %v22_v39 = vpop.xlane.xlu0 %21 }
  0x92   :  { %v26_v40 = vmul.f32 0.0078125, %v22_v39 }
  0x94   :  { %v28_v41 = vadd.f32 1e-06, %v26_v40 }
  0x95   :  { %v24_v42 = vpop.xlane.xlu0 %23 }
  0x96   :  { %375 = vrsqrt.f32 %v28_v41  ;;  %v27_v43 = vmul.f32 0.0078125, %v24_v42 }
  0x98   :  { %v29_v44 = vadd.f32 1e-06, %v27_v43 }
  0x9a   :  { %377 = vrsqrt.f32 %v29_v44 }
  0xa0   :  { %v376_v45 = vpop.eup %375 }
  0xa1   :  { %v32_v47 = vmul.f32 %v376_v45, %v416_v0 }
  0xa3   :  { %v41_v48 = vmul.f32 %v309_v46, %v32_v47 }
  0xa4   :  { %v378_v49 = vpop.eup %377 }
  0xa5   :  { %140 = vmatmul.mubr.f32.vlgmr.msra.gmra.mrb[0].mxu0 %v41_v48  ;;  %249 = vmatmul.mubr.f32.vlgmr.msra.gmra.mrb[0].mxu1 %v41_v48  ;;  %v33_v50 = vmul.f32 %v378_v49, %v421_v1 }
  0xa6   :  { %145 = vmatprep.mubr.f32.mxu0 %v387_v21  ;;  %254 = vmatprep.mubr.f32.mxu1 %v387_v21 }
  0xa7   :  { %v42_v51 = vmul.f32 %v309_v46, %v33_v50 }
  0xa9   :  { %146 = vmatmul.mubr.f32.gmra.mrb[2].mxu0 %v42_v51  ;;  %255 = vmatmul.mubr.f32.gmra.mrb[2].mxu1 %v42_v51 }
 0x178   :  { %v141_v52 = vpop.f32.mrb[0].mxu0  ;;  %v250_v53 = vpop.f32.mrb[0].mxu1 }
 0x179   :  { %v265_v54 = vmul.f32 0.044715, %v141_v52  ;;  %v143_v55 = vpop.f32.mrb[1].mxu0  ;;  %v252_v56 = vpop.f32.mrb[1].mxu1  ;;  %v261_v18 = vmul.f32 0.5, %v141_v52 }
 0x17a   :  { %v266_v57 = vmul.f32 0.044715, %v143_v55  ;;  %v262_v20 = vmul.f32 0.5, %v143_v55 }
 0x17b   :  { %v269_v58 = vmul.f32 %v265_v54, %v141_v52 }
 0x17c   :  { %v270_v59 = vmul.f32 %v266_v57, %v143_v55  ;;  %v147_v0 = vpop.f32.mrb[2].mxu0  ;;  %v256_v60 = vpop.f32.mrb[2].mxu1 }
 0x17d   :  { %v273_v61 = vmul.f32 %v269_v58, %v141_v52  ;;  %v267_v62 = vmul.f32 0.044715, %v147_v0  ;;  %v149_v63 = vpop.f32.mrb[3].mxu0  ;;  %v258_v2 = vpop.f32.mrb[3].mxu1  ;;  %v263_v27 = vmul.f32 0.5, %v147_v0 }
 0x17e   :  { %v274_v1 = vmul.f32 %v270_v59, %v143_v55  ;;  %v268_v3 = vmul.f32 0.044715, %v149_v63  ;;  %v264_v30 = vmul.f32 0.5, %v149_v63 }
 0x17f   :  { %v277_v4 = vadd.f32 %v273_v61, %v141_v52  ;;  %v271_v5 = vmul.f32 %v267_v62, %v147_v0 }
 0x180   :  { %v278_v6 = vadd.f32 %v274_v1, %v143_v55  ;;  %v272_v7 = vmul.f32 %v268_v3, %v149_v63 }
 0x181   :  { %v281_v8 = vmul.f32 0.7978846, %v277_v4  ;;  %v275_v9 = vmul.f32 %v271_v5, %v147_v0 }
 0x182   :  { %v282_v10 = vmul.f32 0.7978846, %v278_v6  ;;  %v276_v11 = vmul.f32 %v272_v7, %v149_v63 }
 0x183   :  { %379 = vtanh.f32 %v281_v8  ;;  %v279_v12 = vadd.f32 %v275_v9, %v147_v0 }
 0x184   :  { %381 = vtanh.f32 %v282_v10  ;;  %v280_v13 = vadd.f32 %v276_v11, %v149_v63 }
 0x185   :  { %v283_v14 = vmul.f32 0.7978846, %v279_v12 }
 0x186   :  { %v284_v15 = vmul.f32 0.7978846, %v280_v13 }
 0x187   :  { %383 = vtanh.f32 %v283_v14 }
 0x188   :  { %385 = vtanh.f32 %v284_v15 }
 0x18d   :  { %v380_v16 = vpop.eup %379 }
 0x18e   :  { %v382_v17 = vpop.eup %381  ;;  %v289_v19 = vadd.f32 1.0, %v380_v16 }
 0x18f   :  { %v290_v21 = vadd.f32 1.0, %v382_v17 }
 0x190   :  { %v293_v22 = vmul.f32 %v289_v19, %v261_v18 }
 0x191   :  { %v384_v23 = vpop.eup %383  ;;  %v294_v24 = vmul.f32 %v290_v21, %v262_v20 }
 0x192   :  { %v386_v25 = vpop.eup %385  ;;  %v297_v26 = vmul.f32 %v293_v22, %v250_v53  ;;  %v291_v28 = vadd.f32 1.0, %v384_v23 }
 0x193   :  { %v298_v29 = vmul.f32 %v294_v24, %v252_v56  ;;  %v292_v31 = vadd.f32 1.0, %v386_v25 }
 0x194   :  { %301 = vst [vmem:[%s640_s4] sm:$0xff] %v297_v26  ;;  %v295_v32 = vmul.f32 %v291_v28, %v263_v27 }
 0x195   :  { %302 = vst [vmem:[%s640_s4 + $0x8] sm:$0xff] %v298_v29  ;;  %v296_v33 = vmul.f32 %v292_v31, %v264_v30 }
 0x196   :  { %v299_v34 = vmul.f32 %v295_v32, %v256_v60 }
 0x197   :  { %v300_v35 = vmul.f32 %v296_v33, %v258_v2 }
 0x198   :  { %303 = vst [vmem:[%s640_s4 + $0x10] sm:$0xff] %v299_v34 }
 0x199   :  { %304 = vst [vmem:[%s640_s4 + $0x18] sm:$0xff] %v300_v35 }

// kernel: neuro_t5_forward.51
= control target key start
LH: loop header
LB: loop body
LE: loop exit
PB: predicated region body
PF: predicated region fallthrough
CT: control target
= control target key end

     0   :  { %s745_s12 = smov 0   ;;  %s747_s13 = smov 0   ;;  %s849_s0 = inlined_call_operand.vmem [shape: f32[16,256], index: 0, kind: input, shape index: {}]   ;;  %s850_s1 = inlined_call_operand.vmem [shape: f32[256,128], index: 1, kind: input, shape index: {}]   ;;  %s851_s2 = inlined_call_operand.vmem [shape: f32[16,128], index: 2, kind: input, shape index: {}]   ;;  %s852_s3 = inlined_call_operand.vmem [shape: f32[16,128], index: 3, kind: output, shape index: {}]  }
   0x1   :  { %s749_s14 = smov 0   ;;  %s751_s15 = smov 0  }
   0x2   :  { %s753_s16 = smov 0  }
   0x3 LB: > { %s25_s17 = sadd.s32 1, %s718_s15  ;;  %p48_p1 = scmp.ne.s32.totalorder %s710_s13, %s706_s12  ;;  %s722_s16 = sphi %s753_s16, %s13_s16   ;;  %s718_s15 = sphi %s751_s15, %s856_s15   ;;  %s714_s14 = sphi %s749_s14, %s855_s14   ;;  %s710_s13 = sphi %s747_s13, %s854_s13   ;;  %s706_s12 = sphi %s745_s12, %s853_s12  }
   0x4   : > { %p26_p0 = scmp.ge.s32.totalorder %s25_s17, 2  ;;  %p49_p2 = scmp.eq.s32.totalorder %s722_s16, 0 }
   0x5   : > { %s41_s19 = sadd.s32 1, %s710_s13  ;;  %p545_p5 = scmp.ge.s32.totalorder %s722_s16, 2 }
   0x6   : > { %s858_s17 = smov (%p26_p0, %s25_s17), 0  ;;  %p50_p3 = por %p49_p2, %p48_p1 }
   0x7   : > { %s37_s18 = ssub.s32 %s718_s15, %s858_s17  ;;  %170 = sbr.rel (%p545_p5) target bundleno = 21 (0x15), region = 20 }
   0x8   : > { %p39_p4 = scmp.eq.s32.totalorder %s37_s18, 0 }
   0xa   : > { %s780_s20 = scalar_select %p39_p4, %s710_s13, %s41_s19  }
   0xe   : > { %173 = sbr.rel (!%p50_p3) target bundleno = 21 (0x15), region = 24  ;;  %s175_s21 = sand.u32 (%p50_p3), 1, %s710_s13  }
   0xf   : > { %s547_s22 = sshll.u32 (%p50_p3), %s718_s15, 3  ;;  %s546_s23 = sshll.u32 (%p50_p3), %s175_s21, 4 }
  0x10   : > { %s182_s26 = scalar_lea.vmem (%p50_p3), %s849_s0, %s547_s22  ;;  %s177_s27 = scalar_lea.vmem (%p50_p3), [#allocation3], %s546_s23 }
  0x11   : > { %v212_v0 = vld [vmem:[%s182_s26] sm:$0xff] (%p50_p3)  ;;  %v214_v1 = vld [vmem:[%s182_s26 + $0x10] sm:$0xff] (%p50_p3) }
  0x12   : > { %213 = vst [vmem:[%s177_s27] sm:$0xff] (%p50_p3), %v212_v0  ;;  %215 = vst [vmem:[%s177_s27 + $0x8] sm:$0xff] (%p50_p3), %v214_v1 }
  0x15 PF: > { %p548_p6 = scmp.ge.s32.totalorder %s722_s16, 1  ;;  %p232_p7 = scmp.lt.s32.totalorder %s722_s16, 3 }
  0x17   : > { %p233_p8 = pnand %p548_p6, %p232_p7 }
  0x18   : > { %s239_s28 = sand.u32 (!%p233_p8), 1, %s706_s12   ;;  %s550_s29 = sshll.u32 (!%p233_p8), %s714_s14, 4 }
  0x19   : > { %236 = sbr.rel (%p233_p8) target bundleno = 300 (0x12c), region = 66  ;;  %s792_s30 = sshll.u32 (!%p233_p8), %s239_s28, 4 }
  0x1a   : > { %p283_p9 = scmp.lt.s32.totalorder (!%p233_p8), %s550_s29, 31  ;;  %s241_s8 = scalar_lea.vmem (!%p233_p8), [#allocation3], %s792_s30 }
  0x1b   : > { %p552_p10 = scmp.ne.s32.totalorder (!%p233_p8), %s714_s14, 0 }
  0x20   : > { %s860_s29 = smov (!%p283_p9, %s550_s29), 31  ;;  %312 = sbr.rel (%p552_p10) target bundleno = 39 (0x27), region = 74 }
  0x21   : > { %s551_s4 = sshll.u32 %s860_s29, 3  ;;  %v724_v2 = vmov (!%p552_p10), 0.0  }
  0x22   : > { %s797_s7 = scalar_lea.vmem %s850_s1, %s551_s4  ;;  %313 = vst [vmem:[#allocation2] sm:$0xff] (!%p552_p10), %v724_v2  ;;  %314 = vst [vmem:[#allocation2 + $0x8] sm:$0xff] (!%p552_p10), %v724_v2 }
  0x27 PF: > { %v319_v3 = vld [vmem:[%s797_s7] sm:$0xff]  ;;  %v320_v4 = vld [vmem:[%s797_s7 + $0x8] sm:$0xff]  ;;  %v321_v5 = vld [vmem:[%s797_s7 + $0x10] sm:$0xff]  ;;  %p553_p11 = scmp.ne.s32.totalorder %s714_s14, 1 }
  0x28   : > { %v611_v6 = vpack.c.bf16 %v320_v4, %v319_v3  ;;  %v322_v7 = vld [vmem:[%s797_s7 + $0x18] sm:$0xff]  ;;  %v323_v9 = vld [vmem:[%s797_s7 + $0x20] sm:$0xff]  ;;  %v324_v10 = vld [vmem:[%s797_s7 + $0x28] sm:$0xff] }
  0x29   : > { %v615_v8 = vpack.c.bf16 %v322_v7, %v321_v5  ;;  %v619_v11 = vpack.c.bf16 %v324_v10, %v323_v9  ;;  %v317_v12 = vld [vmem:[%s241_s8] sm:$0xff]  ;;  %v326_v14 = vld [vmem:[%s797_s7 + $0x38] sm:$0xff]  ;;  %v328_v17 = vld [vmem:[%s797_s7 + $0x48] sm:$0xff] }
  0x2a   : > { %612 = vmatprep.subr.bf16.mxu0 %v611_v6  ;;  %v325_v13 = vld [vmem:[%s797_s7 + $0x30] sm:$0xff]  ;;  %608 = vmatprep.mubr.f32.mxu0 %v317_v12  ;;  %v327_v16 = vld [vmem:[%s797_s7 + $0x40] sm:$0xff]  ;;  %v330_v20 = vld [vmem:[%s797_s7 + $0x58] sm:$0xff] }
  0x2b   : > { %614 = vmatpush3.bf16.msra.mxu0 %v611_v6  ;;  %v623_v15 = vpack.c.bf16 %v326_v14, %v325_v13  ;;  %v627_v18 = vpack.c.bf16 %v328_v17, %v327_v16  ;;  %v329_v19 = vld [vmem:[%s797_s7 + $0x50] sm:$0xff]  ;;  %v331_v22 = vld [vmem:[%s797_s7 + $0x60] sm:$0xff]  ;;  %v332_v23 = vld [vmem:[%s797_s7 + $0x68] sm:$0xff] }
  0x2c   : > { %616 = vmatprep.subr.bf16.mxu0 %v615_v8  ;;  %v631_v21 = vpack.c.bf16 %v330_v20, %v329_v19  ;;  %v635_v24 = vpack.c.bf16 %v332_v23, %v331_v22  ;;  %v333_v25 = vld [vmem:[%s797_s7 + $0x70] sm:$0xff]  ;;  %v334_v26 = vld [vmem:[%s797_s7 + $0x78] sm:$0xff]  ;;  %v316_v29 = vld [vmem:[#allocation2 + $0x8] sm:$0xff] }
  0x2d   : > { %v639_v27 = vpack.c.bf16 %v334_v26, %v333_v25  ;;  %v318_v28 = vld [vmem:[%s241_s8 + $0x8] sm:$0xff]  ;;  %v315_v30 = vld [vmem:[#allocation2] sm:$0xff] }
  0x2e   : > { %v420_v36 = vld [vmem:[%s851_s2] sm:$0xff] (!%p553_p11)  ;;  %v421_v39 = vld [vmem:[%s851_s2 + $0x8] sm:$0xff] (!%p553_p11) }
  0x2f   : > { %618 = vmatpush3.bf16.msra.mxu0 %v615_v8 }
  0x30   : > { %620 = vmatprep.subr.bf16.mxu0 %v619_v11 }
  0x33   : > { %622 = vmatpush3.bf16.msra.mxu0 %v619_v11 }
  0x34   : > { %624 = vmatprep.subr.bf16.mxu0 %v623_v15 }
  0x37   : > { %626 = vmatpush3.bf16.msra.mxu0 %v623_v15 }
  0x38   : > { %628 = vmatprep.subr.bf16.mxu0 %v627_v18 }
  0x3b   : > { %630 = vmatpush3.bf16.msra.mxu0 %v627_v18 }
  0x3c   : > { %632 = vmatprep.subr.bf16.mxu0 %v631_v21 }
  0x3f   : > { %634 = vmatpush3.bf16.msra.mxu0 %v631_v21 }
  0x40   : > { %636 = vmatprep.subr.bf16.mxu0 %v635_v24 }
  0x43   : > { %638 = vmatpush3.bf16.msra.mxu0 %v635_v24 }
  0x44   : > { %640 = vmatprep.subr.bf16.mxu0 %v639_v27 }
  0x47   : > { %642 = vmatpush3.bf16.msra.mxu0 %v639_v27 }
  0x4a   : > { %609 = vmatmul.mubr.f32.vlgmr.msra.gmra.mrb[0].mxu0 %v318_v28 }
 0x11b   : > { %417 = sbr.rel (%p553_p11) target bundleno = 300 (0x12c), region = 78 }
 0x11d   : > { %v610_v31 = vpop.f32.mrb[0].mxu0 }
 0x11e   : > { %v411_v32 = vadd.f32 %v610_v31, %v316_v29  ;;  %v401_v33 = vpop.f32.mrb[1].mxu0 }
 0x11f   : > { %v410_v34 = vadd.f32 %v401_v33, %v315_v30 }
 0x120   : > { %413 = vst [vmem:[#allocation2 + $0x8] sm:$0xff] %v411_v32 }
 0x121   : > { %412 = vst [vmem:[#allocation2] sm:$0xff] %v410_v34 }
 0x127   : > { %v419_v37 = vld [vmem:[#allocation2 + $0x8] sm:$0xff] }
 0x128   : > { %v418_v35 = vld [vmem:[#allocation2] sm:$0xff]  ;;  %v423_v40 = vadd.f32 %v421_v39, %v419_v37 }
 0x129   : > { %v422_v38 = vadd.f32 %v420_v36, %v418_v35 }
 0x12a   : > { %425 = vst [vmem:[%s852_s3 + $0x8] sm:$0xff] %v423_v40 }
 0x12b   : > { %424 = vst [vmem:[%s852_s3] sm:$0xff] %v422_v38 }
 0x12c PF: > { %s13_s16 = sadd.s32 1, %s722_s16   ;;  %s853_s12 = smov %s710_s13 }
 0x12d   : > { %p10_p12 = scmp.ge.s32.totalorder %s13_s16, 4   ;;  %s854_s13 = smov %s780_s20 }
 0x12e   : > { %s855_s14 = smov %s718_s15  ;;  %s856_s15 = smov %s858_s17 }
 0x12f   :  { %12 = sbr.rel (!%p10_p12) target bundleno = 3 (0x3), region = 119 }

// kernel: neuro_t5_forward.61
= control target key start
LH: loop header
LB: loop body
LE: loop exit
PB: predicated region body
PF: predicated region fallthrough
CT: control target
= control target key end

     0   :  { %11 = vsyncpa [#allocation7], 0  ;;  %s1266_s0 = inlined_call_operand.vmem [shape: f32[16,128], index: 0, kind: input, shape index: {}]   ;;  %s1267_s1 = inlined_call_operand.vmem [shape: f32[1,128], index: 1, kind: input, shape index: {}]   ;;  %s1268_s2 = inlined_call_operand.vmem [shape: f32[128,384], index: 2, kind: input, shape index: {}]   ;;  %s1269_s3 = inlined_call_operand.vmem [shape: s32[16,1], index: 3, kind: input, shape index: {}]   ;;  %s1270_s4 = inlined_call_operand.hbm [shape: f32[16,384], index: 4, kind: output, shape index: {0}]   ;;  %s1271_s5 = inlined_call_operand.vmem [shape: f32[16,1], index: 5, kind: output, shape index: {1}]  }
   0x1   :  { %13 = vsyncpa [#allocation7 + $0x1], 0  ;;  %s1069_s18 = smov 0   ;;  %s1071_s19 = smov 0  }
   0x2   :  { %s1073_s20 = smov 0   ;;  %s1075_s21 = smov 0  }
   0x3   :  { %s1077_s22 = smov 0   ;;  %s1079_s23 = smov 0  }
   0x4 LB: > { %s767_s24 = sadd.s32 4294967295, %s1030_s23   ;;  %s768_s25 = sadd.s32 4294967294, %s1030_s23   ;;  %s1030_s23 = sphi %s1079_s23, %s19_s23   ;;  %s1026_s22 = sphi %s1077_s22, %s1278_s22   ;;  %s1022_s21 = sphi %s1075_s21, %s1277_s21   ;;  %s1018_s20 = sphi %s1073_s20, %s1276_s20   ;;  %s1014_s19 = sphi %s1071_s19, %s1275_s19   ;;  %s1010_s18 = sphi %s1069_s18, %s1274_s18  }
   0x5   : > { %s28_s26 = sadd.s32 1, %s1026_s22  ;;  %s85_s27 = sadd.s32 1, %s1018_s20 }
   0x6   : > { %p29_p0 = scmp.ge.s32.totalorder %s28_s26, 3  ;;  %p92_p1 = scmp.ne.s32.totalorder %s1018_s20, %s1014_s19 }
   0x7   : > { %p93_p2 = scmp.eq.s32.totalorder %s1030_s23, 0  ;;  %p150_p3 = scmp.eq.s32.totalorder %s767_s24, 2 }
   0x8   : > { %s1280_s26 = smov (%p29_p0, %s28_s26), 0  ;;  %p155_p6 = scmp.ne.s32.totalorder %s1014_s19, %s1010_s18 }
   0x9   : > { %p94_p4 = por %p93_p2, %p92_p1  ;;  %p1108_p5 = por %p150_p3, %p92_p1 }
   0xa   : > { %s82_s29 = ssub.s32 %s1026_s22, %s1280_s26  ;;  %p156_p8 = scmp.eq.s32.totalorder %s768_s25, 2 }
   0xb   : > { %p83_p7 = scmp.eq.s32.totalorder %s82_s29, 0  ;;  %p772_p10 = scmp.ge.s32.totalorder %s1030_s23, 3 }
   0xc   : > { %p1119_p9 = por %p156_p8, %p155_p6 }
   0xd   : > { %s1117_s30 = scalar_select %p83_p7, %s1018_s20, %s85_s27  }
   0xe   : > { %219 = sbr.rel (%p772_p10) target bundleno = 33 (0x21), region = 28 }
  0x15   : > { %222 = sbr.rel (!%p94_p4) target bundleno = 33 (0x21), region = 32  ;;  %s224_s7 = sand.u32 (%p94_p4), 1, %s1018_s20  }
  0x16   : > { %s774_s8 = sshll.u32 (%p94_p4), %s1026_s22, 3  ;;  %s773_s9 = sshll.u32 (%p94_p4), %s224_s7, 7 }
  0x17   : > { %s1129_s12 = scalar_lea.vmem (%p94_p4), %s1268_s2, %s774_s8  ;;  %s226_s13 = scalar_lea.vmem (%p94_p4), [#allocation5], %s773_s9 }
  0x18   : > { %v286_v0 = vld [vmem:[%s1129_s12] sm:$0xff] (%p94_p4)  ;;  %v288_v1 = vld [vmem:[%s1129_s12 + $0x18] sm:$0xff] (%p94_p4)  ;;  %v290_v2 = vld [vmem:[%s1129_s12 + $0x30] sm:$0xff] (%p94_p4) }
  0x19   : > { %287 = vst [vmem:[%s226_s13] sm:$0xff] (%p94_p4), %v286_v0  ;;  %289 = vst [vmem:[%s226_s13 + $0x8] sm:$0xff] (%p94_p4), %v288_v1  ;;  %v292_v3 = vld [vmem:[%s1129_s12 + $0x48] sm:$0xff] (%p94_p4)  ;;  %v294_v4 = vld [vmem:[%s1129_s12 + $0x60] sm:$0xff] (%p94_p4) }
  0x1a   : > { %291 = vst [vmem:[%s226_s13 + $0x10] sm:$0xff] (%p94_p4), %v290_v2  ;;  %v296_v5 = vld [vmem:[%s1129_s12 + $0x78] sm:$0xff] (%p94_p4)  ;;  %293 = vst [vmem:[%s226_s13 + $0x18] sm:$0xff] (%p94_p4), %v292_v3  ;;  %v298_v6 = vld [vmem:[%s1129_s12 + $0x90] sm:$0xff] (%p94_p4) }
  0x1b   : > { %295 = vst [vmem:[%s226_s13 + $0x20] sm:$0xff] (%p94_p4), %v294_v4  ;;  %297 = vst [vmem:[%s226_s13 + $0x28] sm:$0xff] (%p94_p4), %v296_v5  ;;  %v300_v7 = vld [vmem:[%s1129_s12 + $0xa8] sm:$0xff] (%p94_p4)  ;;  %v302_v8 = vld [vmem:[%s1129_s12 + $0xc0] sm:$0xff] (%p94_p4) }
  0x1c   : > { %299 = vst [vmem:[%s226_s13 + $0x30] sm:$0xff] %v298_v6  ;;  %301 = vst [vmem:[%s226_s13 + $0x38] sm:$0xff] %v300_v7  ;;  %v304_v9 = vld [vmem:[%s1129_s12 + $0xd8] sm:$0xff]  ;;  %v306_v10 = vld [vmem:[%s1129_s12 + $0xf0] sm:$0xff] }
  0x1d   : > { %303 = vst [vmem:[%s226_s13 + $0x40] sm:$0xff] %v302_v8  ;;  %v308_v11 = vld [vmem:[%s1129_s12 + $0x108] sm:$0xff]  ;;  %305 = vst [vmem:[%s226_s13 + $0x48] sm:$0xff] %v304_v9  ;;  %v310_v12 = vld [vmem:[%s1129_s12 + $0x120] sm:$0xff] }
  0x1e   : > { %307 = vst [vmem:[%s226_s13 + $0x50] sm:$0xff] %v306_v10  ;;  %309 = vst [vmem:[%s226_s13 + $0x58] sm:$0xff] %v308_v11  ;;  %v312_v13 = vld [vmem:[%s1129_s12 + $0x138] sm:$0xff]  ;;  %v314_v14 = vld [vmem:[%s1129_s12 + $0x150] sm:$0xff] }
  0x1f   : > { %311 = vst [vmem:[%s226_s13 + $0x60] sm:$0xff] %v310_v12  ;;  %313 = vst [vmem:[%s226_s13 + $0x68] sm:$0xff] %v312_v13  ;;  %v316_v15 = vld [vmem:[%s1129_s12 + $0x168] sm:$0xff] }
  0x20   : > { %315 = vst [vmem:[%s226_s13 + $0x70] sm:$0xff] %v314_v14  ;;  %317 = vst [vmem:[%s226_s13 + $0x78] sm:$0xff] %v316_v15 }
  0x21 PF: > { %p775_p11 = scmp.ge.s32.totalorder %s1030_s23, 1  ;;  %p322_p12 = scmp.lt.s32.totalorder %s1030_s23, 4 }
  0x23   : > { %p323_p13 = pnand %p775_p11, %p322_p12 }
  0x24   : > { %s1150_s14 = sand.u32 (!%p323_p13), 1, %s1014_s19   ;;  %p778_p0 = scmp.ne.s32.totalorder (!%p323_p13), %s1022_s21, 0 }
  0x25   : > { %326 = sbr.rel (%p323_p13) target bundleno = 919 (0x397), region = 70  ;;  %s776_s15 = sshll.u32 (!%p323_p13), %s1150_s14, 7 }
  0x26   : > { %s777_s16 = sshll.u32 (!%p323_p13), %s1150_s14, 4  ;;  %s1154_s17 = scalar_lea.vmem (!%p323_p13), [#allocation5], %s776_s15 }
  0x27   : > { %s1156_s24 = scalar_lea.vmem (!%p323_p13), [#allocation6], %s777_s16 }
  0x2c   : > { %393 = sbr.rel (%p778_p0) target bundleno = 51 (0x33), region = 78  ;;  %vm394_vm0 = vcmask (!%p778_p0), 7168   ;;  %v1032_v16 = vmov (!%p778_p0), -1e+30   ;;  %v1033_v17 = vmov (!%p778_p0), 0.0  }
  0x2d   : > { %395 = vst.msk [vmem:[#allocation2] sm:$0xff] (!%p778_p0), %vm394_vm0, %v1032_v16  ;;  %396 = vst.msk [vmem:[#allocation2 + $0x8] sm:$0xff] (!%p778_p0), %vm394_vm0, %v1032_v16 }
  0x2e   : > { %397 = vst.msk [vmem:[#allocation3] sm:$0xff] (!%p778_p0), %vm394_vm0, %v1033_v17  ;;  %398 = vst.msk [vmem:[#allocation3 + $0x8] sm:$0xff] (!%p778_p0), %vm394_vm0, %v1033_v17 }
  0x2f   : > { %399 = vst.msk [vmem:[#allocation4] sm:$0xff] (!%p778_p0), %vm394_vm0, %v1033_v17  ;;  %400 = vst.msk [vmem:[#allocation4 + $0x8] sm:$0xff] (!%p778_p0), %vm394_vm0, %v1033_v17 }
  0x33 PF: > { %v401_v18 = vld [vmem:[%s1266_s0] sm:$0xff]  ;;  %v402_v19 = vld [vmem:[%s1266_s0 + $0x8] sm:$0xff]  ;;  %v427_v20 = vld [vmem:[%s1154_s17] sm:$0xff]  ;;  %v1034_v61 = vmov 0   ;;  %vm545_vm1 = vcmask 7168   ;;  %v523_v8 = vlaneseq  ;;  %s780_s15 = sshll.u32 %s1022_s21, 7 }
  0x34   : > { %v403_v21 = vmul.f32 %v401_v18, %v401_v18  ;;  %v428_v22 = vld [vmem:[%s1154_s17 + $0x8] sm:$0xff]  ;;  %v429_v23 = vld [vmem:[%s1154_s17 + $0x10] sm:$0xff]  ;;  %v430_v24 = vld [vmem:[%s1154_s17 + $0x18] sm:$0xff]  ;;  %v404_v27 = vmul.f32 %v402_v19, %v402_v19  ;;  %934 = vset.pattern.permute.xlu0 %v1034_v61  ;;  %935 = vset.pattern.permute.xlu1 %v1034_v61  ;;  %v525_v12 = vstv %s780_s15  ;;  %p781_p1 = scmp.ne.s32.totalorder %s1022_s21, 2 }
  0x35   : > { %v841_v25 = vpack.c.bf16 %v428_v22, %v427_v20  ;;  %v845_v26 = vpack.c.bf16 %v430_v24, %v429_v23  ;;  %v431_v28 = vld [vmem:[%s1154_s17 + $0x20] sm:$0xff]  ;;  %v432_v29 = vld [vmem:[%s1154_s17 + $0x28] sm:$0xff]  ;;  %v433_v31 = vld [vmem:[%s1154_s17 + $0x30] sm:$0xff]  ;;  %v524_v11 = vand.u32 127, %v523_v8 }
  0x36   : > { %405 = vadd.xlane.f32.xlu0 %v403_v21  ;;  %v849_v30 = vpack.c.bf16 %v432_v29, %v431_v28  ;;  %v434_v32 = vld [vmem:[%s1154_s17 + $0x38] sm:$0xff]  ;;  %v435_v34 = vld [vmem:[%s1154_s17 + $0x40] sm:$0xff]  ;;  %v436_v35 = vld [vmem:[%s1154_s17 + $0x48] sm:$0xff] }
  0x37   : > { %842 = vmatprep.subr.bf16.mxu0 %v841_v25  ;;  %v853_v33 = vpack.c.bf16 %v434_v32, %v433_v31  ;;  %v857_v36 = vpack.c.bf16 %v436_v35, %v435_v34  ;;  %v437_v37 = vld [vmem:[%s1154_s17 + $0x50] sm:$0xff]  ;;  %v438_v38 = vld [vmem:[%s1154_s17 + $0x58] sm:$0xff]  ;;  %v439_v39 = vld [vmem:[%s1154_s17 + $0x60] sm:$0xff]  ;;  %v526_v16 = vadd.s32 %v525_v12, %v524_v11 }
  0x38   : > { %844 = vmatpush3.bf16.msra.mxu0 %v841_v25  ;;  %v861_v40 = vpack.c.bf16 %v438_v38, %v437_v37  ;;  %v440_v41 = vld [vmem:[%s1154_s17 + $0x68] sm:$0xff]  ;;  %v441_v43 = vld [vmem:[%s1154_s17 + $0x70] sm:$0xff]  ;;  %v442_v44 = vld [vmem:[%s1154_s17 + $0x78] sm:$0xff] }
  0x39   : > { %846 = vmatprep.subr.bf16.mxu0 %v845_v26  ;;  %v865_v42 = vpack.c.bf16 %v440_v41, %v439_v39  ;;  %v869_v45 = vpack.c.bf16 %v442_v44, %v441_v43  ;;  %v779_v53 = vld [vmem:[%s1267_s1] ss:$0 sm:$0xff]  ;;  %v549_v1 = vld [vmem:[#allocation2 + $0x8] sm:$0xff]  ;;  %v557_v37 = vld [vmem:[#allocation3 + $0x8] sm:$0xff] }
  0x3a   : > { %407 = vadd.xlane.f32.xlu0 %v404_v27  ;;  %v548_v62 = vld [vmem:[#allocation2] sm:$0xff]  ;;  %v521_v7 = vld [vmem:[%s1269_s3 + $0x8] sm:$0xff] }
  0x3b   : > { %v520_v6 = vld [vmem:[%s1269_s3] sm:$0xff]  ;;  %v528_v31 = vld [vmem:[#allocation4 + $0x8] sm:$0xff] }
  0x3c   : > { %848 = vmatpush3.bf16.msra.mxu0 %v845_v26  ;;  %v527_v26 = vld [vmem:[#allocation4] sm:$0xff] }
  0x3d   : > { %850 = vmatprep.subr.bf16.mxu0 %v849_v30 }
  0x40   : > { %852 = vmatpush3.bf16.msra.mxu0 %v849_v30  ;;  %v556_v30 = vld [vmem:[#allocation3] sm:$0xff] }
  0x41   : > { %854 = vmatprep.subr.bf16.mxu0 %v853_v33 }
  0x44   : > { %856 = vmatpush3.bf16.msra.mxu0 %v853_v33 }
  0x45   : > { %858 = vmatprep.subr.bf16.mxu0 %v857_v36 }
  0x48   : > { %860 = vmatpush3.bf16.msra.mxu0 %v857_v36 }
  0x49   : > { %862 = vmatprep.subr.bf16.mxu0 %v861_v40 }
  0x4c   : > { %864 = vmatpush3.bf16.msra.mxu0 %v861_v40 }
  0x4d   : > { %866 = vmatprep.subr.bf16.mxu0 %v865_v42 }
  0x50   : > { %868 = vmatpush3.bf16.msra.mxu0 %v865_v42 }
  0x51   : > { %870 = vmatprep.subr.bf16.mxu0 %v869_v45 }
  0x54   : > { %872 = vmatpush3.bf16.msra.mxu0 %v869_v45 }
  0xc3   : > { %v406_v46 = vpop.xlane.xlu0 %405 }
  0xc4   : > { %v410_v47 = vmul.f32 0.0078125, %v406_v46 }
  0xc6   : > { %v412_v48 = vadd.f32 1e-06, %v410_v47 }
  0xc7   : > { %v408_v49 = vpop.xlane.xlu0 %407 }
  0xc8   : > { %936 = vrsqrt.f32 %v412_v48  ;;  %v411_v50 = vmul.f32 0.0078125, %v408_v49 }
  0xca   : > { %v413_v51 = vadd.f32 1e-06, %v411_v50 }
  0xcc   : > { %938 = vrsqrt.f32 %v413_v51 }
  0xd2   : > { %v937_v52 = vpop.eup %936 }
  0xd3   : > { %v416_v54 = vmul.f32 %v937_v52, %v401_v18 }
  0xd5   : > { %v425_v55 = vmul.f32 %v779_v53, %v416_v54 }
  0xd6   : > { %v939_v56 = vpop.eup %938 }
  0xd7   : > { %v417_v57 = vmul.f32 %v939_v56, %v402_v19  ;;  %838 = vmatprep.mubr.f32.mxu0 %v425_v55 }
  0xd9   : > { %v426_v58 = vmul.f32 %v779_v53, %v417_v57 }
  0xdb   : > { %839 = vmatmul.mubr.f32.vlgmr.msra.gmra.mrb[0].mxu0 %v426_v58 }
 0x1ae   : > { %v840_v59 = vpop.f32.mrb[0].mxu0 }
 0x1af   : > { %519 = vst [vmem:[%s1156_s24 + $0x8] sm:$0xff] %v840_v59  ;;  %v509_v60 = vpop.f32.mrb[1].mxu0 }
 0x1b0   : > { %518 = vst [vmem:[%s1156_s24] sm:$0xff] %v509_v60  ;;  %550 = vmax.xlane.f32.xlu1 %v509_v60 }
 0x1b4   : > { %552 = vmax.xlane.f32.xlu1 %v840_v59 }
 0x23d   : > { %v551_v63 = vpop.xlane.xlu1 %550 }
 0x23e   : > { %v554_v0 = vmax.f32 %v548_v62, %v551_v63 }
 0x240   : > { %v558_v2 = vsub.f32 %v548_v62, %v554_v0  ;;  %590 = vst.msk [vmem:[#allocation2] sm:$0xff] %vm545_vm1, %v554_v0  ;;  %568 = vperm.xlu0 %934, %v554_v0  }
 0x241   : > { %v553_v3 = vpop.xlane.xlu1 %552 }
 0x242   : > { %v555_v4 = vmax.f32 %v549_v1, %v553_v3  ;;  %v560_v24 = vmul.f32 1.442695, %v558_v2 }
 0x244   : > { %v559_v5 = vsub.f32 %v549_v1, %v555_v4  ;;  %591 = vst.msk [vmem:[#allocation2 + $0x8] sm:$0xff] %vm545_vm1, %v555_v4  ;;  %573 = vperm.xlu1 %935, %v555_v4  }
 0x246   : > { %v562_v25 = vmul.f32 1.442695, %v559_v5 }
 0x247   : > { %v596_v45 = vld [vmem:[#allocation2] sm:$0xff] (!%p781_p1) }
 0x248   : > { %530 = vperm.xlu1 %935, %v520_v6  }
 0x24b   : > { %v597_v48 = vld [vmem:[#allocation2 + $0x8] sm:$0xff] (!%p781_p1) }
 0x24c   : > { %533 = vperm.xlu1 %935, %v521_v7  }
 0x2bf   : > { %v569_v9 = vpop.permute.xlu0 %568 }
 0x2c0   : > { %v576_v10 = vsub.f32 %v509_v60, %v569_v9 }
 0x2c2   : > { %v578_v13 = vmul.f32 1.442695, %v576_v10 }
 0x2c3   : > { %v574_v14 = vpop.permute.xlu1 %573 }
 0x2c4   : > { %940 = vpow2.f32 %v578_v13  ;;  %v577_v15 = vsub.f32 %v840_v59, %v574_v14 }
 0x2c6   : > { %v580_v17 = vmul.f32 1.442695, %v577_v15 }
 0x2c7   : > { %v531_v18 = vpop.permute.xlu1 %530 }
 0x2c8   : > { %942 = vpow2.f32 %v580_v17  ;;  %vm535_vm2 = vcmp.eq.s32.totalorder %v526_v16, %v531_v18 }
 0x2c9   : > { %v537_v19 = vsel %vm535_vm2, %v509_v60, 0.0  ;;  %944 = vpow2.f32 %v560_v24 }
 0x2ca   : > { %539 = vadd.xlane.f32.xlu1 %v537_v19  ;;  %946 = vpow2.f32 %v562_v25 }
 0x2cb   : > { %v534_v20 = vpop.permute.xlu1 %533 }
 0x2cc   : > { %vm536_vm3 = vcmp.eq.s32.totalorder %v526_v16, %v534_v20 }
 0x2cd   : > { %v538_v21 = vsel %vm536_vm3, %v840_v59, 0.0 }
 0x2ce   : > { %v941_v22 = vpop.eup %940  ;;  %541 = vadd.xlane.f32.xlu0 %v538_v21 }
 0x2cf   : > { %582 = vadd.xlane.f32.xlu1 %v941_v22 }
 0x2d2   : > { %v943_v23 = vpop.eup %942 }
 0x2d3   : > { %584 = vadd.xlane.f32.xlu1 %v943_v23  ;;  %v945_v28 = vpop.eup %944 }
 0x2d4   : > { %v564_v33 = vmul.f32 %v945_v28, %v556_v30  ;;  %v947_v34 = vpop.eup %946 }
 0x2d5   : > { %v565_v39 = vmul.f32 %v947_v34, %v557_v37 }
 0x357   : > { %v540_v27 = vpop.xlane.xlu1 %539 }
 0x358   : > { %v543_v29 = vadd.f32 %v540_v27, %v527_v26 }
 0x35a   : > { %546 = vst.msk [vmem:[#allocation4] sm:$0xff] %vm545_vm1, %v543_v29 }
 0x35b   : > { %v542_v32 = vpop.xlane.xlu0 %541 }
 0x35c   : > { %v544_v35 = vadd.f32 %v542_v32, %v528_v31  ;;  %v583_v36 = vpop.xlane.xlu1 %582 }
 0x35d   : > { %v586_v38 = vadd.f32 %v583_v36, %v564_v33  ;;  %595 = sbr.rel (%p781_p1) target bundleno = 893 (0x37d), region = 82 }
 0x35e   : > { %547 = vst.msk [vmem:[#allocation4 + $0x8] sm:$0xff] %vm545_vm1, %v544_v35 }
 0x35f   : > { %588 = vst.msk [vmem:[#allocation3] sm:$0xff] %vm545_vm1, %v586_v38 }
 0x360   : > { %v585_v40 = vpop.xlane.xlu1 %584 }
 0x361   : > { %v587_v41 = vadd.f32 %v585_v40, %v565_v39  ;;  %v606_v49 = vld [vmem:[#allocation4] sm:$0xff] (!%p781_p1) }
 0x363   : > { %589 = vst.msk [vmem:[#allocation3 + $0x8] sm:$0xff] %vm545_vm1, %v587_v41 }
 0x365   : > { %v607_v52 = vld [vmem:[#allocation4 + $0x8] sm:$0xff] }
 0x366   : > { %v598_v42 = vld [vmem:[#allocation3] sm:$0xff] }
 0x367   : > { %948 = vlog2.f32 %v598_v42 }
 0x36a   : > { %v599_v43 = vld [vmem:[#allocation3 + $0x8] sm:$0xff] }
 0x36b   : > { %950 = vlog2.f32 %v599_v43 }
 0x371   : > { %v949_v44 = vpop.eup %948 }
 0x372   : > { %v601_v47 = vmul.f32 0.6931472, %v949_v44 }
 0x374   : > { %v604_v51 = vadd.f32 %v601_v47, %v596_v45 }
 0x375   : > { %v951_v46 = vpop.eup %950 }
 0x376   : > { %v603_v50 = vmul.f32 0.6931472, %v951_v46  ;;  %v608_v54 = vsub.f32 %v604_v51, %v606_v49 }
 0x378   : > { %v605_v53 = vadd.f32 %v603_v50, %v597_v48  ;;  %610 = vst.msk [vmem:[%s1271_s5] sm:$0xff] %vm545_vm1, %v608_v54 }
 0x37a   : > { %v609_v55 = vsub.f32 %v605_v53, %v607_v52 }
 0x37c   : > { %611 = vst.msk [vmem:[%s1271_s5 + $0x8] sm:$0xff] %vm545_vm1, %v609_v55 }
 0x37d PF: > { %s1215_s8 = scalar_lea.hbm %s1270_s4, %s780_s15  ;;  %s633_s9 = sshll.u32 %s1156_s24, 4  ;;  %s1218_s9 = int_to_ptr.vmem [resolvable:$true] %s633_s9 }
 0x37e   : > { %s613_s10 = scalar_lea.sflag [#allocation7], %s1150_s14  ;;  %s952_s11 = scalar_lea.vmem %s1218_s9, 256 }
 0x37f   : > { %p953_p2 = scmp.ne.s32.totalorder %s1218_s9, %s952_s11  ;;  %s1035_s21 = smov [#allocation6]  }
 0x380   : > { %s956_s12 = sshll.u32 %s1035_s21, 4  ;;  %s957_s12 = int_to_ptr.vmem [resolvable:$false] %s956_s12 }
 0x381   : > { %p954_p3 = pnand %p953_p2, %p1108_p5  ;;  %s958_s13 = scalar_lea.vmem %s957_s12, 512 }
 0x382   : > { %p959_p6 = scmp.lt.s32.totalorder %s1218_s9, %s957_s12  ;;  %p960_p7 = scmp.lt.s32.totalorder %s958_s13, %s952_s11 }
 0x383   : > { %p955_p4 = pneg %p954_p3 }
 0x384   : > { %p961_p8 = por %p960_p7, %p959_p6 }
 0x386   : > { %p962_p10 = pnand %p961_p8, %p955_p4 }
 0x388   : > { %965 = shalt.err (!%p962_p10)
}
 0x389   : > { %s966_s24 = scalar_lea.hbm %s1215_s8, 256  ;;  %s970_s17 = scalar_lea.hbm %s1270_s4, 768 }
 0x38a   : > { %p967_p11 = scmp.ne.s32.totalorder %s1215_s8, %s966_s24  ;;  %p971_p0 = scmp.lt.u32.totalorder %s1215_s8, %s1270_s4 }
 0x38b   : > { %p972_p1 = scmp.lt.u32.totalorder %s970_s17, %s966_s24  ;;  %p974_p3 = scmp.lt.u32.totalorder %s966_s24, %s1215_s8 }
 0x38c   : > { %p968_p12 = pnand %p967_p11, %p1108_p5 }
 0x38d   : > { %p973_p2 = por %p972_p1, %p971_p0 }
 0x38e   : > { %p969_p13 = pneg %p968_p12 }
 0x38f   : > { %p975_p4 = por %p974_p3, %p973_p2 }
 0x391   : > { %p976_p6 = pnand %p975_p4, %p969_p13 }
 0x393   : > { %979 = shalt.err (!%p976_p6)
}
 0x394   : > { %s1036_s29 = smov 128   ;;  %s1037_s7 = smov 384  }
 0x395   : > { %s1038_s11 = smov 8  }
 0x396   : > { %873 = dma.vmem_to_hbm [thread:$0]  (%p1108_p5), %s1218_s9, 256, %s1215_s8, %s613_s10, %s1036_s29, %s1037_s7, %s1038_s11  }
 0x397 PF: > { %p879_p7 = scmp.ge.s32.totalorder %s1030_s23, 2  ;;  %s660_s21 = sand.u32 1, %s1010_s18  }
 0x398   : > { %s661_s12 = scalar_lea.sflag [#allocation7], %s660_s21 }
 0x399   : > { %p876_p8 = pnand %p879_p7, %p1119_p9 }
 0x39b   : > { %1005 = dma.done.wait (!%p876_p8), %s661_s12, 256  }
 0x39c   : > { %1007 = vsyncadd (!%p876_p8), %s661_s12, 4294967040  ;;  %s19_s23 = sadd.s32 1, %s1030_s23   ;;  %s1274_s18 = smov %s1014_s19 }
 0x39d   : > { %p16_p10 = scmp.ge.s32.totalorder %s19_s23, 5   ;;  %s1275_s19 = smov %s1018_s20 }
 0x39e   : > { %s1276_s20 = smov %s1117_s30  ;;  %s1277_s21 = smov %s1026_s22 }
 0x39f   : > { %s1278_s22 = smov %s1280_s26  ;;  %18 = sbr.rel (!%p16_p10) target bundleno = 4 (0x4), region = 140 }
 0x3a6   :  { %666 = vsyncpa [#allocation7], 1 }
 0x3a7   :  { %668 = vsyncpa [#allocation7 + $0x1], 1 }

</bundles_post_ra>
